<compile_context>
chip_gen: v7x
topology: tpu7x:2x2x1
jax: 0.10.0
libtpu: 0.0.40
codegen_flags: <defaults>
</compile_context>

<pallas_src>
import functools

import numpy as np
import jax
import jax.numpy as jnp
from jax import lax
from jax.experimental import pallas as pl
from jax.experimental.pallas import tpu as pltpu

_K1_PAD = 128      # conv1 im2col channels (9*cin) padded to a full lane group
_OUT_PAD = 128     # fc2 outputs padded to a full lane group
_MAX_BLOCK_B = 16  # images per grid step (batch becomes the FC matmul M dim)


def _r8(n):
    return -(-n // 8) * 8


def _geometry(h, w):
    """Static row counts of the flat zero-padded layout for each conv layer."""
    layers = []
    for pooled in (True, True, False):
        wp = w + 2
        if pooled:
            n_pool = _r8((h - 2) * wp + (w - 2) + 1)   # pool windows we may select
            n_acc = _r8(n_pool + wp + 1)               # conv rows feeding them
        else:
            n_pool = 0
            n_acc = _r8((h - 1) * wp + w)              # valid conv rows only
        n_in = _r8(max(n_acc + 2 * wp + 2, (h + 2) * wp))
        layers.append(dict(h=h, w=w, wp=wp, n_in=n_in, n_acc=n_acc, n_pool=n_pool))
        if pooled:
            h, w = h // 2, w // 2
    return layers


def _selection_matrix(prev, nxt):
    """0/1 matrix: pool windows at even positions of `prev`'s flat grid ->
    interior of `nxt`'s zero-padded flat grid (padding rows stay all-zero)."""
    s = np.zeros((nxt['n_in'], prev['n_pool']), np.float32)
    for i in range(nxt['h']):
        for j in range(nxt['w']):
            s[(i + 1) * nxt['wp'] + (j + 1), 2 * i * prev['wp'] + 2 * j] = 1.0
    return s


# ---------------------------- fused kernel ----------------------------------

def _fed_forward_kernel(x_ref, w1_ref, b1_ref, w2_ref, b2_ref, w3_ref, b3_ref,
                        s2_ref, s3_ref, wf1_ref, bf1_ref, wf2_ref, bf2_ref,
                        o_ref, a3_scr, *, geom):
    f32, bf16 = jnp.float32, jnp.bfloat16
    g1, g2, g3 = geom
    bb = x_ref.shape[0]                      # images in this batch block

    def conv3x3_relu(x_bf, w_ref, b_ref, wp, n_rows):
        # x_bf: (rows, Cin) bf16 flat zero-padded image; the 9 taps are
        # contiguous row-shifted slices -> 9 accumulated MXU matmuls (bf16
        # operands, f32 accumulation).  Accumulator starts from tap 0's dot.
        acc = jnp.dot(x_bf[0:n_rows, :], w_ref[0], preferred_element_type=f32)
        for k in range(1, 9):
            dy, dx = divmod(k, 3)
            off = dy * wp + dx
            acc = acc + jnp.dot(x_bf[off:off + n_rows, :], w_ref[k],
                                preferred_element_type=f32)
        return jnp.maximum(acc + b_ref[...], 0.0)   # bias + ReLU in f32

    def maxpool2x2(acc, wp, n_out):
        # 2x2 window max with the window's top-left corner at every flat pos.
        return jnp.maximum(
            jnp.maximum(acc[0:n_out, :], acc[1:n_out + 1, :]),
            jnp.maximum(acc[wp:wp + n_out, :], acc[wp + 1:wp + n_out + 1, :]))

    def per_image(b, carry):
        # conv1 + ReLU (16x16x3 -> 16x16x32): ONE K=128 matmul on the wrapper's
        # im2col rows (all 9 taps on lanes), then 2x2 maxpool.
        a1 = jnp.dot(x_ref[b], w1_ref[...], preferred_element_type=f32)
        a1 = jnp.maximum(a1 + b1_ref[...], 0.0)
        p1 = maxpool2x2(a1, g1['wp'], g1['n_pool'])
        # 0/1 selection matmul: keep even-position pool windows and re-embed
        # them into conv2's zero-padded flat layout (padding rows stay zero).
        x2 = jnp.dot(s2_ref[...], p1.astype(bf16),
                     preferred_element_type=f32).astype(bf16)

        # conv2 + ReLU + maxpool   (8x8x32 -> 4x4x64)
        a2 = conv3x3_relu(x2, w2_ref, b2_ref, g2['wp'], g2['n_acc'])
        p2 = maxpool2x2(a2, g2['wp'], g2['n_pool'])
        x3 = jnp.dot(s3_ref[...], p2.astype(bf16),
                     preferred_element_type=f32).astype(bf16)

        # conv3 + ReLU             (4x4x64 -> 4x4x128).  adaptive_avg_pool2d
        # ((4,4)) is the identity for a 4x4 map, so nothing to do for it here.
        a3 = conv3x3_relu(x3, w3_ref, b3_ref, g3['wp'], g3['n_acc'])
        a3_scr[b] = a3                       # (n_acc3, 128) f32 per image
        return carry

    lax.fori_loop(0, bb, per_image, 0)

    # Batched fully-connected head: batch is the M dim, so fc1/fc2 weights are
    # pushed through the MXU once per block of bb images.  The NCHW flatten is
    # folded into wf1's per-spatial-position blocks, and the padded-grid junk
    # rows of a3 are simply never read.
    acc = None
    for hh in range(g3['h']):
        for ww in range(g3['w']):
            lhs = a3_scr[:, hh * g3['wp'] + ww, :].astype(bf16)     # (bb, C3)
            part = jnp.dot(lhs, wf1_ref[hh * g3['w'] + ww],
                           preferred_element_type=f32)
            acc = part if acc is None else acc + part
    h = jnp.maximum(acc + bf1_ref[...], 0.0)                        # (bb, 512)

    # fc2 (outputs lane-padded to 128 -> unmasked store; sliced in wrapper)
    o_ref[...] = (jnp.dot(h.astype(bf16), wf2_ref[...],
                          preferred_element_type=f32) + bf2_ref[...])


# ------------------------------ wrapper --------------------------------------

def fed_model_forward(params, x_nchw, *, block_b=_MAX_BLOCK_B):
    n, cin, hh, ww = x_nchw.shape
    assert (hh, ww) == (16, 16), "fused kernel is specialized to 16x16 inputs"
    # TODO(synk): adaptive_avg_pool2d is only handled for the case where conv3's
    # feature map is already 4x4 (identity); other resolutions are unsupported.

    geom = _geometry(hh, ww)
    g1, g2, g3 = geom
    out_dim = params['fc2_w'].shape[0]
    hidden = params['fc1_w'].shape[0]
    c1 = params['conv1_w'].shape[0]
    c3 = params['conv3_w'].shape[0]
    k1 = 9 * cin

    # ---- batch blocking: bb images per grid step ----
    if n <= block_b:
        bb, n_pad = n, n
    else:
        bb = block_b
        n_pad = pl.cdiv(n, bb) * bb

    # ---- conv1 im2col input: (n_pad, n_acc1, 128) bf16, taps on lanes ----
    # Row r = i*wp + j of an image holds the 9*cin values of the 3x3 window at
    # padded position (i, j); rows with j >= w or i >= h are junk and are never
    # selected downstream (pool/selection only touch valid even positions).
    x = jnp.transpose(x_nchw, (0, 2, 3, 1)).astype(jnp.float32)          # NHWC
    xp = jnp.pad(x, ((0, 0), (1, 3), (1, 3), (0, 0)))                    # (n,h+4,w+4,cin)
    taps = [xp[:, dy:dy + hh + 1, dx:dx + ww + 2, :]
            for dy in range(3) for dx in range(3)]                       # (n,h+1,w+2,cin)
    xi = jnp.concatenate(taps, axis=-1)                                  # (n,h+1,w+2,9cin)
    xi = xi.reshape(n, (hh + 1) * (ww + 2), k1)[:, :g1['n_acc'], :]
    xi = jnp.pad(xi, ((0, n_pad - n), (0, 0), (0, _K1_PAD - k1)))
    xi = xi.astype(jnp.bfloat16)

    # ---- weights: PyTorch layouts -> MXU-friendly bf16 blocks ----
    # conv1 folded into an im2col weight: (9*cin -> 128, cout)
    w1 = jnp.transpose(params['conv1_w'], (2, 3, 1, 0)).reshape(k1, c1)
    w1 = jnp.pad(w1, ((0, _K1_PAD - k1), (0, 0))).astype(jnp.bfloat16)

    def conv_w(w):
        cout, ci = w.shape[0], w.shape[1]
        return jnp.transpose(w, (2, 3, 1, 0)).reshape(9, ci, cout).astype(jnp.bfloat16)

    w2 = conv_w(params['conv2_w'])
    w3 = conv_w(params['conv3_w'])
    b1 = params['conv1_b'].reshape(1, -1).astype(jnp.float32)
    b2 = params['conv2_b'].reshape(1, -1).astype(jnp.float32)
    b3 = params['conv3_b'].reshape(1, -1).astype(jnp.float32)

    # fc1: (hidden, c3*4*4) -> (16 spatial, c3, hidden)  [NCHW flatten folded in]
    wf1 = params['fc1_w'].reshape(hidden, c3, 16).transpose(2, 1, 0).astype(jnp.bfloat16)
    bf1 = params['fc1_b'].reshape(1, -1).astype(jnp.float32)
    # fc2: (out, hidden) -> (hidden, 128) lane-padded
    wf2 = jnp.pad(params['fc2_w'].T, ((0, 0), (0, _OUT_PAD - out_dim))).astype(jnp.bfloat16)
    bf2 = jnp.pad(params['fc2_b'], (0, _OUT_PAD - out_dim)).reshape(1, -1).astype(jnp.float32)

    # ---- constant 0/1 pool-select / re-pad matrices ----
    s2 = jnp.asarray(_selection_matrix(g1, g2), jnp.bfloat16)
    s3 = jnp.asarray(_selection_matrix(g2, g3), jnp.bfloat16)

    kernel = functools.partial(_fed_forward_kernel, geom=geom)

    def pinned(shape):
        # Constant-index (VMEM-resident) block; single-buffered since its block
        # index never changes, halving the resident-weight VMEM footprint.
        nd = len(shape)
        imap = lambda i, _nd=nd: (0,) * _nd
        if hasattr(pl, "Buffered"):
            try:
                return pl.BlockSpec(shape, imap, pipeline_mode=pl.Buffered(1))
            except TypeError:
                pass
        return pl.BlockSpec(shape, imap)

    out = pl.pallas_call(
        kernel,
        grid=(n_pad // bb,),
        in_specs=[
            pl.BlockSpec((bb, g1['n_acc'], _K1_PAD), lambda i: (i, 0, 0)),
            pinned(w1.shape), pinned(b1.shape),
            pinned(w2.shape), pinned(b2.shape),
            pinned(w3.shape), pinned(b3.shape),
            pinned(s2.shape), pinned(s3.shape),
            pinned(wf1.shape), pinned(bf1.shape),
            pinned(wf2.shape), pinned(bf2.shape),
        ],
        out_specs=pl.BlockSpec((bb, _OUT_PAD), lambda i: (i, 0)),
        out_shape=jax.ShapeDtypeStruct((n_pad, _OUT_PAD), jnp.float32),
        scratch_shapes=[pltpu.VMEM((bb, g3['n_acc'], c3), jnp.float32)],
        compiler_params=pltpu.CompilerParams(
            dimension_semantics=("parallel",),   # megacore split across blocks (v7x)
            vmem_limit_bytes=32 * 1024 * 1024),
    )(xi, w1, b1, w2, b2, w3, b3, s2, s3, wf1, bf1, wf2, bf2)

    return out[:n, :out_dim]


# ---------------- Deterministic parameter init (PyTorch shapes) ----------------

def init_params(key, input_dim=3, output_dim=10):
    ks = jax.random.split(key, 10)

    def u(k, shape, fan_in):
        bound = 1.0 / jnp.sqrt(jnp.float32(fan_in))
        return jax.random.uniform(k, shape, jnp.float32, -bound, bound)

    return {
        'conv1_w': u(ks[0], (32, input_dim, 3, 3), input_dim * 9),
        'conv1_b': u(ks[1], (32,), input_dim * 9),
        'conv2_w': u(ks[2], (64, 32, 3, 3), 32 * 9),
        'conv2_b': u(ks[3], (64,), 32 * 9),
        'conv3_w': u(ks[4], (128, 64, 3, 3), 64 * 9),
        'conv3_b': u(ks[5], (128,), 64 * 9),
        'fc1_w': u(ks[6], (512, 128 * 4 * 4), 128 * 16),
        'fc1_b': u(ks[7], (512,), 128 * 16),
        'fc2_w': u(ks[8], (output_dim, 512), 512),
        'fc2_b': u(ks[9], (output_dim,), 512),
    }


# ---------------- Pure-JAX reference for the correctness check ----------------

def _adaptive_avg_pool_nhwc(x, out_hw=4):
    N, H, W, C = x.shape
    kh, kw = H // out_hw, W // out_hw
    return x.reshape(N, out_hw, kh, out_hw, kw, C).mean(axis=(2, 4))


def _reference_forward(params, x_nchw):
    x = jnp.transpose(x_nchw, (0, 2, 3, 1)).astype(jnp.float32)

    def conv(x, w_t, b):
        k = jnp.transpose(w_t, (2, 3, 1, 0))  # HWIO
        y = jax.lax.conv_general_dilated(x, k, (1, 1), ((1, 1), (1, 1)),
                                         dimension_numbers=('NHWC', 'HWIO', 'NHWC'))
        return jnp.maximum(y + b, 0.0)

    def pool(x):
        N, H, W, C = x.shape
        return x.reshape(N, H // 2, 2, W // 2, 2, C).max(axis=(2, 4))

    x = pool(conv(x, params['conv1_w'], params['conv1_b']))
    x = pool(conv(x, params['conv2_w'], params['conv2_b']))
    x = conv(x, params['conv3_w'], params['conv3_b'])
    x = _adaptive_avg_pool_nhwc(x, 4)
    N = x.shape[0]
    x = jnp.transpose(x, (0, 3, 1, 2)).reshape(N, -1)
    h = jnp.maximum(x @ params['fc1_w'].T + params['fc1_b'], 0.0)
    return h @ params['fc2_w'].T + params['fc2_b']


if __name__ == "__main__":
    key = jax.random.PRNGKey(0)
    pkey, xkey = jax.random.split(key)
    params = init_params(pkey, input_dim=3, output_dim=10)
    # NCHW input like the PyTorch module; 16x16 so conv3's feature map is 4x4.
    x = jax.random.normal(xkey, (2, 3, 16, 16), jnp.float32)

    out = jax.jit(fed_model_forward)(params, x)
    out = jax.block_until_ready(out)
    assert out.shape == (2, 10), out.shape

    ref = _reference_forward(params, x)
    # Tolerance sized for bf16 MXU operands with f32 accumulation.
    max_err = float(jnp.max(jnp.abs(out - ref)))
    assert jnp.allclose(out, ref, atol=5e-2, rtol=5e-2), f"mismatch, max abs err {max_err}"

    print("KERNEL_OK")
</pallas_src>

<mosaic_0001>
module attributes {stable_mosaic.version = 11 : i64} {
  func.func @_fed_forward_kernel(%arg0: i32, %arg1: memref<2x296x128xbf16, #tpu.memory_space<vmem>>, %arg2: memref<128x32xbf16, #tpu.memory_space<vmem>>, %arg3: memref<1x32xf32, #tpu.memory_space<vmem>>, %arg4: memref<9x32x64xbf16, #tpu.memory_space<vmem>>, %arg5: memref<1x64xf32, #tpu.memory_space<vmem>>, %arg6: memref<9x64x128xbf16, #tpu.memory_space<vmem>>, %arg7: memref<1x128xf32, #tpu.memory_space<vmem>>, %arg8: memref<112x272xbf16, #tpu.memory_space<vmem>>, %arg9: memref<40x72xbf16, #tpu.memory_space<vmem>>, %arg10: memref<16x128x512xbf16, #tpu.memory_space<vmem>>, %arg11: memref<1x512xf32, #tpu.memory_space<vmem>>, %arg12: memref<512x128xbf16, #tpu.memory_space<vmem>>, %arg13: memref<1x128xf32, #tpu.memory_space<vmem>>, %arg14: memref<2x128xf32, #tpu.memory_space<vmem>>, %arg15: memref<2x24x128xf32, #tpu.memory_space<vmem>>) attributes {dimension_semantics = [#tpu.dimension_semantics<parallel>], iteration_bounds = array<i64: 1>, scalar_prefetch = 0 : i64, scratch_operands = 1 : i64, tpu.core_type = #tpu.core_type<tc>, window_params = [{transform_indices = @transform_0, window_bounds = array<i64: 2, 296, 128>}, {pipeline_mode = #tpu.pipeline_mode<synchronous>, transform_indices = @transform_1, window_bounds = array<i64: 128, 32>}, {pipeline_mode = #tpu.pipeline_mode<synchronous>, transform_indices = @transform_2, window_bounds = array<i64: 1, 32>}, {pipeline_mode = #tpu.pipeline_mode<synchronous>, transform_indices = @transform_3, window_bounds = array<i64: 9, 32, 64>}, {pipeline_mode = #tpu.pipeline_mode<synchronous>, transform_indices = @transform_4, window_bounds = array<i64: 1, 64>}, {pipeline_mode = #tpu.pipeline_mode<synchronous>, transform_indices = @transform_5, window_bounds = array<i64: 9, 64, 128>}, {pipeline_mode = #tpu.pipeline_mode<synchronous>, transform_indices = @transform_6, window_bounds = array<i64: 1, 128>}, {pipeline_mode = #tpu.pipeline_mode<synchronous>, transform_indices = @transform_7, window_bounds = array<i64: 112, 272>}, {pipeline_mode = #tpu.pipeline_mode<synchronous>, transform_indices = @transform_8, window_bounds = array<i64: 40, 72>}, {pipeline_mode = #tpu.pipeline_mode<synchronous>, transform_indices = @transform_9, window_bounds = array<i64: 16, 128, 512>}, {pipeline_mode = #tpu.pipeline_mode<synchronous>, transform_indices = @transform_10, window_bounds = array<i64: 1, 512>}, {pipeline_mode = #tpu.pipeline_mode<synchronous>, transform_indices = @transform_11, window_bounds = array<i64: 512, 128>}, {pipeline_mode = #tpu.pipeline_mode<synchronous>, transform_indices = @transform_12, window_bounds = array<i64: 1, 128>}, {transform_indices = @transform_13, window_bounds = array<i64: 2, 128>}]} {
    %c0_i32 = arith.constant 0 : i32
    %c2_i32 = arith.constant 2 : i32
    %0 = arith.addi %c0_i32, %c2_i32 : i32
    %c1_i32 = arith.constant 1 : i32
    scf.for %arg16 = %c0_i32 to %0 step %c1_i32  : i32 {
      %124 = arith.index_cast %arg16 : i32 to index
      %c0_102 = arith.constant 0 : index
      %c0_103 = arith.constant 0 : index
      %125 = vector.load %arg1[%124, %c0_102, %c0_103] : memref<2x296x128xbf16, #tpu.memory_space<vmem>>, vector<1x296x128xbf16>
      %126 = vector.shape_cast %125 : vector<1x296x128xbf16> to vector<296x128xbf16>
      %c0_104 = arith.constant 0 : index
      %c0_105 = arith.constant 0 : index
      %127 = vector.load %arg2[%c0_104, %c0_105] : memref<128x32xbf16, #tpu.memory_space<vmem>>, vector<128x32xbf16>
      %cst_106 = arith.constant dense<0.000000e+00> : vector<296x32xf32>
      %128 = tpu.matmul %126, %127, %cst_106 {dimension_numbers = #tpu.dot_dimension_numbers<[1], [0], [0], [1], [0, 0, 1, 1], [], []>} : vector<296x128xbf16>, vector<128x32xbf16>, vector<296x32xf32> -> vector<296x32xf32>
      %c0_107 = arith.constant 0 : index
      %c0_108 = arith.constant 0 : index
      %129 = vector.load %arg3[%c0_107, %c0_108] : memref<1x32xf32, #tpu.memory_space<vmem>>, vector<1x32xf32>
      %130 = vector.broadcast %129 : vector<1x32xf32> to vector<296x32xf32>
      %131 = arith.addf %128, %130 : vector<296x32xf32>
      %cst_109 = arith.constant 0.000000e+00 : f32
      %132 = vector.broadcast %cst_109 : f32 to vector<296x32xf32>
      %133 = arith.maximumf %131, %132 : vector<296x32xf32>
      %134 = vector.extract_strided_slice %133 {offsets = [0, 0], sizes = [272, 32], strides = [1, 1]} : vector<296x32xf32> to vector<272x32xf32>
      %135 = vector.extract_strided_slice %133 {offsets = [1, 0], sizes = [272, 32], strides = [1, 1]} : vector<296x32xf32> to vector<272x32xf32>
      %136 = arith.maximumf %134, %135 : vector<272x32xf32>
      %137 = vector.extract_strided_slice %133 {offsets = [18, 0], sizes = [272, 32], strides = [1, 1]} : vector<296x32xf32> to vector<272x32xf32>
      %138 = vector.extract_strided_slice %133 {offsets = [19, 0], sizes = [272, 32], strides = [1, 1]} : vector<296x32xf32> to vector<272x32xf32>
      %139 = arith.maximumf %137, %138 : vector<272x32xf32>
      %140 = arith.maximumf %136, %139 : vector<272x32xf32>
      %c0_110 = arith.constant 0 : index
      %c0_111 = arith.constant 0 : index
      %141 = vector.load %arg8[%c0_110, %c0_111] : memref<112x272xbf16, #tpu.memory_space<vmem>>, vector<112x272xbf16>
      %142 = arith.truncf %140 : vector<272x32xf32> to vector<272x32xbf16>
      %cst_112 = arith.constant dense<0.000000e+00> : vector<112x32xf32>
      %143 = tpu.matmul %141, %142, %cst_112 {dimension_numbers = #tpu.dot_dimension_numbers<[1], [0], [0], [1], [0, 0, 1, 1], [], []>} : vector<112x272xbf16>, vector<272x32xbf16>, vector<112x32xf32> -> vector<112x32xf32>
      %144 = arith.truncf %143 : vector<112x32xf32> to vector<112x32xbf16>
      %145 = vector.extract_strided_slice %144 {offsets = [0, 0], sizes = [88, 32], strides = [1, 1]} : vector<112x32xbf16> to vector<88x32xbf16>
      %c0_113 = arith.constant 0 : index
      %c0_114 = arith.constant 0 : index
      %c0_115 = arith.constant 0 : index
      %146 = vector.load %arg4[%c0_113, %c0_114, %c0_115] : memref<9x32x64xbf16, #tpu.memory_space<vmem>>, vector<1x32x64xbf16>
      %147 = vector.shape_cast %146 : vector<1x32x64xbf16> to vector<32x64xbf16>
      %cst_116 = arith.constant dense<0.000000e+00> : vector<88x64xf32>
      %148 = tpu.matmul %145, %147, %cst_116 {dimension_numbers = #tpu.dot_dimension_numbers<[1], [0], [0], [1], [0, 0, 1, 1], [], []>} : vector<88x32xbf16>, vector<32x64xbf16>, vector<88x64xf32> -> vector<88x64xf32>
      %149 = vector.extract_strided_slice %144 {offsets = [1, 0], sizes = [88, 32], strides = [1, 1]} : vector<112x32xbf16> to vector<88x32xbf16>
      %c1_117 = arith.constant 1 : index
      %c0_118 = arith.constant 0 : index
      %c0_119 = arith.constant 0 : index
      %150 = vector.load %arg4[%c1_117, %c0_118, %c0_119] : memref<9x32x64xbf16, #tpu.memory_space<vmem>>, vector<1x32x64xbf16>
      %151 = vector.shape_cast %150 : vector<1x32x64xbf16> to vector<32x64xbf16>
      %cst_120 = arith.constant dense<0.000000e+00> : vector<88x64xf32>
      %152 = tpu.matmul %149, %151, %cst_120 {dimension_numbers = #tpu.dot_dimension_numbers<[1], [0], [0], [1], [0, 0, 1, 1], [], []>} : vector<88x32xbf16>, vector<32x64xbf16>, vector<88x64xf32> -> vector<88x64xf32>
      %153 = arith.addf %148, %152 : vector<88x64xf32>
      %154 = vector.extract_strided_slice %144 {offsets = [2, 0], sizes = [88, 32], strides = [1, 1]} : vector<112x32xbf16> to vector<88x32xbf16>
      %c2_121 = arith.constant 2 : index
      %c0_122 = arith.constant 0 : index
      %c0_123 = arith.constant 0 : index
      %155 = vector.load %arg4[%c2_121, %c0_122, %c0_123] : memref<9x32x64xbf16, #tpu.memory_space<vmem>>, vector<1x32x64xbf16>
      %156 = vector.shape_cast %155 : vector<1x32x64xbf16> to vector<32x64xbf16>
      %cst_124 = arith.constant dense<0.000000e+00> : vector<88x64xf32>
      %157 = tpu.matmul %154, %156, %cst_124 {dimension_numbers = #tpu.dot_dimension_numbers<[1], [0], [0], [1], [0, 0, 1, 1], [], []>} : vector<88x32xbf16>, vector<32x64xbf16>, vector<88x64xf32> -> vector<88x64xf32>
      %158 = arith.addf %153, %157 : vector<88x64xf32>
      %159 = vector.extract_strided_slice %144 {offsets = [10, 0], sizes = [88, 32], strides = [1, 1]} : vector<112x32xbf16> to vector<88x32xbf16>
      %c3_125 = arith.constant 3 : index
      %c0_126 = arith.constant 0 : index
      %c0_127 = arith.constant 0 : index
      %160 = vector.load %arg4[%c3_125, %c0_126, %c0_127] : memref<9x32x64xbf16, #tpu.memory_space<vmem>>, vector<1x32x64xbf16>
      %161 = vector.shape_cast %160 : vector<1x32x64xbf16> to vector<32x64xbf16>
      %cst_128 = arith.constant dense<0.000000e+00> : vector<88x64xf32>
      %162 = tpu.matmul %159, %161, %cst_128 {dimension_numbers = #tpu.dot_dimension_numbers<[1], [0], [0], [1], [0, 0, 1, 1], [], []>} : vector<88x32xbf16>, vector<32x64xbf16>, vector<88x64xf32> -> vector<88x64xf32>
      %163 = arith.addf %158, %162 : vector<88x64xf32>
      %164 = vector.extract_strided_slice %144 {offsets = [11, 0], sizes = [88, 32], strides = [1, 1]} : vector<112x32xbf16> to vector<88x32xbf16>
      %c4_129 = arith.constant 4 : index
      %c0_130 = arith.constant 0 : index
      %c0_131 = arith.constant 0 : index
      %165 = vector.load %arg4[%c4_129, %c0_130, %c0_131] : memref<9x32x64xbf16, #tpu.memory_space<vmem>>, vector<1x32x64xbf16>
      %166 = vector.shape_cast %165 : vector<1x32x64xbf16> to vector<32x64xbf16>
      %cst_132 = arith.constant dense<0.000000e+00> : vector<88x64xf32>
      %167 = tpu.matmul %164, %166, %cst_132 {dimension_numbers = #tpu.dot_dimension_numbers<[1], [0], [0], [1], [0, 0, 1, 1], [], []>} : vector<88x32xbf16>, vector<32x64xbf16>, vector<88x64xf32> -> vector<88x64xf32>
      %168 = arith.addf %163, %167 : vector<88x64xf32>
      %169 = vector.extract_strided_slice %144 {offsets = [12, 0], sizes = [88, 32], strides = [1, 1]} : vector<112x32xbf16> to vector<88x32xbf16>
      %c5_133 = arith.constant 5 : index
      %c0_134 = arith.constant 0 : index
      %c0_135 = arith.constant 0 : index
      %170 = vector.load %arg4[%c5_133, %c0_134, %c0_135] : memref<9x32x64xbf16, #tpu.memory_space<vmem>>, vector<1x32x64xbf16>
      %171 = vector.shape_cast %170 : vector<1x32x64xbf16> to vector<32x64xbf16>
      %cst_136 = arith.constant dense<0.000000e+00> : vector<88x64xf32>
      %172 = tpu.matmul %169, %171, %cst_136 {dimension_numbers = #tpu.dot_dimension_numbers<[1], [0], [0], [1], [0, 0, 1, 1], [], []>} : vector<88x32xbf16>, vector<32x64xbf16>, vector<88x64xf32> -> vector<88x64xf32>
      %173 = arith.addf %168, %172 : vector<88x64xf32>
      %174 = vector.extract_strided_slice %144 {offsets = [20, 0], sizes = [88, 32], strides = [1, 1]} : vector<112x32xbf16> to vector<88x32xbf16>
      %c6_137 = arith.constant 6 : index
      %c0_138 = arith.constant 0 : index
      %c0_139 = arith.constant 0 : index
      %175 = vector.load %arg4[%c6_137, %c0_138, %c0_139] : memref<9x32x64xbf16, #tpu.memory_space<vmem>>, vector<1x32x64xbf16>
      %176 = vector.shape_cast %175 : vector<1x32x64xbf16> to vector<32x64xbf16>
      %cst_140 = arith.constant dense<0.000000e+00> : vector<88x64xf32>
      %177 = tpu.matmul %174, %176, %cst_140 {dimension_numbers = #tpu.dot_dimension_numbers<[1], [0], [0], [1], [0, 0, 1, 1], [], []>} : vector<88x32xbf16>, vector<32x64xbf16>, vector<88x64xf32> -> vector<88x64xf32>
      %178 = arith.addf %173, %177 : vector<88x64xf32>
      %179 = vector.extract_strided_slice %144 {offsets = [21, 0], sizes = [88, 32], strides = [1, 1]} : vector<112x32xbf16> to vector<88x32xbf16>
      %c7_141 = arith.constant 7 : index
      %c0_142 = arith.constant 0 : index
      %c0_143 = arith.constant 0 : index
      %180 = vector.load %arg4[%c7_141, %c0_142, %c0_143] : memref<9x32x64xbf16, #tpu.memory_space<vmem>>, vector<1x32x64xbf16>
      %181 = vector.shape_cast %180 : vector<1x32x64xbf16> to vector<32x64xbf16>
      %cst_144 = arith.constant dense<0.000000e+00> : vector<88x64xf32>
      %182 = tpu.matmul %179, %181, %cst_144 {dimension_numbers = #tpu.dot_dimension_numbers<[1], [0], [0], [1], [0, 0, 1, 1], [], []>} : vector<88x32xbf16>, vector<32x64xbf16>, vector<88x64xf32> -> vector<88x64xf32>
      %183 = arith.addf %178, %182 : vector<88x64xf32>
      %184 = vector.extract_strided_slice %144 {offsets = [22, 0], sizes = [88, 32], strides = [1, 1]} : vector<112x32xbf16> to vector<88x32xbf16>
      %c8_145 = arith.constant 8 : index
      %c0_146 = arith.constant 0 : index
      %c0_147 = arith.constant 0 : index
      %185 = vector.load %arg4[%c8_145, %c0_146, %c0_147] : memref<9x32x64xbf16, #tpu.memory_space<vmem>>, vector<1x32x64xbf16>
      %186 = vector.shape_cast %185 : vector<1x32x64xbf16> to vector<32x64xbf16>
      %cst_148 = arith.constant dense<0.000000e+00> : vector<88x64xf32>
      %187 = tpu.matmul %184, %186, %cst_148 {dimension_numbers = #tpu.dot_dimension_numbers<[1], [0], [0], [1], [0, 0, 1, 1], [], []>} : vector<88x32xbf16>, vector<32x64xbf16>, vector<88x64xf32> -> vector<88x64xf32>
      %188 = arith.addf %183, %187 : vector<88x64xf32>
      %c0_149 = arith.constant 0 : index
      %c0_150 = arith.constant 0 : index
      %189 = vector.load %arg5[%c0_149, %c0_150] : memref<1x64xf32, #tpu.memory_space<vmem>>, vector<1x64xf32>
      %190 = vector.broadcast %189 : vector<1x64xf32> to vector<88x64xf32>
      %191 = arith.addf %188, %190 : vector<88x64xf32>
      %cst_151 = arith.constant 0.000000e+00 : f32
      %192 = vector.broadcast %cst_151 : f32 to vector<88x64xf32>
      %193 = arith.maximumf %191, %192 : vector<88x64xf32>
      %194 = vector.extract_strided_slice %193 {offsets = [0, 0], sizes = [72, 64], strides = [1, 1]} : vector<88x64xf32> to vector<72x64xf32>
      %195 = vector.extract_strided_slice %193 {offsets = [1, 0], sizes = [72, 64], strides = [1, 1]} : vector<88x64xf32> to vector<72x64xf32>
      %196 = arith.maximumf %194, %195 : vector<72x64xf32>
      %197 = vector.extract_strided_slice %193 {offsets = [10, 0], sizes = [72, 64], strides = [1, 1]} : vector<88x64xf32> to vector<72x64xf32>
      %198 = vector.extract_strided_slice %193 {offsets = [11, 0], sizes = [72, 64], strides = [1, 1]} : vector<88x64xf32> to vector<72x64xf32>
      %199 = arith.maximumf %197, %198 : vector<72x64xf32>
      %200 = arith.maximumf %196, %199 : vector<72x64xf32>
      %c0_152 = arith.constant 0 : index
      %c0_153 = arith.constant 0 : index
      %201 = vector.load %arg9[%c0_152, %c0_153] : memref<40x72xbf16, #tpu.memory_space<vmem>>, vector<40x72xbf16>
      %202 = arith.truncf %200 : vector<72x64xf32> to vector<72x64xbf16>
      %cst_154 = arith.constant dense<0.000000e+00> : vector<40x64xf32>
      %203 = tpu.matmul %201, %202, %cst_154 {dimension_numbers = #tpu.dot_dimension_numbers<[1], [0], [0], [1], [0, 0, 1, 1], [], []>} : vector<40x72xbf16>, vector<72x64xbf16>, vector<40x64xf32> -> vector<40x64xf32>
      %204 = arith.truncf %203 : vector<40x64xf32> to vector<40x64xbf16>
      %205 = vector.extract_strided_slice %204 {offsets = [0, 0], sizes = [24, 64], strides = [1, 1]} : vector<40x64xbf16> to vector<24x64xbf16>
      %c0_155 = arith.constant 0 : index
      %c0_156 = arith.constant 0 : index
      %c0_157 = arith.constant 0 : index
      %206 = vector.load %arg6[%c0_155, %c0_156, %c0_157] : memref<9x64x128xbf16, #tpu.memory_space<vmem>>, vector<1x64x128xbf16>
      %207 = vector.shape_cast %206 : vector<1x64x128xbf16> to vector<64x128xbf16>
      %cst_158 = arith.constant dense<0.000000e+00> : vector<24x128xf32>
      %208 = tpu.matmul %205, %207, %cst_158 {dimension_numbers = #tpu.dot_dimension_numbers<[1], [0], [0], [1], [0, 0, 1, 1], [], []>} : vector<24x64xbf16>, vector<64x128xbf16>, vector<24x128xf32> -> vector<24x128xf32>
      %209 = vector.extract_strided_slice %204 {offsets = [1, 0], sizes = [24, 64], strides = [1, 1]} : vector<40x64xbf16> to vector<24x64xbf16>
      %c1_159 = arith.constant 1 : index
      %c0_160 = arith.constant 0 : index
      %c0_161 = arith.constant 0 : index
      %210 = vector.load %arg6[%c1_159, %c0_160, %c0_161] : memref<9x64x128xbf16, #tpu.memory_space<vmem>>, vector<1x64x128xbf16>
      %211 = vector.shape_cast %210 : vector<1x64x128xbf16> to vector<64x128xbf16>
      %cst_162 = arith.constant dense<0.000000e+00> : vector<24x128xf32>
      %212 = tpu.matmul %209, %211, %cst_162 {dimension_numbers = #tpu.dot_dimension_numbers<[1], [0], [0], [1], [0, 0, 1, 1], [], []>} : vector<24x64xbf16>, vector<64x128xbf16>, vector<24x128xf32> -> vector<24x128xf32>
      %213 = arith.addf %208, %212 : vector<24x128xf32>
      %214 = vector.extract_strided_slice %204 {offsets = [2, 0], sizes = [24, 64], strides = [1, 1]} : vector<40x64xbf16> to vector<24x64xbf16>
      %c2_163 = arith.constant 2 : index
      %c0_164 = arith.constant 0 : index
      %c0_165 = arith.constant 0 : index
      %215 = vector.load %arg6[%c2_163, %c0_164, %c0_165] : memref<9x64x128xbf16, #tpu.memory_space<vmem>>, vector<1x64x128xbf16>
      %216 = vector.shape_cast %215 : vector<1x64x128xbf16> to vector<64x128xbf16>
      %cst_166 = arith.constant dense<0.000000e+00> : vector<24x128xf32>
      %217 = tpu.matmul %214, %216, %cst_166 {dimension_numbers = #tpu.dot_dimension_numbers<[1], [0], [0], [1], [0, 0, 1, 1], [], []>} : vector<24x64xbf16>, vector<64x128xbf16>, vector<24x128xf32> -> vector<24x128xf32>
      %218 = arith.addf %213, %217 : vector<24x128xf32>
      %219 = vector.extract_strided_slice %204 {offsets = [6, 0], sizes = [24, 64], strides = [1, 1]} : vector<40x64xbf16> to vector<24x64xbf16>
      %c3_167 = arith.constant 3 : index
      %c0_168 = arith.constant 0 : index
      %c0_169 = arith.constant 0 : index
      %220 = vector.load %arg6[%c3_167, %c0_168, %c0_169] : memref<9x64x128xbf16, #tpu.memory_space<vmem>>, vector<1x64x128xbf16>
      %221 = vector.shape_cast %220 : vector<1x64x128xbf16> to vector<64x128xbf16>
      %cst_170 = arith.constant dense<0.000000e+00> : vector<24x128xf32>
      %222 = tpu.matmul %219, %221, %cst_170 {dimension_numbers = #tpu.dot_dimension_numbers<[1], [0], [0], [1], [0, 0, 1, 1], [], []>} : vector<24x64xbf16>, vector<64x128xbf16>, vector<24x128xf32> -> vector<24x128xf32>
      %223 = arith.addf %218, %222 : vector<24x128xf32>
      %224 = vector.extract_strided_slice %204 {offsets = [7, 0], sizes = [24, 64], strides = [1, 1]} : vector<40x64xbf16> to vector<24x64xbf16>
      %c4_171 = arith.constant 4 : index
      %c0_172 = arith.constant 0 : index
      %c0_173 = arith.constant 0 : index
      %225 = vector.load %arg6[%c4_171, %c0_172, %c0_173] : memref<9x64x128xbf16, #tpu.memory_space<vmem>>, vector<1x64x128xbf16>
      %226 = vector.shape_cast %225 : vector<1x64x128xbf16> to vector<64x128xbf16>
      %cst_174 = arith.constant dense<0.000000e+00> : vector<24x128xf32>
      %227 = tpu.matmul %224, %226, %cst_174 {dimension_numbers = #tpu.dot_dimension_numbers<[1], [0], [0], [1], [0, 0, 1, 1], [], []>} : vector<24x64xbf16>, vector<64x128xbf16>, vector<24x128xf32> -> vector<24x128xf32>
      %228 = arith.addf %223, %227 : vector<24x128xf32>
      %229 = vector.extract_strided_slice %204 {offsets = [8, 0], sizes = [24, 64], strides = [1, 1]} : vector<40x64xbf16> to vector<24x64xbf16>
      %c5_175 = arith.constant 5 : index
      %c0_176 = arith.constant 0 : index
      %c0_177 = arith.constant 0 : index
      %230 = vector.load %arg6[%c5_175, %c0_176, %c0_177] : memref<9x64x128xbf16, #tpu.memory_space<vmem>>, vector<1x64x128xbf16>
      %231 = vector.shape_cast %230 : vector<1x64x128xbf16> to vector<64x128xbf16>
      %cst_178 = arith.constant dense<0.000000e+00> : vector<24x128xf32>
      %232 = tpu.matmul %229, %231, %cst_178 {dimension_numbers = #tpu.dot_dimension_numbers<[1], [0], [0], [1], [0, 0, 1, 1], [], []>} : vector<24x64xbf16>, vector<64x128xbf16>, vector<24x128xf32> -> vector<24x128xf32>
      %233 = arith.addf %228, %232 : vector<24x128xf32>
      %234 = vector.extract_strided_slice %204 {offsets = [12, 0], sizes = [24, 64], strides = [1, 1]} : vector<40x64xbf16> to vector<24x64xbf16>
      %c6_179 = arith.constant 6 : index
      %c0_180 = arith.constant 0 : index
      %c0_181 = arith.constant 0 : index
      %235 = vector.load %arg6[%c6_179, %c0_180, %c0_181] : memref<9x64x128xbf16, #tpu.memory_space<vmem>>, vector<1x64x128xbf16>
      %236 = vector.shape_cast %235 : vector<1x64x128xbf16> to vector<64x128xbf16>
      %cst_182 = arith.constant dense<0.000000e+00> : vector<24x128xf32>
      %237 = tpu.matmul %234, %236, %cst_182 {dimension_numbers = #tpu.dot_dimension_numbers<[1], [0], [0], [1], [0, 0, 1, 1], [], []>} : vector<24x64xbf16>, vector<64x128xbf16>, vector<24x128xf32> -> vector<24x128xf32>
      %238 = arith.addf %233, %237 : vector<24x128xf32>
      %239 = vector.extract_strided_slice %204 {offsets = [13, 0], sizes = [24, 64], strides = [1, 1]} : vector<40x64xbf16> to vector<24x64xbf16>
      %c7_183 = arith.constant 7 : index
      %c0_184 = arith.constant 0 : index
      %c0_185 = arith.constant 0 : index
      %240 = vector.load %arg6[%c7_183, %c0_184, %c0_185] : memref<9x64x128xbf16, #tpu.memory_space<vmem>>, vector<1x64x128xbf16>
      %241 = vector.shape_cast %240 : vector<1x64x128xbf16> to vector<64x128xbf16>
      %cst_186 = arith.constant dense<0.000000e+00> : vector<24x128xf32>
      %242 = tpu.matmul %239, %241, %cst_186 {dimension_numbers = #tpu.dot_dimension_numbers<[1], [0], [0], [1], [0, 0, 1, 1], [], []>} : vector<24x64xbf16>, vector<64x128xbf16>, vector<24x128xf32> -> vector<24x128xf32>
      %243 = arith.addf %238, %242 : vector<24x128xf32>
      %244 = vector.extract_strided_slice %204 {offsets = [14, 0], sizes = [24, 64], strides = [1, 1]} : vector<40x64xbf16> to vector<24x64xbf16>
      %c8_187 = arith.constant 8 : index
      %c0_188 = arith.constant 0 : index
      %c0_189 = arith.constant 0 : index
      %245 = vector.load %arg6[%c8_187, %c0_188, %c0_189] : memref<9x64x128xbf16, #tpu.memory_space<vmem>>, vector<1x64x128xbf16>
      %246 = vector.shape_cast %245 : vector<1x64x128xbf16> to vector<64x128xbf16>
      %cst_190 = arith.constant dense<0.000000e+00> : vector<24x128xf32>
      %247 = tpu.matmul %244, %246, %cst_190 {dimension_numbers = #tpu.dot_dimension_numbers<[1], [0], [0], [1], [0, 0, 1, 1], [], []>} : vector<24x64xbf16>, vector<64x128xbf16>, vector<24x128xf32> -> vector<24x128xf32>
      %248 = arith.addf %243, %247 : vector<24x128xf32>
      %c0_191 = arith.constant 0 : index
      %c0_192 = arith.constant 0 : index
      %249 = vector.load %arg7[%c0_191, %c0_192] : memref<1x128xf32, #tpu.memory_space<vmem>>, vector<1x128xf32>
      %250 = vector.broadcast %249 : vector<1x128xf32> to vector<24x128xf32>
      %251 = arith.addf %248, %250 : vector<24x128xf32>
      %cst_193 = arith.constant 0.000000e+00 : f32
      %252 = vector.broadcast %cst_193 : f32 to vector<24x128xf32>
      %253 = arith.maximumf %251, %252 : vector<24x128xf32>
      %254 = arith.index_cast %arg16 : i32 to index
      %c0_194 = arith.constant 0 : index
      %c0_195 = arith.constant 0 : index
      %255 = vector.load %arg15[%254, %c0_194, %c0_195] : memref<2x24x128xf32, #tpu.memory_space<vmem>>, vector<1x24x128xf32>
      %256 = vector.shape_cast %255 : vector<1x24x128xf32> to vector<24x128xf32>
      %257 = vector.shape_cast %253 : vector<24x128xf32> to vector<1x24x128xf32>
      tpu.vector_store %arg15[%254, %c0_194, %c0_195], %257 {strides = array<i32>} : memref<2x24x128xf32, #tpu.memory_space<vmem>>, vector<1x24x128xf32>,
    }
    %c2_i32_0 = arith.constant 2 : i32
    %c0 = arith.constant 0 : index
    %c0_1 = arith.constant 0 : index
    %c0_2 = arith.constant 0 : index
    %1 = vector.load %arg15[%c0, %c0_1, %c0_2] : memref<2x24x128xf32, #tpu.memory_space<vmem>>, vector<2x1x128xf32>
    %2 = vector.shape_cast %1 : vector<2x1x128xf32> to vector<2x128xf32>
    %3 = arith.truncf %2 : vector<2x128xf32> to vector<2x128xbf16>
    %c0_3 = arith.constant 0 : index
    %c0_4 = arith.constant 0 : index
    %c0_5 = arith.constant 0 : index
    %4 = vector.load %arg10[%c0_3, %c0_4, %c0_5] : memref<16x128x512xbf16, #tpu.memory_space<vmem>>, vector<1x128x512xbf16>
    %5 = vector.shape_cast %4 : vector<1x128x512xbf16> to vector<128x512xbf16>
    %cst = arith.constant dense<0.000000e+00> : vector<2x512xf32>
    %6 = tpu.matmul %3, %5, %cst {dimension_numbers = #tpu.dot_dimension_numbers<[1], [0], [0], [1], [0, 0, 1, 1], [], []>} : vector<2x128xbf16>, vector<128x512xbf16>, vector<2x512xf32> -> vector<2x512xf32>
    %c0_6 = arith.constant 0 : index
    %c1 = arith.constant 1 : index
    %c0_7 = arith.constant 0 : index
    %7 = vector.load %arg15[%c0_6, %c1, %c0_7] : memref<2x24x128xf32, #tpu.memory_space<vmem>>, vector<2x1x128xf32>
    %8 = vector.shape_cast %7 : vector<2x1x128xf32> to vector<2x128xf32>
    %9 = arith.truncf %8 : vector<2x128xf32> to vector<2x128xbf16>
    %c1_8 = arith.constant 1 : index
    %c0_9 = arith.constant 0 : index
    %c0_10 = arith.constant 0 : index
    %10 = vector.load %arg10[%c1_8, %c0_9, %c0_10] : memref<16x128x512xbf16, #tpu.memory_space<vmem>>, vector<1x128x512xbf16>
    %11 = vector.shape_cast %10 : vector<1x128x512xbf16> to vector<128x512xbf16>
    %cst_11 = arith.constant dense<0.000000e+00> : vector<2x512xf32>
    %12 = tpu.matmul %9, %11, %cst_11 {dimension_numbers = #tpu.dot_dimension_numbers<[1], [0], [0], [1], [0, 0, 1, 1], [], []>} : vector<2x128xbf16>, vector<128x512xbf16>, vector<2x512xf32> -> vector<2x512xf32>
    %13 = arith.addf %6, %12 : vector<2x512xf32>
    %c0_12 = arith.constant 0 : index
    %c2 = arith.constant 2 : index
    %c0_13 = arith.constant 0 : index
    %14 = vector.load %arg15[%c0_12, %c2, %c0_13] : memref<2x24x128xf32, #tpu.memory_space<vmem>>, vector<2x1x128xf32>
    %15 = vector.shape_cast %14 : vector<2x1x128xf32> to vector<2x128xf32>
    %16 = arith.truncf %15 : vector<2x128xf32> to vector<2x128xbf16>
    %c2_14 = arith.constant 2 : index
    %c0_15 = arith.constant 0 : index
    %c0_16 = arith.constant 0 : index
    %17 = vector.load %arg10[%c2_14, %c0_15, %c0_16] : memref<16x128x512xbf16, #tpu.memory_space<vmem>>, vector<1x128x512xbf16>
    %18 = vector.shape_cast %17 : vector<1x128x512xbf16> to vector<128x512xbf16>
    %cst_17 = arith.constant dense<0.000000e+00> : vector<2x512xf32>
    %19 = tpu.matmul %16, %18, %cst_17 {dimension_numbers = #tpu.dot_dimension_numbers<[1], [0], [0], [1], [0, 0, 1, 1], [], []>} : vector<2x128xbf16>, vector<128x512xbf16>, vector<2x512xf32> -> vector<2x512xf32>
    %20 = arith.addf %13, %19 : vector<2x512xf32>
    %c0_18 = arith.constant 0 : index
    %c3 = arith.constant 3 : index
    %c0_19 = arith.constant 0 : index
    %21 = vector.load %arg15[%c0_18, %c3, %c0_19] : memref<2x24x128xf32, #tpu.memory_space<vmem>>, vector<2x1x128xf32>
    %22 = vector.shape_cast %21 : vector<2x1x128xf32> to vector<2x128xf32>
    %23 = arith.truncf %22 : vector<2x128xf32> to vector<2x128xbf16>
    %c3_20 = arith.constant 3 : index
    %c0_21 = arith.constant 0 : index
    %c0_22 = arith.constant 0 : index
    %24 = vector.load %arg10[%c3_20, %c0_21, %c0_22] : memref<16x128x512xbf16, #tpu.memory_space<vmem>>, vector<1x128x512xbf16>
    %25 = vector.shape_cast %24 : vector<1x128x512xbf16> to vector<128x512xbf16>
    %cst_23 = arith.constant dense<0.000000e+00> : vector<2x512xf32>
    %26 = tpu.matmul %23, %25, %cst_23 {dimension_numbers = #tpu.dot_dimension_numbers<[1], [0], [0], [1], [0, 0, 1, 1], [], []>} : vector<2x128xbf16>, vector<128x512xbf16>, vector<2x512xf32> -> vector<2x512xf32>
    %27 = arith.addf %20, %26 : vector<2x512xf32>
    %c0_24 = arith.constant 0 : index
    %c6 = arith.constant 6 : index
    %c0_25 = arith.constant 0 : index
    %28 = vector.load %arg15[%c0_24, %c6, %c0_25] : memref<2x24x128xf32, #tpu.memory_space<vmem>>, vector<2x1x128xf32>
    %29 = vector.shape_cast %28 : vector<2x1x128xf32> to vector<2x128xf32>
    %30 = arith.truncf %29 : vector<2x128xf32> to vector<2x128xbf16>
    %c4 = arith.constant 4 : index
    %c0_26 = arith.constant 0 : index
    %c0_27 = arith.constant 0 : index
    %31 = vector.load %arg10[%c4, %c0_26, %c0_27] : memref<16x128x512xbf16, #tpu.memory_space<vmem>>, vector<1x128x512xbf16>
    %32 = vector.shape_cast %31 : vector<1x128x512xbf16> to vector<128x512xbf16>
    %cst_28 = arith.constant dense<0.000000e+00> : vector<2x512xf32>
    %33 = tpu.matmul %30, %32, %cst_28 {dimension_numbers = #tpu.dot_dimension_numbers<[1], [0], [0], [1], [0, 0, 1, 1], [], []>} : vector<2x128xbf16>, vector<128x512xbf16>, vector<2x512xf32> -> vector<2x512xf32>
    %34 = arith.addf %27, %33 : vector<2x512xf32>
    %c0_29 = arith.constant 0 : index
    %c7 = arith.constant 7 : index
    %c0_30 = arith.constant 0 : index
    %35 = vector.load %arg15[%c0_29, %c7, %c0_30] : memref<2x24x128xf32, #tpu.memory_space<vmem>>, vector<2x1x128xf32>
    %36 = vector.shape_cast %35 : vector<2x1x128xf32> to vector<2x128xf32>
    %37 = arith.truncf %36 : vector<2x128xf32> to vector<2x128xbf16>
    %c5 = arith.constant 5 : index
    %c0_31 = arith.constant 0 : index
    %c0_32 = arith.constant 0 : index
    %38 = vector.load %arg10[%c5, %c0_31, %c0_32] : memref<16x128x512xbf16, #tpu.memory_space<vmem>>, vector<1x128x512xbf16>
    %39 = vector.shape_cast %38 : vector<1x128x512xbf16> to vector<128x512xbf16>
    %cst_33 = arith.constant dense<0.000000e+00> : vector<2x512xf32>
    %40 = tpu.matmul %37, %39, %cst_33 {dimension_numbers = #tpu.dot_dimension_numbers<[1], [0], [0], [1], [0, 0, 1, 1], [], []>} : vector<2x128xbf16>, vector<128x512xbf16>, vector<2x512xf32> -> vector<2x512xf32>
    %41 = arith.addf %34, %40 : vector<2x512xf32>
    %c0_34 = arith.constant 0 : index
    %c8 = arith.constant 8 : index
    %c0_35 = arith.constant 0 : index
    %42 = vector.load %arg15[%c0_34, %c8, %c0_35] : memref<2x24x128xf32, #tpu.memory_space<vmem>>, vector<2x1x128xf32>
    %43 = vector.shape_cast %42 : vector<2x1x128xf32> to vector<2x128xf32>
    %44 = arith.truncf %43 : vector<2x128xf32> to vector<2x128xbf16>
    %c6_36 = arith.constant 6 : index
    %c0_37 = arith.constant 0 : index
    %c0_38 = arith.constant 0 : index
    %45 = vector.load %arg10[%c6_36, %c0_37, %c0_38] : memref<16x128x512xbf16, #tpu.memory_space<vmem>>, vector<1x128x512xbf16>
    %46 = vector.shape_cast %45 : vector<1x128x512xbf16> to vector<128x512xbf16>
    %cst_39 = arith.constant dense<0.000000e+00> : vector<2x512xf32>
    %47 = tpu.matmul %44, %46, %cst_39 {dimension_numbers = #tpu.dot_dimension_numbers<[1], [0], [0], [1], [0, 0, 1, 1], [], []>} : vector<2x128xbf16>, vector<128x512xbf16>, vector<2x512xf32> -> vector<2x512xf32>
    %48 = arith.addf %41, %47 : vector<2x512xf32>
    %c0_40 = arith.constant 0 : index
    %c9 = arith.constant 9 : index
    %c0_41 = arith.constant 0 : index
    %49 = vector.load %arg15[%c0_40, %c9, %c0_41] : memref<2x24x128xf32, #tpu.memory_space<vmem>>, vector<2x1x128xf32>
    %50 = vector.shape_cast %49 : vector<2x1x128xf32> to vector<2x128xf32>
    %51 = arith.truncf %50 : vector<2x128xf32> to vector<2x128xbf16>
    %c7_42 = arith.constant 7 : index
    %c0_43 = arith.constant 0 : index
    %c0_44 = arith.constant 0 : index
    %52 = vector.load %arg10[%c7_42, %c0_43, %c0_44] : memref<16x128x512xbf16, #tpu.memory_space<vmem>>, vector<1x128x512xbf16>
    %53 = vector.shape_cast %52 : vector<1x128x512xbf16> to vector<128x512xbf16>
    %cst_45 = arith.constant dense<0.000000e+00> : vector<2x512xf32>
    %54 = tpu.matmul %51, %53, %cst_45 {dimension_numbers = #tpu.dot_dimension_numbers<[1], [0], [0], [1], [0, 0, 1, 1], [], []>} : vector<2x128xbf16>, vector<128x512xbf16>, vector<2x512xf32> -> vector<2x512xf32>
    %55 = arith.addf %48, %54 : vector<2x512xf32>
    %c0_46 = arith.constant 0 : index
    %c12 = arith.constant 12 : index
    %c0_47 = arith.constant 0 : index
    %56 = vector.load %arg15[%c0_46, %c12, %c0_47] : memref<2x24x128xf32, #tpu.memory_space<vmem>>, vector<2x1x128xf32>
    %57 = vector.shape_cast %56 : vector<2x1x128xf32> to vector<2x128xf32>
    %58 = arith.truncf %57 : vector<2x128xf32> to vector<2x128xbf16>
    %c8_48 = arith.constant 8 : index
    %c0_49 = arith.constant 0 : index
    %c0_50 = arith.constant 0 : index
    %59 = vector.load %arg10[%c8_48, %c0_49, %c0_50] : memref<16x128x512xbf16, #tpu.memory_space<vmem>>, vector<1x128x512xbf16>
    %60 = vector.shape_cast %59 : vector<1x128x512xbf16> to vector<128x512xbf16>
    %cst_51 = arith.constant dense<0.000000e+00> : vector<2x512xf32>
    %61 = tpu.matmul %58, %60, %cst_51 {dimension_numbers = #tpu.dot_dimension_numbers<[1], [0], [0], [1], [0, 0, 1, 1], [], []>} : vector<2x128xbf16>, vector<128x512xbf16>, vector<2x512xf32> -> vector<2x512xf32>
    %62 = arith.addf %55, %61 : vector<2x512xf32>
    %c0_52 = arith.constant 0 : index
    %c13 = arith.constant 13 : index
    %c0_53 = arith.constant 0 : index
    %63 = vector.load %arg15[%c0_52, %c13, %c0_53] : memref<2x24x128xf32, #tpu.memory_space<vmem>>, vector<2x1x128xf32>
    %64 = vector.shape_cast %63 : vector<2x1x128xf32> to vector<2x128xf32>
    %65 = arith.truncf %64 : vector<2x128xf32> to vector<2x128xbf16>
    %c9_54 = arith.constant 9 : index
    %c0_55 = arith.constant 0 : index
    %c0_56 = arith.constant 0 : index
    %66 = vector.load %arg10[%c9_54, %c0_55, %c0_56] : memref<16x128x512xbf16, #tpu.memory_space<vmem>>, vector<1x128x512xbf16>
    %67 = vector.shape_cast %66 : vector<1x128x512xbf16> to vector<128x512xbf16>
    %cst_57 = arith.constant dense<0.000000e+00> : vector<2x512xf32>
    %68 = tpu.matmul %65, %67, %cst_57 {dimension_numbers = #tpu.dot_dimension_numbers<[1], [0], [0], [1], [0, 0, 1, 1], [], []>} : vector<2x128xbf16>, vector<128x512xbf16>, vector<2x512xf32> -> vector<2x512xf32>
    %69 = arith.addf %62, %68 : vector<2x512xf32>
    %c0_58 = arith.constant 0 : index
    %c14 = arith.constant 14 : index
    %c0_59 = arith.constant 0 : index
    %70 = vector.load %arg15[%c0_58, %c14, %c0_59] : memref<2x24x128xf32, #tpu.memory_space<vmem>>, vector<2x1x128xf32>
    %71 = vector.shape_cast %70 : vector<2x1x128xf32> to vector<2x128xf32>
    %72 = arith.truncf %71 : vector<2x128xf32> to vector<2x128xbf16>
    %c10 = arith.constant 10 : index
    %c0_60 = arith.constant 0 : index
    %c0_61 = arith.constant 0 : index
    %73 = vector.load %arg10[%c10, %c0_60, %c0_61] : memref<16x128x512xbf16, #tpu.memory_space<vmem>>, vector<1x128x512xbf16>
    %74 = vector.shape_cast %73 : vector<1x128x512xbf16> to vector<128x512xbf16>
    %cst_62 = arith.constant dense<0.000000e+00> : vector<2x512xf32>
    %75 = tpu.matmul %72, %74, %cst_62 {dimension_numbers = #tpu.dot_dimension_numbers<[1], [0], [0], [1], [0, 0, 1, 1], [], []>} : vector<2x128xbf16>, vector<128x512xbf16>, vector<2x512xf32> -> vector<2x512xf32>
    %76 = arith.addf %69, %75 : vector<2x512xf32>
    %c0_63 = arith.constant 0 : index
    %c15 = arith.constant 15 : index
    %c0_64 = arith.constant 0 : index
    %77 = vector.load %arg15[%c0_63, %c15, %c0_64] : memref<2x24x128xf32, #tpu.memory_space<vmem>>, vector<2x1x128xf32>
    %78 = vector.shape_cast %77 : vector<2x1x128xf32> to vector<2x128xf32>
    %79 = arith.truncf %78 : vector<2x128xf32> to vector<2x128xbf16>
    %c11 = arith.constant 11 : index
    %c0_65 = arith.constant 0 : index
    %c0_66 = arith.constant 0 : index
    %80 = vector.load %arg10[%c11, %c0_65, %c0_66] : memref<16x128x512xbf16, #tpu.memory_space<vmem>>, vector<1x128x512xbf16>
    %81 = vector.shape_cast %80 : vector<1x128x512xbf16> to vector<128x512xbf16>
    %cst_67 = arith.constant dense<0.000000e+00> : vector<2x512xf32>
    %82 = tpu.matmul %79, %81, %cst_67 {dimension_numbers = #tpu.dot_dimension_numbers<[1], [0], [0], [1], [0, 0, 1, 1], [], []>} : vector<2x128xbf16>, vector<128x512xbf16>, vector<2x512xf32> -> vector<2x512xf32>
    %83 = arith.addf %76, %82 : vector<2x512xf32>
    %c0_68 = arith.constant 0 : index
    %c18 = arith.constant 18 : index
    %c0_69 = arith.constant 0 : index
    %84 = vector.load %arg15[%c0_68, %c18, %c0_69] : memref<2x24x128xf32, #tpu.memory_space<vmem>>, vector<2x1x128xf32>
    %85 = vector.shape_cast %84 : vector<2x1x128xf32> to vector<2x128xf32>
    %86 = arith.truncf %85 : vector<2x128xf32> to vector<2x128xbf16>
    %c12_70 = arith.constant 12 : index
    %c0_71 = arith.constant 0 : index
    %c0_72 = arith.constant 0 : index
    %87 = vector.load %arg10[%c12_70, %c0_71, %c0_72] : memref<16x128x512xbf16, #tpu.memory_space<vmem>>, vector<1x128x512xbf16>
    %88 = vector.shape_cast %87 : vector<1x128x512xbf16> to vector<128x512xbf16>
    %cst_73 = arith.constant dense<0.000000e+00> : vector<2x512xf32>
    %89 = tpu.matmul %86, %88, %cst_73 {dimension_numbers = #tpu.dot_dimension_numbers<[1], [0], [0], [1], [0, 0, 1, 1], [], []>} : vector<2x128xbf16>, vector<128x512xbf16>, vector<2x512xf32> -> vector<2x512xf32>
    %90 = arith.addf %83, %89 : vector<2x512xf32>
    %c0_74 = arith.constant 0 : index
    %c19 = arith.constant 19 : index
    %c0_75 = arith.constant 0 : index
    %91 = vector.load %arg15[%c0_74, %c19, %c0_75] : memref<2x24x128xf32, #tpu.memory_space<vmem>>, vector<2x1x128xf32>
    %92 = vector.shape_cast %91 : vector<2x1x128xf32> to vector<2x128xf32>
    %93 = arith.truncf %92 : vector<2x128xf32> to vector<2x128xbf16>
    %c13_76 = arith.constant 13 : index
    %c0_77 = arith.constant 0 : index
    %c0_78 = arith.constant 0 : index
    %94 = vector.load %arg10[%c13_76, %c0_77, %c0_78] : memref<16x128x512xbf16, #tpu.memory_space<vmem>>, vector<1x128x512xbf16>
    %95 = vector.shape_cast %94 : vector<1x128x512xbf16> to vector<128x512xbf16>
    %cst_79 = arith.constant dense<0.000000e+00> : vector<2x512xf32>
    %96 = tpu.matmul %93, %95, %cst_79 {dimension_numbers = #tpu.dot_dimension_numbers<[1], [0], [0], [1], [0, 0, 1, 1], [], []>} : vector<2x128xbf16>, vector<128x512xbf16>, vector<2x512xf32> -> vector<2x512xf32>
    %97 = arith.addf %90, %96 : vector<2x512xf32>
    %c0_80 = arith.constant 0 : index
    %c20 = arith.constant 20 : index
    %c0_81 = arith.constant 0 : index
    %98 = vector.load %arg15[%c0_80, %c20, %c0_81] : memref<2x24x128xf32, #tpu.memory_space<vmem>>, vector<2x1x128xf32>
    %99 = vector.shape_cast %98 : vector<2x1x128xf32> to vector<2x128xf32>
    %100 = arith.truncf %99 : vector<2x128xf32> to vector<2x128xbf16>
    %c14_82 = arith.constant 14 : index
    %c0_83 = arith.constant 0 : index
    %c0_84 = arith.constant 0 : index
    %101 = vector.load %arg10[%c14_82, %c0_83, %c0_84] : memref<16x128x512xbf16, #tpu.memory_space<vmem>>, vector<1x128x512xbf16>
    %102 = vector.shape_cast %101 : vector<1x128x512xbf16> to vector<128x512xbf16>
    %cst_85 = arith.constant dense<0.000000e+00> : vector<2x512xf32>
    %103 = tpu.matmul %100, %102, %cst_85 {dimension_numbers = #tpu.dot_dimension_numbers<[1], [0], [0], [1], [0, 0, 1, 1], [], []>} : vector<2x128xbf16>, vector<128x512xbf16>, vector<2x512xf32> -> vector<2x512xf32>
    %104 = arith.addf %97, %103 : vector<2x512xf32>
    %c0_86 = arith.constant 0 : index
    %c21 = arith.constant 21 : index
    %c0_87 = arith.constant 0 : index
    %105 = vector.load %arg15[%c0_86, %c21, %c0_87] : memref<2x24x128xf32, #tpu.memory_space<vmem>>, vector<2x1x128xf32>
    %106 = vector.shape_cast %105 : vector<2x1x128xf32> to vector<2x128xf32>
    %107 = arith.truncf %106 : vector<2x128xf32> to vector<2x128xbf16>
    %c15_88 = arith.constant 15 : index
    %c0_89 = arith.constant 0 : index
    %c0_90 = arith.constant 0 : index
    %108 = vector.load %arg10[%c15_88, %c0_89, %c0_90] : memref<16x128x512xbf16, #tpu.memory_space<vmem>>, vector<1x128x512xbf16>
    %109 = vector.shape_cast %108 : vector<1x128x512xbf16> to vector<128x512xbf16>
    %cst_91 = arith.constant dense<0.000000e+00> : vector<2x512xf32>
    %110 = tpu.matmul %107, %109, %cst_91 {dimension_numbers = #tpu.dot_dimension_numbers<[1], [0], [0], [1], [0, 0, 1, 1], [], []>} : vector<2x128xbf16>, vector<128x512xbf16>, vector<2x512xf32> -> vector<2x512xf32>
    %111 = arith.addf %104, %110 : vector<2x512xf32>
    %c0_92 = arith.constant 0 : index
    %c0_93 = arith.constant 0 : index
    %112 = vector.load %arg11[%c0_92, %c0_93] : memref<1x512xf32, #tpu.memory_space<vmem>>, vector<1x512xf32>
    %113 = vector.broadcast %112 : vector<1x512xf32> to vector<2x512xf32>
    %114 = arith.addf %111, %113 : vector<2x512xf32>
    %cst_94 = arith.constant 0.000000e+00 : f32
    %115 = vector.broadcast %cst_94 : f32 to vector<2x512xf32>
    %116 = arith.maximumf %114, %115 : vector<2x512xf32>
    %117 = arith.truncf %116 : vector<2x512xf32> to vector<2x512xbf16>
    %c0_95 = arith.constant 0 : index
    %c0_96 = arith.constant 0 : index
    %118 = vector.load %arg12[%c0_95, %c0_96] : memref<512x128xbf16, #tpu.memory_space<vmem>>, vector<512x128xbf16>
    %cst_97 = arith.constant dense<0.000000e+00> : vector<2x128xf32>
    %119 = tpu.matmul %117, %118, %cst_97 {dimension_numbers = #tpu.dot_dimension_numbers<[1], [0], [0], [1], [0, 0, 1, 1], [], []>} : vector<2x512xbf16>, vector<512x128xbf16>, vector<2x128xf32> -> vector<2x128xf32>
    %c0_98 = arith.constant 0 : index
    %c0_99 = arith.constant 0 : index
    %120 = vector.load %arg13[%c0_98, %c0_99] : memref<1x128xf32, #tpu.memory_space<vmem>>, vector<1x128xf32>
    %121 = vector.broadcast %120 : vector<1x128xf32> to vector<2x128xf32>
    %122 = arith.addf %119, %121 : vector<2x128xf32>
    %c0_100 = arith.constant 0 : index
    %c0_101 = arith.constant 0 : index
    %123 = vector.load %arg14[%c0_100, %c0_101] : memref<2x128xf32, #tpu.memory_space<vmem>>, vector<2x128xf32>
    tpu.vector_store %arg14[%c0_100, %c0_101], %122 {strides = array<i32>} : memref<2x128xf32, #tpu.memory_space<vmem>>, vector<2x128xf32>,
    return
  }
  func.func @transform_0(%arg0: i32) -> (i32, i32, i32) {
    %c0_i32 = arith.constant 0 : i32
    %c0_i32_0 = arith.constant 0 : i32
    %c0_i32_1 = arith.constant 0 : i32
    return %arg0, %c0_i32, %c0_i32_0 : i32, i32, i32
  }
  func.func @transform_1(%arg0: i32) -> (i32, i32) {
    %c0_i32 = arith.constant 0 : i32
    %c0_i32_0 = arith.constant 0 : i32
    %c0_i32_1 = arith.constant 0 : i32
    return %c0_i32, %c0_i32_0 : i32, i32
  }
  func.func @transform_2(%arg0: i32) -> (i32, i32) {
    %c0_i32 = arith.constant 0 : i32
    %c0_i32_0 = arith.constant 0 : i32
    %c0_i32_1 = arith.constant 0 : i32
    return %c0_i32, %c0_i32_0 : i32, i32
  }
  func.func @transform_3(%arg0: i32) -> (i32, i32, i32) {
    %c0_i32 = arith.constant 0 : i32
    %c0_i32_0 = arith.constant 0 : i32
    %c0_i32_1 = arith.constant 0 : i32
    %c0_i32_2 = arith.constant 0 : i32
    return %c0_i32, %c0_i32_0, %c0_i32_1 : i32, i32, i32
  }
  func.func @transform_4(%arg0: i32) -> (i32, i32) {
    %c0_i32 = arith.constant 0 : i32
    %c0_i32_0 = arith.constant 0 : i32
    %c0_i32_1 = arith.constant 0 : i32
    return %c0_i32, %c0_i32_0 : i32, i32
  }
  func.func @transform_5(%arg0: i32) -> (i32, i32, i32) {
    %c0_i32 = arith.constant 0 : i32
    %c0_i32_0 = arith.constant 0 : i32
    %c0_i32_1 = arith.constant 0 : i32
    %c0_i32_2 = arith.constant 0 : i32
    return %c0_i32, %c0_i32_0, %c0_i32_1 : i32, i32, i32
  }
  func.func @transform_6(%arg0: i32) -> (i32, i32) {
    %c0_i32 = arith.constant 0 : i32
    %c0_i32_0 = arith.constant 0 : i32
    %c0_i32_1 = arith.constant 0 : i32
    return %c0_i32, %c0_i32_0 : i32, i32
  }
  func.func @transform_7(%arg0: i32) -> (i32, i32) {
    %c0_i32 = arith.constant 0 : i32
    %c0_i32_0 = arith.constant 0 : i32
    %c0_i32_1 = arith.constant 0 : i32
    return %c0_i32, %c0_i32_0 : i32, i32
  }
  func.func @transform_8(%arg0: i32) -> (i32, i32) {
    %c0_i32 = arith.constant 0 : i32
    %c0_i32_0 = arith.constant 0 : i32
    %c0_i32_1 = arith.constant 0 : i32
    return %c0_i32, %c0_i32_0 : i32, i32
  }
  func.func @transform_9(%arg0: i32) -> (i32, i32, i32) {
    %c0_i32 = arith.constant 0 : i32
    %c0_i32_0 = arith.constant 0 : i32
    %c0_i32_1 = arith.constant 0 : i32
    %c0_i32_2 = arith.constant 0 : i32
    return %c0_i32, %c0_i32_0, %c0_i32_1 : i32, i32, i32
  }
  func.func @transform_10(%arg0: i32) -> (i32, i32) {
    %c0_i32 = arith.constant 0 : i32
    %c0_i32_0 = arith.constant 0 : i32
    %c0_i32_1 = arith.constant 0 : i32
    return %c0_i32, %c0_i32_0 : i32, i32
  }
  func.func @transform_11(%arg0: i32) -> (i32, i32) {
    %c0_i32 = arith.constant 0 : i32
    %c0_i32_0 = arith.constant 0 : i32
    %c0_i32_1 = arith.constant 0 : i32
    return %c0_i32, %c0_i32_0 : i32, i32
  }
  func.func @transform_12(%arg0: i32) -> (i32, i32) {
    %c0_i32 = arith.constant 0 : i32
    %c0_i32_0 = arith.constant 0 : i32
    %c0_i32_1 = arith.constant 0 : i32
    return %c0_i32, %c0_i32_0 : i32, i32
  }
  func.func @transform_13(%arg0: i32) -> (i32, i32) {
    %c0_i32 = arith.constant 0 : i32
    %c0_i32_0 = arith.constant 0 : i32
    return %arg0, %c0_i32 : i32, i32
  }
}

</mosaic_0001>

<bundles_post_ra>
// kernel: fed_model_forward.1
= control target key start
LH: loop header
LB: loop body
LE: loop exit
PB: predicated region body
PF: predicated region fallthrough
CT: control target
= control target key end

     0   :  { %18 = vsyncpa [#allocation4], 0  ;;  %s11726_s25 = smov 0   ;;  %s14500_s0 = inlined_call_operand.vmem [shape: bf16[2,296,128], index: 0, kind: input, shape index: {}]   ;;  %s14501_s1 = inlined_call_operand.vmem [shape: bf16[128,32], index: 1, kind: input, shape index: {}]   ;;  %s14502_s2 = inlined_call_operand.vmem [shape: f32[1,32], index: 2, kind: input, shape index: {}]   ;;  %s14503_s3 = inlined_call_operand.vmem [shape: bf16[9,32,64], index: 3, kind: input, shape index: {}]   ;;  %s14504_s4 = inlined_call_operand.vmem [shape: f32[1,64], index: 4, kind: input, shape index: {}]   ;;  %s14505_s5 = inlined_call_operand.vmem [shape: bf16[9,64,128], index: 5, kind: input, shape index: {}]   ;;  %s14506_s6 = inlined_call_operand.vmem [shape: f32[1,128], index: 6, kind: input, shape index: {}]   ;;  %s14507_s7 = inlined_call_operand.vmem [shape: bf16[112,272], index: 7, kind: input, shape index: {}]   ;;  %s14508_s8 = inlined_call_operand.vmem [shape: bf16[40,72], index: 8, kind: input, shape index: {}]   ;;  %s14509_s9 = inlined_call_operand.vmem [shape: bf16[16,128,512], index: 9, kind: input, shape index: {}]   ;;  %s14510_s10 = inlined_call_operand.vmem [shape: f32[1,512], index: 10, kind: input, shape index: {}]   ;;  %s14511_s11 = inlined_call_operand.vmem [shape: bf16[512,128], index: 11, kind: input, shape index: {}]   ;;  %s14512_s12 = inlined_call_operand.vmem [shape: f32[1,128], index: 12, kind: input, shape index: {}]   ;;  %s14513_s13 = inlined_call_operand.hbm [shape: f32[2,128], index: 13, kind: output, shape index: {}]  }
   0x1 LB: > { %v10708_v0 = vld [vmem:[%s14501_s1] sm:$0xff]   ;;  %v14514_v1 = vmov 0.0   ;;  %v10709_v2 = vld [vmem:[%s14501_s1 + $0x8] sm:$0xff]   ;;  %vm11653_vm0 = vmmov 0   ;;  %s9964_s30 = smul.u32 148, %s11650_s25  ;;  %v10710_v3 = vld [vmem:[%s14501_s1 + $0x10] sm:$0xff]   ;;  %s11650_s25 = sphi %s11726_s25, %s51_s25  }
   0x2   : > { %10236 = vmatprep.subr.bf16.mxu0 %v14514_v1  ;;  %10252 = vmatprep.mubr.msk.bf16.mxu0 %vm11653_vm0, %v14514_v1  ;;  %v10711_v4 = vld [vmem:[%s14501_s1 + $0x18] sm:$0xff]   ;;  %v10712_v5 = vld [vmem:[%s14501_s1 + $0x20] sm:$0xff]   ;;  %v10713_v6 = vld [vmem:[%s14501_s1 + $0x28] sm:$0xff]   ;;  %vm531_vm1 = vcmask 1046528   ;;  %vm716_vm2 = vcmask 1045504   ;;  %vm1004_vm3 = vcmask 130048  }
   0x3   : > { %10237 = vmatpush3.bf16.msra.mxu0 %v10708_v0  ;;  %s11749_s18 = scalar_lea.vmem %s14500_s0, %s9964_s30  ;;  %v10714_v7 = vld [vmem:[%s14501_s1 + $0x30] sm:$0xff]   ;;  %v10715_v8 = vld [vmem:[%s14501_s1 + $0x38] sm:$0xff]   ;;  %v11832_v28 = vld [vmem:[%s14502_s2] ss:$0 sm:$0xff]  ;;  %vm1633_vm4 = vcmask 1042432   ;;  %vm1932_vm6 = vcmask 1041408  }
   0x4   : > { %10238 = vmatprep.subr.bf16.mxu0 %v14514_v1  ;;  %v10716_v9 = vld [vmem:[%s11749_s18] sm:$0xff]   ;;  %v10717_v10 = vld [vmem:[%s11749_s18 + $0x8] sm:$0xff]   ;;  %v10718_v11 = vld [vmem:[%s11749_s18 + $0x10] sm:$0xff]   ;;  %vm1220_vm5 = vsmask.f32 7424  ;;  %vm1280_vm7 = vcmask 261120  }
   0x5   : > { %v10719_v12 = vld [vmem:[%s11749_s18 + $0x18] sm:$0xff]   ;;  %v10720_v13 = vld [vmem:[%s11749_s18 + $0x20] sm:$0xff]   ;;  %v10721_v14 = vld [vmem:[%s11749_s18 + $0x28] sm:$0xff]   ;;  %vm1773_vm8 = vsmask.f32 2304  ;;  %vm2360_vm9 = vcmask 1044480  }
   0x6   : > { %v10722_v15 = vld [vmem:[%s11749_s18 + $0x30] sm:$0xff]   ;;  %v10723_v16 = vld [vmem:[%s11749_s18 + $0x38] sm:$0xff]   ;;  %v10724_v17 = vld [vmem:[%s11749_s18 + $0x40] sm:$0xff]   ;;  %vm2210_vm10 = vsmask.f32 5376  ;;  %vm2656_vm11 = vcmask 1043456  }
   0x7   : > { %10239 = vmatpush3.bf16.msra.mxu0 %v10709_v2  ;;  %v10725_v18 = vld [vmem:[%s11749_s18 + $0x48] sm:$0xff]   ;;  %v10726_v19 = vld [vmem:[%s11749_s18 + $0x50] sm:$0xff]   ;;  %v10727_v20 = vld [vmem:[%s11749_s18 + $0x58] sm:$0xff]   ;;  %vm2646_vm12 = vcmask 588800   ;;  %vm2775_vm13 = vcmask 523264   ;;  %vm3498_vm15 = vcmask 1040384  }
   0x8   : > { %10240 = vmatprep.subr.bf16.mxu0 %v14514_v1  ;;  %v10728_v21 = vld [vmem:[%s11749_s18 + $0x60] sm:$0xff]   ;;  %v10729_v22 = vld [vmem:[%s11749_s18 + $0x68] sm:$0xff]   ;;  %v10730_v23 = vld [vmem:[%s11749_s18 + $0x70] sm:$0xff]   ;;  %vm3103_vm14 = vsmask.f32 4352  ;;  %s3598_s15 = smul.u32 24, %s11650_s25 }
   0x9   : > { %v10731_v24 = vld [vmem:[%s11749_s18 + $0x78] sm:$0xff]   ;;  %v10732_v25 = vld [vmem:[%s11749_s18 + $0x80] sm:$0xff]   ;;  %v10733_v26 = vld [vmem:[%s11749_s18 + $0x88] sm:$0xff]   ;;  %s51_s25 = sadd.s32 1, %s11650_s25  }
   0xa   : > { %v10734_v27 = vld [vmem:[%s11749_s18 + $0x90] ss:$0 sps:$4 sm:$0xff]   ;;  %s3599_s16 = scalar_lea.vmem [#allocation2], %s3598_s15  ;;  %p48_p0 = scmp.ge.s32.totalorder %s51_s25, 2  }
   0xb   : > { %10241 = vmatpush3.bf16.msra.mxu0 %v10710_v3  ;;  %s11655_s29 = smov (%p48_p0), [#allocation3]  }
   0xc   : > { %10242 = vmatprep.subr.bf16.mxu0 %v14514_v1  ;;  %s8635_s30 = sshll.u32 (%p48_p0), %s11655_s29, 4  ;;  %s8636_s30 = int_to_ptr.vmem [resolvable:$true] %s8635_s30 }
   0xd   :  { %s11620_s14 = scalar_lea.vmem (%p48_p0), %s8636_s30, 32  ;;  %p11625_p2 = scmp.lt.s32.totalorder (%p48_p0), %s8636_s30, %s8636_s30 }
   0xe   :  { %p11621_p1 = scmp.ne.s32.totalorder (%p48_p0), %s8636_s30, %s11620_s14  ;;  %p11626_p3 = scmp.lt.s32.totalorder (%p48_p0), %s11620_s14, %s11620_s14 }
   0xf   : > { %10243 = vmatpush3.bf16.msra.mxu0 %v10711_v4 }
  0x10   : > { %10244 = vmatprep.subr.bf16.mxu0 %v14514_v1  ;;  %p11627_p4 = por (%p48_p0), %p11626_p3, %p11625_p2 }
  0x12   :  { %p11628_p5 = pnand (%p48_p0), %p11627_p4, %p11621_p1 }
  0x13   : > { %10245 = vmatpush3.bf16.msra.mxu0 %v10712_v5 }
  0x14   : > { %10246 = vmatprep.subr.bf16.mxu0 %v14514_v1 }
  0x17   : > { %10247 = vmatpush3.bf16.msra.mxu0 %v10713_v6 }
  0x18   : > { %10248 = vmatprep.subr.bf16.mxu0 %v14514_v1 }
  0x1b   : > { %10249 = vmatpush3.bf16.msra.mxu0 %v10714_v7 }
  0x1c   : > { %10250 = vmatprep.subr.bf16.mxu0 %v14514_v1 }
  0x1f   : > { %10251 = vmatpush3.bf16.msra.mxu0 %v10715_v8 }
  0x20   : > { %10502 = vmatprep.subr.bf16.mxu0 %v14514_v1 }
  0x22   : > { %10253 = vmatmul.mubr.bf16.vlgmr.msra.gmra.mrb[0].mxu0 %v10716_v9 }
  0x23   : > { %10256 = vmatprep.mubr.msk.bf16.mxu0 %vm11653_vm0, %v14514_v1 }
  0x2a   : > { %10257 = vmatmul.mubr.bf16.gmra.mrb[4].mxu0 %v10717_v10 }
  0x2b   : > { %10260 = vmatprep.mubr.msk.bf16.mxu0 %vm11653_vm0, %v14514_v1 }
  0x32   : > { %10261 = vmatmul.mubr.bf16.gmra.mrb[8].mxu0 %v10718_v11 }
  0x33   : > { %10264 = vmatprep.mubr.msk.bf16.mxu0 %vm11653_vm0, %v14514_v1 }
  0x3a   : > { %10265 = vmatmul.mubr.bf16.gmra.mrb[12].mxu0 %v10719_v12 }
  0x3b   : > { %10268 = vmatprep.mubr.msk.bf16.mxu0 %vm11653_vm0, %v14514_v1 }
  0x42   : > { %10269 = vmatmul.mubr.bf16.gmra.mrb[16].mxu0 %v10720_v13 }
  0x43   : > { %10272 = vmatprep.mubr.msk.bf16.mxu0 %vm11653_vm0, %v14514_v1 }
  0x4a   : > { %10273 = vmatmul.mubr.bf16.gmra.mrb[20].mxu0 %v10721_v14 }
  0x4b   : > { %10276 = vmatprep.mubr.msk.bf16.mxu0 %vm11653_vm0, %v14514_v1 }
  0x52   : > { %10277 = vmatmul.mubr.bf16.gmra.mrb[24].mxu0 %v10722_v15 }
  0x53   : > { %10280 = vmatprep.mubr.msk.bf16.mxu0 %vm11653_vm0, %v14514_v1 }
  0x5a   : > { %10281 = vmatmul.mubr.bf16.gmra.mrb[28].mxu0 %v10723_v16 }
  0x5b   : > { %10284 = vmatprep.mubr.msk.bf16.mxu0 %vm11653_vm0, %v14514_v1 }
  0x62   : > { %10285 = vmatmul.mubr.bf16.gmra.mrb[32].mxu0 %v10724_v17  ;;  %v10737_v17 = vld [vmem:[%s14507_s7 + $0x4] ss:$12 sps:$4 sm:$0xff]  }
  0x63   : > { %10288 = vmatprep.mubr.msk.bf16.mxu0 %vm11653_vm0, %v14514_v1  ;;  %1058 = vmatprep.mubr.bf16.mxu1 %v10737_v17 }
  0x6a   : > { %10289 = vmatmul.mubr.bf16.gmra.mrb[36].mxu0 %v10725_v18 }
  0x6b   : > { %10292 = vmatprep.mubr.msk.bf16.mxu0 %vm11653_vm0, %v14514_v1 }
  0x72   : > { %10293 = vmatmul.mubr.bf16.gmra.mrb[40].mxu0 %v10726_v19 }
  0x73   : > { %10296 = vmatprep.mubr.msk.bf16.mxu0 %vm11653_vm0, %v14514_v1 }
  0x7a   : > { %10297 = vmatmul.mubr.bf16.gmra.mrb[44].mxu0 %v10727_v20 }
  0x7b   : > { %10300 = vmatprep.mubr.msk.bf16.mxu0 %vm11653_vm0, %v14514_v1 }
  0x82   : > { %10301 = vmatmul.mubr.bf16.gmra.mrb[48].mxu0 %v10728_v21 }
  0x83   : > { %10304 = vmatprep.mubr.msk.bf16.mxu0 %vm11653_vm0, %v14514_v1 }
  0x8a   : > { %10305 = vmatmul.mubr.bf16.gmra.mrb[52].mxu0 %v10729_v22 }
  0x8b   : > { %10308 = vmatprep.mubr.msk.bf16.mxu0 %vm11653_vm0, %v14514_v1 }
  0x92   : > { %10309 = vmatmul.mubr.bf16.gmra.mrb[56].mxu0 %v10730_v23 }
  0x93   : > { %10312 = vmatprep.mubr.msk.bf16.mxu0 %vm11653_vm0, %v14514_v1 }
  0x9a   : > { %10313 = vmatmul.mubr.bf16.gmra.mrb[60].mxu0 %v10731_v24 }
  0x9b   : > { %10316 = vmatprep.mubr.msk.bf16.mxu0 %vm11653_vm0, %v14514_v1 }
  0xa2   : > { %10317 = vmatmul.mubr.bf16.gmra.mrb[64].mxu0 %v10732_v25 }
  0xa3   : > { %10320 = vmatprep.mubr.msk.bf16.mxu0 %vm11653_vm0, %v14514_v1 }
  0xaa   : > { %10321 = vmatmul.mubr.bf16.gmra.mrb[68].mxu0 %v10733_v26 }
  0xab   : > { %10324 = vmatprep.mubr.msk.bf16.mxu0 %vm11653_vm0, %v14514_v1 }
  0xb2   : > { %10325 = vmatmul.mubr.bf16.gmra.mrb[72].mxu0 %v10734_v27 }
  0xb3   : > { %10512 = vmatprep.mubr.msk.bf16.mxu0 %vm11653_vm0, %v14514_v1 }
  0xf5   : > { %v309_v29 = vpop.f32.mrb[0].mxu0 }
  0xf6   : > { %v310_v30 = vadd.f32 %v11832_v28, %v309_v29  ;;  %v10254_v31 = vpop.f32.mrb[1].mxu0 }
  0xf7   : > { %v312_v32 = vpop.f32.mrb[2].mxu0 }
  0xf8   : > { %v459_v33 = vmax.f32 %v310_v30, 0.0  ;;  %v313_v34 = vadd.f32 %v11832_v28, %v312_v32  ;;  %v10255_v35 = vpop.f32.mrb[3].mxu0 }
  0xfa   : > { %v460_v36 = vmax.f32 %v313_v34, 0.0  ;;  %v532_v37 = vrot.slane %v459_v33, 1 }
  0xfc   : > { %v533_v38 = vrot.slane %v460_v36, 1 }
  0xfd   : > { %v317_v39 = vpop.f32.mrb[4].mxu0 }
  0xfe   : > { %v318_v40 = vadd.f32 %v11832_v28, %v317_v39  ;;  %v10258_v41 = vpop.f32.mrb[5].mxu0  ;;  %v534_v42 = vsel %vm531_vm1, %v532_v37, %v533_v38 }
  0xff   : > { %v320_v43 = vpop.f32.mrb[6].mxu0  ;;  %v635_v44 = vmax.f32 %v459_v33, %v534_v42 }
 0x100   : > { %v461_v45 = vmax.f32 %v318_v40, 0.0  ;;  %v321_v46 = vadd.f32 %v11832_v28, %v320_v43  ;;  %v10259_v47 = vpop.f32.mrb[7].mxu0 }
 0x102   : > { %v535_v48 = vrot.slane %v461_v45, 1  ;;  %v462_v49 = vmax.f32 %v321_v46, 0.0 }
 0x104   : > { %v537_v50 = vrot.slane %v462_v49, 1  ;;  %v536_v51 = vsel %vm531_vm1, %v533_v38, %v535_v48 }
 0x105   : > { %v325_v52 = vpop.f32.mrb[8].mxu0  ;;  %v636_v53 = vmax.f32 %v460_v36, %v536_v51 }
 0x106   : > { %v538_v54 = vsel %vm531_vm1, %v535_v48, %v537_v50  ;;  %v326_v55 = vadd.f32 %v11832_v28, %v325_v52  ;;  %v10262_v56 = vpop.f32.mrb[9].mxu0 }
 0x107   : > { %v637_v57 = vmax.f32 %v461_v45, %v538_v54  ;;  %v328_v58 = vpop.f32.mrb[10].mxu0 }
 0x108   : > { %v463_v59 = vmax.f32 %v326_v55, 0.0  ;;  %v329_v60 = vadd.f32 %v11832_v28, %v328_v58  ;;  %v10263_v61 = vpop.f32.mrb[11].mxu0 }
 0x109   : > { %v717_v10 = vrot.slane %v637_v57, 2 }
 0x10a   : > { %v539_v62 = vrot.slane %v463_v59, 1  ;;  %v464_v63 = vmax.f32 %v329_v60, 0.0 }
 0x10c   : > { %v540_v0 = vsel %vm531_vm1, %v537_v50, %v539_v62  ;;  %v541_v2 = vrot.slane %v464_v63, 1 }
 0x10d   : > { %v638_v3 = vmax.f32 %v462_v49, %v540_v0  ;;  %v333_v4 = vpop.f32.mrb[12].mxu0 }
 0x10e   : > { %v542_v5 = vsel %vm531_vm1, %v539_v62, %v541_v2  ;;  %v334_v6 = vadd.f32 %v11832_v28, %v333_v4  ;;  %v10266_v7 = vpop.f32.mrb[13].mxu0 }
 0x10f   : > { %v11846_v8 = vmax.f32 %v463_v59, %v542_v5  ;;  %v336_v9 = vpop.f32.mrb[14].mxu0  ;;  %v718_v11 = vrot.slane %v638_v3, 2 }
 0x110   : > { %v465_v12 = vmax.f32 %v334_v6, 0.0  ;;  %v337_v13 = vadd.f32 %v11832_v28, %v336_v9  ;;  %v10267_v14 = vpop.f32.mrb[15].mxu0 }
 0x111   : > { %v719_v15 = vsel %vm716_vm2, %v717_v10, %v718_v11  ;;  %v720_v16 = vrot.slane %v11846_v8, 2 }
 0x112   : > { %v543_v18 = vrot.slane %v465_v12, 1  ;;  %v466_v19 = vmax.f32 %v337_v13, 0.0  ;;  %v820_v20 = vmax.f32 %v635_v44, %v719_v15 }
 0x113   : > { %v721_v21 = vsel %vm716_vm2, %v718_v11, %v720_v16 }
 0x114   : > { %v544_v22 = vsel %vm531_vm1, %v541_v2, %v543_v18  ;;  %v545_v23 = vrot.slane %v466_v19, 1  ;;  %v821_v24 = vmax.f32 %v636_v53, %v721_v21 }
 0x115   : > { %v640_v25 = vmax.f32 %v464_v63, %v544_v22  ;;  %v341_v26 = vpop.f32.mrb[16].mxu0 }
 0x116   : > { %v546_v27 = vsel %vm531_vm1, %v543_v18, %v545_v23  ;;  %v342_v29 = vadd.f32 %v11832_v28, %v341_v26  ;;  %v10270_v30 = vpop.f32.mrb[17].mxu0  ;;  %v11858_v31 = vpack.c.bf16 %v821_v24, %v820_v20 }
 0x117   : > { %v722_v32 = vrot.slane %v640_v25, 2  ;;  %v641_v33 = vmax.f32 %v465_v12, %v546_v27  ;;  %v344_v34 = vpop.f32.mrb[18].mxu0 }
 0x118   : > { %v467_v35 = vmax.f32 %v342_v29, 0.0  ;;  %v345_v36 = vadd.f32 %v11832_v28, %v344_v34  ;;  %v10271_v37 = vpop.f32.mrb[19].mxu0 }
 0x119   : > { %v724_v38 = vrot.slane %v641_v33, 2  ;;  %v723_v39 = vsel %vm716_vm2, %v720_v16, %v722_v32 }
 0x11a   : > { %v547_v40 = vrot.slane %v467_v35, 1  ;;  %v468_v41 = vmax.f32 %v345_v36, 0.0  ;;  %v822_v42 = vmax.f32 %v637_v57, %v723_v39 }
 0x11b   : > { %v725_v43 = vsel %vm716_vm2, %v722_v32, %v724_v38 }
 0x11c   : > { %v548_v44 = vsel %vm531_vm1, %v545_v23, %v547_v40  ;;  %v549_v45 = vrot.slane %v468_v41, 1  ;;  %v823_v46 = vmax.f32 %v638_v3, %v725_v43 }
 0x11d   : > { %v642_v47 = vmax.f32 %v466_v19, %v548_v44  ;;  %v349_v48 = vpop.f32.mrb[20].mxu0 }
 0x11e   : > { %v550_v49 = vsel %vm531_vm1, %v547_v40, %v549_v45  ;;  %v350_v50 = vadd.f32 %v11832_v28, %v349_v48  ;;  %v10274_v51 = vpop.f32.mrb[21].mxu0  ;;  %v11866_v52 = vpack.c.bf16 %v823_v46, %v822_v42 }
 0x11f   : > { %v726_v53 = vrot.slane %v642_v47, 2  ;;  %v643_v54 = vmax.f32 %v467_v35, %v550_v49  ;;  %v352_v55 = vpop.f32.mrb[22].mxu0 }
 0x120   : > { %v469_v56 = vmax.f32 %v350_v50, 0.0  ;;  %v353_v57 = vadd.f32 %v11832_v28, %v352_v55  ;;  %v10275_v58 = vpop.f32.mrb[23].mxu0 }
 0x121   : > { %v728_v59 = vrot.slane %v643_v54, 2  ;;  %v727_v60 = vsel %vm716_vm2, %v724_v38, %v726_v53 }
 0x122   : > { %v551_v61 = vrot.slane %v469_v56, 1  ;;  %v470_v62 = vmax.f32 %v353_v57, 0.0  ;;  %v824_v63 = vmax.f32 %v11846_v8, %v727_v60 }
 0x123   : > { %v729_v0 = vsel %vm716_vm2, %v726_v53, %v728_v59 }
 0x124   : > { %v552_v2 = vsel %vm531_vm1, %v549_v45, %v551_v61  ;;  %v553_v3 = vrot.slane %v470_v62, 1  ;;  %v825_v4 = vmax.f32 %v640_v25, %v729_v0 }
 0x125   : > { %v644_v5 = vmax.f32 %v468_v41, %v552_v2  ;;  %v357_v6 = vpop.f32.mrb[24].mxu0 }
 0x126   : > { %v554_v7 = vsel %vm531_vm1, %v551_v61, %v553_v3  ;;  %v358_v9 = vadd.f32 %v11832_v28, %v357_v6  ;;  %v10278_v10 = vpop.f32.mrb[25].mxu0  ;;  %v11875_v11 = vpack.c.bf16 %v825_v4, %v824_v63 }
 0x127   : > { %v730_v12 = vrot.slane %v644_v5, 2  ;;  %v645_v13 = vmax.f32 %v469_v56, %v554_v7  ;;  %v360_v14 = vpop.f32.mrb[26].mxu0 }
 0x128   : > { %v471_v15 = vmax.f32 %v358_v9, 0.0  ;;  %v361_v8 = vadd.f32 %v11832_v28, %v360_v14  ;;  %v10279_v16 = vpop.f32.mrb[27].mxu0 }
 0x129   : > { %v732_v17 = vrot.slane %v645_v13, 2  ;;  %v731_v18 = vsel %vm716_vm2, %v728_v59, %v730_v12 }
 0x12a   : > { %v555_v19 = vrot.slane %v471_v15, 1  ;;  %v472_v20 = vmax.f32 %v361_v8, 0.0  ;;  %v826_v21 = vmax.f32 %v641_v33, %v731_v18 }
 0x12b   : > { %v733_v22 = vsel %vm716_vm2, %v730_v12, %v732_v17 }
 0x12c   : > { %v556_v23 = vsel %vm531_vm1, %v553_v3, %v555_v19  ;;  %v557_v24 = vrot.slane %v472_v20, 1  ;;  %v827_v25 = vmax.f32 %v642_v47, %v733_v22 }
 0x12d   : > { %v646_v26 = vmax.f32 %v470_v62, %v556_v23  ;;  %v365_v27 = vpop.f32.mrb[28].mxu0 }
 0x12e   : > { %v558_v29 = vsel %vm531_vm1, %v555_v19, %v557_v24  ;;  %v366_v30 = vadd.f32 %v11832_v28, %v365_v27  ;;  %v10282_v32 = vpop.f32.mrb[29].mxu0  ;;  %v11883_v34 = vpack.c.bf16 %v827_v25, %v826_v21 }
 0x12f   : > { %v734_v35 = vrot.slane %v646_v26, 2  ;;  %v647_v36 = vmax.f32 %v471_v15, %v558_v29  ;;  %v368_v37 = vpop.f32.mrb[30].mxu0 }
 0x130   : > { %v473_v38 = vmax.f32 %v366_v30, 0.0  ;;  %v369_v33 = vadd.f32 %v11832_v28, %v368_v37  ;;  %v10283_v39 = vpop.f32.mrb[31].mxu0 }
 0x131   : > { %v736_v40 = vrot.slane %v647_v36, 2  ;;  %v735_v41 = vsel %vm716_vm2, %v732_v17, %v734_v35 }
 0x132   : > { %v559_v42 = vrot.slane %v473_v38, 1  ;;  %v474_v43 = vmax.f32 %v369_v33, 0.0  ;;  %v828_v44 = vmax.f32 %v643_v54, %v735_v41 }
 0x133   : > { %v737_v45 = vsel %vm716_vm2, %v734_v35, %v736_v40 }
 0x134   : > { %v560_v46 = vsel %vm531_vm1, %v557_v24, %v559_v42  ;;  %v561_v47 = vrot.slane %v474_v43, 1  ;;  %v829_v48 = vmax.f32 %v644_v5, %v737_v45 }
 0x135   : > { %v648_v49 = vmax.f32 %v472_v20, %v560_v46  ;;  %v373_v50 = vpop.f32.mrb[32].mxu0 }
 0x136   : > { %v562_v51 = vsel %vm531_vm1, %v559_v42, %v561_v47  ;;  %v374_v53 = vadd.f32 %v11832_v28, %v373_v50  ;;  %v10286_v55 = vpop.f32.mrb[33].mxu0  ;;  %v11891_v56 = vpack.c.bf16 %v829_v48, %v828_v44 }
 0x137   : > { %v738_v57 = vrot.slane %v648_v49, 2  ;;  %v649_v58 = vmax.f32 %v473_v38, %v562_v51  ;;  %v376_v59 = vpop.f32.mrb[34].mxu0 }
 0x138   : > { %v475_v60 = vmax.f32 %v374_v53, 0.0  ;;  %v377_v54 = vadd.f32 %v11832_v28, %v376_v59  ;;  %v10287_v61 = vpop.f32.mrb[35].mxu0 }
 0x139   : > { %v740_v62 = vrot.slane %v649_v58, 2  ;;  %v739_v63 = vsel %vm716_vm2, %v736_v40, %v738_v57 }
 0x13a   : > { %v563_v0 = vrot.slane %v475_v60, 1  ;;  %v476_v2 = vmax.f32 %v377_v54, 0.0  ;;  %v830_v3 = vmax.f32 %v645_v13, %v739_v63 }
 0x13b   : > { %v741_v4 = vsel %vm716_vm2, %v738_v57, %v740_v62 }
 0x13c   : > { %v564_v5 = vsel %vm531_vm1, %v561_v47, %v563_v0  ;;  %v565_v6 = vrot.slane %v476_v2, 1  ;;  %v831_v7 = vmax.f32 %v646_v26, %v741_v4 }
 0x13d   : > { %v650_v9 = vmax.f32 %v474_v43, %v564_v5  ;;  %v381_v10 = vpop.f32.mrb[36].mxu0 }
 0x13e   : > { %v382_v12 = vadd.f32 %v11832_v28, %v381_v10  ;;  %v10290_v14 = vpop.f32.mrb[37].mxu0  ;;  %v566_v15 = vsel %vm531_vm1, %v563_v0, %v565_v6  ;;  %v11899_v8 = vpack.c.bf16 %v831_v7, %v830_v3 }
 0x13f   : > { %v742_v16 = vrot.slane %v650_v9, 2  ;;  %v384_v17 = vpop.f32.mrb[38].mxu0  ;;  %v651_v18 = vmax.f32 %v475_v60, %v566_v15 }
 0x140   : > { %v477_v19 = vmax.f32 %v382_v12, 0.0  ;;  %v385_v13 = vadd.f32 %v11832_v28, %v384_v17  ;;  %v10291_v20 = vpop.f32.mrb[39].mxu0 }
 0x141   : > { %v744_v21 = vrot.slane %v651_v18, 2  ;;  %v743_v22 = vsel %vm716_vm2, %v740_v62, %v742_v16 }
 0x142   : > { %v567_v23 = vrot.slane %v477_v19, 1  ;;  %v478_v24 = vmax.f32 %v385_v13, 0.0  ;;  %v832_v25 = vmax.f32 %v647_v36, %v743_v22 }
 0x143   : > { %v745_v26 = vsel %vm716_vm2, %v742_v16, %v744_v21 }
 0x144   : > { %v569_v27 = vrot.slane %v478_v24, 1  ;;  %v568_v29 = vsel %vm531_vm1, %v565_v6, %v567_v23  ;;  %v833_v30 = vmax.f32 %v648_v49, %v745_v26 }
 0x145   : > { %v389_v32 = vpop.f32.mrb[40].mxu0  ;;  %v652_v35 = vmax.f32 %v476_v2, %v568_v29 }
 0x146   : > { %v570_v37 = vsel %vm531_vm1, %v567_v23, %v569_v27  ;;  %v390_v38 = vadd.f32 %v11832_v28, %v389_v32  ;;  %v10294_v33 = vpop.f32.mrb[41].mxu0  ;;  %v11907_v39 = vpack.c.bf16 %v833_v30, %v832_v25 }
 0x147   : > { %v11909_v40 = vmax.f32 %v477_v19, %v570_v37  ;;  %v392_v41 = vpop.f32.mrb[42].mxu0  ;;  %v746_v42 = vrot.slane %v652_v35, 2 }
 0x148   : > { %v479_v36 = vmax.f32 %v390_v38, 0.0  ;;  %v393_v43 = vadd.f32 %v11832_v28, %v392_v41  ;;  %v10295_v44 = vpop.f32.mrb[43].mxu0 }
 0x149   : > { %v748_v45 = vrot.slane %v11909_v40, 2  ;;  %v747_v46 = vsel %vm716_vm2, %v744_v21, %v746_v42 }
 0x14a   : > { %v571_v47 = vrot.slane %v479_v36, 1  ;;  %v480_v48 = vmax.f32 %v393_v43, 0.0  ;;  %v834_v49 = vmax.f32 %v649_v58, %v747_v46 }
 0x14b   : > { %v749_v50 = vsel %vm716_vm2, %v746_v42, %v748_v45 }
 0x14c   : > { %v572_v51 = vsel %vm531_vm1, %v569_v27, %v571_v47  ;;  %v573_v53 = vrot.slane %v480_v48, 1  ;;  %v835_v55 = vmax.f32 %v650_v9, %v749_v50 }
 0x14d   : > { %v654_v57 = vmax.f32 %v478_v24, %v572_v51  ;;  %v397_v59 = vpop.f32.mrb[44].mxu0 }
 0x14e   : > { %v574_v60 = vsel %vm531_vm1, %v571_v47, %v573_v53  ;;  %v398_v54 = vadd.f32 %v11832_v28, %v397_v59  ;;  %v10298_v61 = vpop.f32.mrb[45].mxu0  ;;  %v11918_v62 = vpack.c.bf16 %v835_v55, %v834_v49 }
 0x14f   : > { %v11920_v63 = vmax.f32 %v479_v36, %v574_v60  ;;  %v400_v0 = vpop.f32.mrb[46].mxu0  ;;  %v750_v2 = vrot.slane %v654_v57, 2 }
 0x150   : > { %v481_v58 = vmax.f32 %v398_v54, 0.0  ;;  %v401_v3 = vadd.f32 %v11832_v28, %v400_v0  ;;  %v10299_v4 = vpop.f32.mrb[47].mxu0 }
 0x151   : > { %v751_v5 = vsel %vm716_vm2, %v748_v45, %v750_v2  ;;  %v752_v6 = vrot.slane %v11920_v63, 2 }
 0x152   : > { %v575_v7 = vrot.slane %v481_v58, 1  ;;  %v482_v9 = vmax.f32 %v401_v3, 0.0  ;;  %v836_v10 = vmax.f32 %v651_v18, %v751_v5 }
 0x153   : > { %v753_v12 = vsel %vm716_vm2, %v750_v2, %v752_v6 }
 0x154   : > { %v576_v14 = vsel %vm531_vm1, %v573_v53, %v575_v7  ;;  %v577_v15 = vrot.slane %v482_v9, 1  ;;  %v837_v16 = vmax.f32 %v652_v35, %v753_v12 }
 0x155   : > { %v656_v17 = vmax.f32 %v480_v48, %v576_v14  ;;  %v405_v19 = vpop.f32.mrb[48].mxu0 }
 0x156   : > { %v578_v13 = vsel %vm531_vm1, %v575_v7, %v577_v15  ;;  %v406_v20 = vadd.f32 %v11832_v28, %v405_v19  ;;  %v10302_v21 = vpop.f32.mrb[49].mxu0  ;;  %v890_v22 = vpack.c.bf16 %v837_v16, %v836_v10 }
 0x157   : > { %v754_v23 = vrot.slane %v656_v17, 2  ;;  %v11929_v24 = vmax.f32 %v481_v58, %v578_v13  ;;  %v408_v25 = vpop.f32.mrb[50].mxu0 }
 0x158   : > { %v483_v26 = vmax.f32 %v406_v20, 0.0  ;;  %v409_v18 = vadd.f32 %v11832_v28, %v408_v25  ;;  %v10303_v27 = vpop.f32.mrb[51].mxu0  ;;  %9992 = vmatprep.subr.bf16.mxu1 %v890_v22 }
 0x159   : > { %v756_v29 = vrot.slane %v11929_v24, 2  ;;  %9993 = vmatpush3.bf16.msra.mxu1 %v11858_v31  ;;  %v755_v30 = vsel %vm716_vm2, %v752_v6, %v754_v23 }
 0x15a   : > { %v579_v32 = vrot.slane %v483_v26, 1  ;;  %v484_v35 = vmax.f32 %v409_v18, 0.0  ;;  %v838_v37 = vmax.f32 %v11909_v40, %v755_v30 }
 0x15b   : > { %v757_v38 = vsel %vm716_vm2, %v754_v23, %v756_v29 }
 0x15c   : > { %v580_v33 = vsel %vm531_vm1, %v577_v15, %v579_v32  ;;  %v581_v41 = vrot.slane %v484_v35, 1  ;;  %v839_v42 = vmax.f32 %v654_v57, %v757_v38 }
 0x15d   : > { %v658_v36 = vmax.f32 %v482_v9, %v580_v33  ;;  %v413_v43 = vpop.f32.mrb[52].mxu0 }
 0x15e   : > { %v582_v44 = vsel %vm531_vm1, %v579_v32, %v581_v41  ;;  %v414_v45 = vadd.f32 %v11832_v28, %v413_v43  ;;  %v10306_v46 = vpop.f32.mrb[53].mxu0  ;;  %v891_v31 = vpack.c.bf16 %v839_v42, %v838_v37 }
 0x15f   : > { %v758_v47 = vrot.slane %v658_v36, 2  ;;  %v11940_v48 = vmax.f32 %v483_v26, %v582_v44  ;;  %v416_v49 = vpop.f32.mrb[54].mxu0 }
 0x160   : > { %v485_v50 = vmax.f32 %v414_v45, 0.0  ;;  %v417_v40 = vadd.f32 %v11832_v28, %v416_v49  ;;  %v10307_v51 = vpop.f32.mrb[55].mxu0  ;;  %9994 = vmatprep.subr.bf16.mxu1 %v891_v31 }
 0x161   : > { %v760_v53 = vrot.slane %v11940_v48, 2  ;;  %9995 = vmatpush3.bf16.msra.mxu1 %v11866_v52  ;;  %v759_v55 = vsel %vm716_vm2, %v756_v29, %v758_v47 }
 0x162   : > { %v583_v57 = vrot.slane %v485_v50, 1  ;;  %v486_v59 = vmax.f32 %v417_v40, 0.0  ;;  %v840_v60 = vmax.f32 %v11920_v63, %v759_v55 }
 0x163   : > { %v761_v54 = vsel %vm716_vm2, %v758_v47, %v760_v53 }
 0x164   : > { %v584_v61 = vsel %vm531_vm1, %v581_v41, %v583_v57  ;;  %v585_v0 = vrot.slane %v486_v59, 1  ;;  %v841_v2 = vmax.f32 %v656_v17, %v761_v54 }
 0x165   : > { %v660_v58 = vmax.f32 %v484_v35, %v584_v61  ;;  %v421_v3 = vpop.f32.mrb[56].mxu0 }
 0x166   : > { %v586_v4 = vsel %vm531_vm1, %v583_v57, %v585_v0  ;;  %v422_v5 = vadd.f32 %v11832_v28, %v421_v3  ;;  %v10310_v6 = vpop.f32.mrb[57].mxu0  ;;  %v892_v52 = vpack.c.bf16 %v841_v2, %v840_v60 }
 0x167   : > { %v762_v7 = vrot.slane %v660_v58, 2  ;;  %v11951_v9 = vmax.f32 %v485_v50, %v586_v4  ;;  %v424_v10 = vpop.f32.mrb[58].mxu0 }
 0x168   : > { %v487_v12 = vmax.f32 %v422_v5, 0.0  ;;  %v425_v63 = vadd.f32 %v11832_v28, %v424_v10  ;;  %v10311_v14 = vpop.f32.mrb[59].mxu0  ;;  %9996 = vmatprep.subr.bf16.mxu1 %v892_v52 }
 0x169   : > { %v764_v15 = vrot.slane %v11951_v9, 2  ;;  %9997 = vmatpush3.bf16.msra.mxu1 %v11875_v11  ;;  %v763_v16 = vsel %vm716_vm2, %v760_v53, %v762_v7 }
 0x16a   : > { %v587_v17 = vrot.slane %v487_v12, 1  ;;  %v488_v19 = vmax.f32 %v425_v63, 0.0  ;;  %v842_v13 = vmax.f32 %v11929_v24, %v763_v16 }
 0x16b   : > { %v765_v20 = vsel %vm716_vm2, %v762_v7, %v764_v15 }
 0x16c   : > { %v588_v21 = vsel %vm531_vm1, %v585_v0, %v587_v17  ;;  %v589_v22 = vrot.slane %v488_v19, 1  ;;  %v843_v23 = vmax.f32 %v658_v36, %v765_v20 }
 0x16d   : > { %v662_v25 = vmax.f32 %v486_v59, %v588_v21  ;;  %v429_v26 = vpop.f32.mrb[60].mxu0 }
 0x16e   : > { %v590_v18 = vsel %vm531_vm1, %v587_v17, %v589_v22  ;;  %v430_v27 = vadd.f32 %v11832_v28, %v429_v26  ;;  %v10314_v29 = vpop.f32.mrb[61].mxu0  ;;  %v893_v11 = vpack.c.bf16 %v843_v23, %v842_v13 }
 0x16f   : > { %v766_v30 = vrot.slane %v662_v25, 2  ;;  %v11962_v32 = vmax.f32 %v487_v12, %v590_v18  ;;  %v432_v35 = vpop.f32.mrb[62].mxu0 }
 0x170   : > { %v489_v37 = vmax.f32 %v430_v27, 0.0  ;;  %v433_v24 = vadd.f32 %v11832_v28, %v432_v35  ;;  %v10315_v38 = vpop.f32.mrb[63].mxu0  ;;  %9998 = vmatprep.subr.bf16.mxu1 %v893_v11 }
 0x171   : > { %v768_v33 = vrot.slane %v11962_v32, 2  ;;  %9999 = vmatpush3.bf16.msra.mxu1 %v11883_v34  ;;  %v767_v41 = vsel %vm716_vm2, %v764_v15, %v766_v30 }
 0x172   : > { %v591_v42 = vrot.slane %v489_v37, 1  ;;  %v490_v36 = vmax.f32 %v433_v24, 0.0  ;;  %v844_v43 = vmax.f32 %v11940_v48, %v767_v41 }
 0x173   : > { %v769_v44 = vsel %vm716_vm2, %v766_v30, %v768_v33 }
 0x174   : > { %v592_v45 = vsel %vm531_vm1, %v589_v22, %v591_v42  ;;  %v593_v46 = vrot.slane %v490_v36, 1  ;;  %v845_v31 = vmax.f32 %v660_v58, %v769_v44 }
 0x175   : > { %v664_v47 = vmax.f32 %v488_v19, %v592_v45  ;;  %v437_v49 = vpop.f32.mrb[64].mxu0 }
 0x176   : > { %v594_v50 = vsel %vm531_vm1, %v591_v42, %v593_v46  ;;  %v438_v40 = vadd.f32 %v11832_v28, %v437_v49  ;;  %v10318_v51 = vpop.f32.mrb[65].mxu0  ;;  %v894_v34 = vpack.c.bf16 %v845_v31, %v844_v43 }
 0x177   : > { %v770_v53 = vrot.slane %v664_v47, 2  ;;  %v11973_v55 = vmax.f32 %v489_v37, %v594_v50  ;;  %v440_v57 = vpop.f32.mrb[66].mxu0 }
 0x178   : > { %v491_v59 = vmax.f32 %v438_v40, 0.0  ;;  %v441_v48 = vadd.f32 %v11832_v28, %v440_v57  ;;  %v10319_v60 = vpop.f32.mrb[67].mxu0  ;;  %10000 = vmatprep.subr.bf16.mxu1 %v894_v34 }
 0x179   : > { %v772_v54 = vrot.slane %v11973_v55, 2  ;;  %10001 = vmatpush3.bf16.msra.mxu1 %v11891_v56  ;;  %v771_v61 = vsel %vm716_vm2, %v768_v33, %v770_v53  ;;  %v10743_v60 = vld [vmem:[%s14507_s7 + $0x30] ss:$12 sps:$4 sm:$0xff]  }
 0x17a   : > { %v595_v0 = vrot.slane %v491_v59, 1  ;;  %v492_v2 = vmax.f32 %v441_v48, 0.0  ;;  %v846_v58 = vmax.f32 %v11951_v9, %v771_v61  ;;  %v10740_v48 = vld [vmem:[%s14507_s7 + $0x18] ss:$12 sps:$4 sm:$0xff]   ;;  %v10746_v61 = vld [vmem:[%s14507_s7 + $0x48] ss:$12 sps:$4 sm:$0xff]  }
 0x17b   : > { %v773_v3 = vsel %vm716_vm2, %v770_v53, %v772_v54  ;;  %v10738_v53 = vld [vmem:[%s14507_s7 + $0x1c] ss:$12 sps:$4 sm:$0xff]  }
 0x17c   : > { %v596_v4 = vsel %vm531_vm1, %v593_v46, %v595_v0  ;;  %v597_v5 = vrot.slane %v492_v2, 1  ;;  %v847_v6 = vmax.f32 %v662_v25, %v773_v3  ;;  %v10752_v3 = vld [vmem:[%s14507_s7 + $0x78] ss:$12 sps:$4 sm:$0xff]  }
 0x17d   : > { %v666_v52 = vmax.f32 %v490_v36, %v596_v4  ;;  %v445_v7 = vpop.f32.mrb[68].mxu0  ;;  %v10753_v4 = vld [vmem:[%s14507_s7 + $0x94] ss:$12 sps:$4 sm:$0xff]  }
 0x17e   : > { %v598_v10 = vsel %vm531_vm1, %v595_v0, %v597_v5  ;;  %v446_v12 = vadd.f32 %v11832_v28, %v445_v7  ;;  %v10322_v63 = vpop.f32.mrb[69].mxu0  ;;  %v895_v56 = vpack.c.bf16 %v847_v6, %v846_v58  ;;  %v10747_v0 = vld [vmem:[%s14507_s7 + $0x64] ss:$12 sps:$4 sm:$0xff]   ;;  %v10750_v58 = vld [vmem:[%s14507_s7 + $0x7c] ss:$12 sps:$4 sm:$0xff]  }
 0x17f   : > { %v774_v14 = vrot.slane %v666_v52, 2  ;;  %v667_v15 = vmax.f32 %v491_v59, %v598_v10  ;;  %v448_v16 = vpop.f32.mrb[70].mxu0  ;;  %v10756_v6 = vld [vmem:[%s14507_s7 + $0x8] ss:$12 sps:$4 sm:$0xff]   ;;  %v10758_v7 = vld [vmem:[%s14507_s7 + $0x38] ss:$12 sps:$4 sm:$0xff]  }
 0x180   : > { %v493_v17 = vmax.f32 %v446_v12, 0.0  ;;  %v449_v9 = vadd.f32 %v11832_v28, %v448_v16  ;;  %v10323_v19 = vpop.f32.mrb[71].mxu0  ;;  %10002 = vmatprep.subr.bf16.mxu1 %v895_v56  ;;  %v10759_v10 = vld [vmem:[%s14507_s7 + $0x50] ss:$12 sps:$4 sm:$0xff]   ;;  %v10760_v12 = vld [vmem:[%s14507_s7 + $0x68] ss:$12 sps:$4 sm:$0xff]  }
 0x181   : > { %v776_v13 = vrot.slane %v667_v15, 2  ;;  %10003 = vmatpush3.bf16.msra.mxu1 %v11899_v8  ;;  %v775_v20 = vsel %vm716_vm2, %v772_v54, %v774_v14  ;;  %v10744_v54 = vld [vmem:[%s14507_s7 + $0x4c] ss:$12 sps:$4 sm:$0xff]   ;;  %v12091_v16 = vld [vmem:[%s14503_s3] sm:$0xff]  }
 0x182   : > { %v599_v21 = vrot.slane %v493_v17, 1  ;;  %v494_v22 = vmax.f32 %v449_v9, 0.0  ;;  %v848_v23 = vmax.f32 %v11962_v32, %v775_v20  ;;  %v10761_v63 = vld [vmem:[%s14507_s7 + $0x80] ss:$12 sps:$4 sm:$0xff]   ;;  %v10762_v56 = vld [vmem:[%s14507_s7 + $0x98] ss:$12 sps:$4 sm:$0xff]  }
 0x183   : > { %v777_v25 = vsel %vm716_vm2, %v774_v14, %v776_v13  ;;  %v10763_v14 = vld [vmem:[%s14503_s3 + $0x10] sm:$0xff]  }
 0x184   : > { %v600_v26 = vsel %vm531_vm1, %v597_v5, %v599_v21  ;;  %v671_v18 = vrot.slane %v494_v22, 1  ;;  %v849_v27 = vmax.f32 %v664_v47, %v777_v25  ;;  %v10755_v5 = vld [vmem:[%s14507_s7 + $0x90] ss:$12 sps:$4 sm:$0xff]  }
 0x185   : > { %v668_v29 = vmax.f32 %v492_v2, %v600_v26  ;;  %v453_v11 = vpop.f32.mrb[72].mxu0  ;;  %v10749_v2 = vld [vmem:[%s14507_s7 + $0x60] ss:$12 sps:$4 sm:$0xff]  }
 0x186   : > { %v672_v30 = vsel %vm531_vm1, %v599_v21, %v671_v18  ;;  %v454_v35 = vadd.f32 %v11832_v28, %v453_v11  ;;  %v896_v37 = vpack.c.bf16 %v849_v27, %v848_v23  ;;  %v10326_v8 = vpop.f32.mrb[73].mxu0 }
 0x187   : > { %v778_v24 = vrot.slane %v668_v29, 2  ;;  %v678_v38 = vmax.f32 %v493_v17, %v672_v30  ;;  %v456_v33 = vpop.f32.mrb[74].mxu0 }
 0x188   : > { %v495_v41 = vmax.f32 %v454_v35, 0.0  ;;  %10004 = vmatprep.subr.bf16.mxu1 %v896_v37  ;;  %v10327_v32 = vpop.f32.mrb[75].mxu0 }
 0x189   : > { %v780_v42 = vrot.slane %v678_v38, 2  ;;  %10005 = vmatpush3.bf16.msra.mxu1 %v11907_v39  ;;  %v779_v36 = vsel %vm716_vm2, %v776_v13, %v778_v24  ;;  %v10735_v39 = vld [vmem:[%s14507_s7] ss:$12 sps:$4 sm:$0xff]  }
 0x18a   : > { %v673_v43 = vrot.slane %v495_v41, 1  ;;  %v850_v44 = vmax.f32 %v11973_v55, %v779_v36 }
 0x18b   : > { %v781_v45 = vsel %vm716_vm2, %v778_v24, %v780_v42 }
 0x18c   : > { %v674_v28 = vsel %vm531_vm1, %v671_v18, %v673_v43  ;;  %v680_v46 = vmax.f32 %v495_v41, %v673_v43  ;;  %v851_v31 = vmax.f32 %v666_v52, %v781_v45  ;;  %v10757_v52 = vld [vmem:[%s14507_s7 + $0x20] ss:$12 sps:$4 sm:$0xff]  }
 0x18d   : > { %v679_v47 = vmax.f32 %v494_v22, %v674_v28 }
 0x18e   : > { %v784_v49 = vrot.slane %v680_v46, 2  ;;  %v897_v50 = vpack.c.bf16 %v851_v31, %v850_v44 }
 0x18f   : > { %v782_v40 = vrot.slane %v679_v47, 2 }
 0x190   : > { %10006 = vmatprep.subr.bf16.mxu1 %v897_v50 }
 0x191   : > { %v785_v51 = vsel %vm716_vm2, %v782_v40, %v784_v49  ;;  %10007 = vmatpush3.bf16.msra.mxu1 %v11918_v62  ;;  %v783_v34 = vsel %vm716_vm2, %v780_v42, %v782_v40  ;;  %v10741_v62 = vld [vmem:[%s14507_s7 + $0x34] ss:$12 sps:$4 sm:$0xff]  }
 0x192   : > { %v853_v55 = vmax.f32 %v668_v29, %v785_v51  ;;  %10328 = vmatprep.subr.bf16.mxu1 %v14514_v1  ;;  %v852_v57 = vmax.f32 %v667_v15, %v783_v34  ;;  %v10764_v15 = vld [vmem:[%s14503_s3 + $0x18] sm:$0xff]  }
 0x194   : > { %1059 = vmatmul.mubr.bf16.vlgmr.msra.gmra.mrb[0].mxu1 %v10735_v39  ;;  %v898_v59 = vpack.c.bf16 %v853_v55, %v852_v57 }
 0x195   : > { %1066 = vmatprep.mubr.bf16.mxu1 %v10738_v53 }
 0x196   : > { %10329 = vmatpush3.bf16.msra.mxu1 %v898_v59 }
 0x197   : > { %10358 = vmatprep.subr.bf16.mxu1 %v10763_v14 }
 0x19c   : > { %1067 = vmatmul.mubr.bf16.gmra.mrb[4].mxu1 %v10740_v48 }
 0x19d   : > { %1074 = vmatprep.mubr.bf16.mxu1 %v10741_v62 }
 0x1a4   : > { %1075 = vmatmul.mubr.bf16.gmra.mrb[8].mxu1 %v10743_v60 }
 0x1a5   : > { %1082 = vmatprep.mubr.bf16.mxu1 %v10744_v54 }
 0x1ac   : > { %1083 = vmatmul.mubr.bf16.gmra.mrb[12].mxu1 %v10746_v61 }
 0x1ad   : > { %1090 = vmatprep.mubr.bf16.mxu1 %v10747_v0 }
 0x1b4   : > { %1091 = vmatmul.mubr.bf16.gmra.mrb[16].mxu1 %v10749_v2 }
 0x1b5   : > { %1098 = vmatprep.mubr.bf16.mxu1 %v10750_v58 }
 0x1bc   : > { %1099 = vmatmul.mubr.bf16.gmra.mrb[20].mxu1 %v10752_v3 }
 0x1bd   : > { %1106 = vmatprep.mubr.bf16.mxu1 %v10753_v4 }
 0x1c4   : > { %1107 = vmatmul.mubr.bf16.gmra.mrb[24].mxu1 %v10755_v5 }
 0x1c5   : > { %10330 = vmatprep.mubr.msk.bf16.mxu1 %vm11653_vm0, %v14514_v1 }
 0x1cc   : > { %10331 = vmatmul.mubr.msk.bf16.vlgmr.msra.gmra.mrb[28].mxu1 %vm1004_vm3, %v10756_v6 }
 0x1cd   : > { %10334 = vmatprep.mubr.msk.bf16.mxu1 %vm11653_vm0, %v14514_v1  ;;  %10359 = vmatpush3.bf16.msra.mxu1 %v10763_v14 }
 0x1ce   : > { %10360 = vmatprep.subr.bf16.mxu1 %v10764_v15 }
 0x1d1   : > { %10361 = vmatpush3.bf16.msra.mxu1 %v10764_v15 }
 0x1d2   : > { %10374 = vmatprep.subr.bf16.mxu1 %v12091_v16 }
 0x1d4   : > { %10335 = vmatmul.mubr.msk.bf16.gmra.mrb[32].mxu1 %vm1004_vm3, %v10757_v52 }
 0x1d5   : > { %10338 = vmatprep.mubr.msk.bf16.mxu1 %vm11653_vm0, %v14514_v1 }
 0x1dc   : > { %10339 = vmatmul.mubr.msk.bf16.gmra.mrb[36].mxu1 %vm1004_vm3, %v10758_v7 }
 0x1dd   : > { %10342 = vmatprep.mubr.msk.bf16.mxu1 %vm11653_vm0, %v14514_v1 }
 0x1e4   : > { %10343 = vmatmul.mubr.msk.bf16.gmra.mrb[40].mxu1 %vm1004_vm3, %v10759_v10 }
 0x1e5   : > { %10346 = vmatprep.mubr.msk.bf16.mxu1 %vm11653_vm0, %v14514_v1 }
 0x1ec   : > { %10347 = vmatmul.mubr.msk.bf16.gmra.mrb[44].mxu1 %vm1004_vm3, %v10760_v12 }
 0x1ed   : > { %10350 = vmatprep.mubr.msk.bf16.mxu1 %vm11653_vm0, %v14514_v1 }
 0x1f4   : > { %10351 = vmatmul.mubr.msk.bf16.gmra.mrb[48].mxu1 %vm1004_vm3, %v10761_v63 }
 0x1f5   : > { %10354 = vmatprep.mubr.msk.bf16.mxu1 %vm11653_vm0, %v14514_v1 }
 0x1fc   : > { %10355 = vmatmul.mubr.msk.bf16.gmra.mrb[52].mxu1 %vm1004_vm3, %v10762_v56 }
 0x267   : > { %v10008_v17 = vpop.f32.mrb[0].mxu1 }
 0x268   : > { %v10009_v9 = vpop.f32.mrb[1].mxu1 }
 0x269   : > { %v10010_v19 = vadd.f32 %v10009_v9, %v10008_v17  ;;  %v10011_v13 = vpop.f32.mrb[2].mxu1 }
 0x26a   : > { %v10012_v20 = vpop.f32.mrb[3].mxu1 }
 0x26b   : > { %v10013_v21 = vadd.f32 %v10012_v20, %v10011_v13 }
 0x26f   : > { %v10014_v22 = vpop.f32.mrb[4].mxu1 }
 0x270   : > { %v10015_v23 = vpop.f32.mrb[5].mxu1 }
 0x271   : > { %v10016_v25 = vadd.f32 %v10015_v23, %v10014_v22  ;;  %v10017_v26 = vpop.f32.mrb[6].mxu1 }
 0x272   : > { %v10018_v18 = vpop.f32.mrb[7].mxu1 }
 0x273   : > { %v10019_v27 = vadd.f32 %v10018_v18, %v10017_v26 }
 0x277   : > { %v10020_v29 = vpop.f32.mrb[8].mxu1 }
 0x278   : > { %v10021_v11 = vpop.f32.mrb[9].mxu1 }
 0x279   : > { %v10022_v30 = vadd.f32 %v10021_v11, %v10020_v29  ;;  %v10023_v35 = vpop.f32.mrb[10].mxu1 }
 0x27a   : > { %v10024_v37 = vpop.f32.mrb[11].mxu1 }
 0x27b   : > { %v12094_v8 = vadd.f32 %v10024_v37, %v10023_v35 }
 0x27f   : > { %v10026_v24 = vpop.f32.mrb[12].mxu1 }
 0x280   : > { %v10027_v38 = vpop.f32.mrb[13].mxu1 }
 0x281   : > { %v12096_v33 = vadd.f32 %v10027_v38, %v10026_v24  ;;  %v10029_v41 = vpop.f32.mrb[14].mxu1 }
 0x282   : > { %v10030_v32 = vpop.f32.mrb[15].mxu1 }
 0x283   : > { %v12098_v42 = vadd.f32 %v10030_v32, %v10029_v41 }
 0x287   : > { %v10032_v36 = vpop.f32.mrb[16].mxu1 }
 0x288   : > { %v10033_v43 = vpop.f32.mrb[17].mxu1 }
 0x289   : > { %v12100_v44 = vadd.f32 %v10033_v43, %v10032_v36  ;;  %v10035_v45 = vpop.f32.mrb[18].mxu1 }
 0x28a   : > { %v10036_v28 = vpop.f32.mrb[19].mxu1 }
 0x28b   : > { %v12102_v46 = vadd.f32 %v10036_v28, %v10035_v45 }
 0x28f   : > { %v10038_v31 = vpop.f32.mrb[20].mxu1 }
 0x290   : > { %v10039_v47 = vpop.f32.mrb[21].mxu1 }
 0x291   : > { %v12104_v49 = vadd.f32 %v10039_v47, %v10038_v31  ;;  %v10041_v50 = vpop.f32.mrb[22].mxu1 }
 0x292   : > { %v10042_v40 = vpop.f32.mrb[23].mxu1 }
 0x293   : > { %v12106_v39 = vadd.f32 %v10042_v40, %v10041_v50 }
 0x297   : > { %v10044_v51 = vpop.f32.mrb[24].mxu1 }
 0x298   : > { %v10045_v34 = vpop.f32.mrb[25].mxu1 }
 0x299   : > { %v12108_v53 = vadd.f32 %v10045_v34, %v10044_v51  ;;  %v10047_v55 = vpop.f32.mrb[26].mxu1 }
 0x29a   : > { %v10048_v57 = vpop.f32.mrb[27].mxu1 }
 0x29b   : > { %v12110_v59 = vadd.f32 %v10048_v57, %v10047_v55 }
 0x29f   : > { %v1149_v48 = vpop.f32.mrb[28].mxu1 }
 0x2a0   : > { %v1150_v62 = vadd.f32 %v10010_v19, %v1149_v48  ;;  %v10332_v60 = vpop.f32.mrb[29].mxu1 }
 0x2a1   : > { %v1152_v54 = vpop.f32.mrb[30].mxu1 }
 0x2a2   : > { %v1153_v61 = vadd.f32 %v10013_v21, %v1152_v54  ;;  %v10333_v0 = vpop.f32.mrb[31].mxu1 }
 0x2a4   : > { %v12112_v2 = vpack.c.bf16 %v1153_v61, %v1150_v62 }
 0x2a6   : > { %v1222_v58 = vshrl.u32 %v12112_v2, 16  ;;  %v1224_v3 = vshll.u32 %v12112_v2, 16  ;;  %v1495_v17 = vrot.slane %v12112_v2, 1  ;;  %v1634_v9 = vrot.slane %v12112_v2, 5 }
 0x2a7   : > { %v1157_v4 = vpop.f32.mrb[32].mxu1 }
 0x2a8   : > { %v1158_v5 = vadd.f32 %v10016_v25, %v1157_v4  ;;  %v10336_v6 = vpop.f32.mrb[33].mxu1  ;;  %v1774_v52 = vrot.slane %v1222_v58, 5  ;;  %v1775_v7 = vrot.slane %v1224_v3, 6  ;;  %v1226_v14 = vrot.slane %v1224_v3, 1 }
 0x2a9   : > { %v1160_v10 = vpop.f32.mrb[34].mxu1  ;;  %v1933_v25 = vrot.slane %v12112_v2, 6 }
 0x2aa   : > { %v1161_v12 = vadd.f32 %v10019_v27, %v1160_v10  ;;  %v10337_v63 = vpop.f32.mrb[35].mxu1  ;;  %v1776_v56 = vor.u32 %v1775_v7, %v1774_v52  ;;  %v1227_v23 = vor.u32 %v1226_v14, %v1222_v58  ;;  %v10766_v52 = vld [vmem:[%s14503_s3 + $0x8] sm:$0xff]  }
 0x2ac   : > { %v12116_v15 = vpack.c.bf16 %v1161_v12, %v1158_v5 }
 0x2ae   : > { %v1229_v19 = vshll.u32 %v12116_v15, 16  ;;  %v1233_v13 = vshrl.u32 %v12116_v15, 16  ;;  %v1496_v20 = vrot.slane %v12116_v15, 1  ;;  %v1635_v21 = vrot.slane %v12116_v15, 5 }
 0x2af   : > { %v1165_v22 = vpop.f32.mrb[36].mxu1  ;;  %v1934_v26 = vrot.slane %v12116_v15, 6  ;;  %v2073_v40 = vrot.slane %v12116_v15, 2  ;;  %v2361_v51 = vrot.slane %v12116_v15, 3 }
 0x2b0   : > { %v1166_v18 = vadd.f32 %v10022_v30, %v1165_v22  ;;  %v10340_v27 = vpop.f32.mrb[37].mxu1  ;;  %v1231_v29 = vrot.slane %v1229_v19, 1  ;;  %v12127_v11 = vsel %vm531_vm1, %v1495_v17, %v1496_v20  ;;  %v12130_v35 = vsel %vm1633_vm4, %v1634_v9, %v1635_v21 }
 0x2b1   : > { %v1168_v37 = vpop.f32.mrb[38].mxu1  ;;  %v1777_v24 = vrot.slane %v1233_v13, 5  ;;  %v1778_v38 = vrot.slane %v1229_v19, 6  ;;  %v12133_v41 = vsel %vm1932_vm6, %v1933_v25, %v1934_v26  ;;  %v2211_v32 = vrot.slane %v1233_v13, 2 }
 0x2b2   : > { %v1169_v36 = vadd.f32 %v12094_v8, %v1168_v37  ;;  %v10341_v43 = vpop.f32.mrb[39].mxu1  ;;  %v1232_v30 = vsel %vm1220_vm5, %v1227_v23, %v1231_v29  ;;  %v2212_v45 = vrot.slane %v1229_v19, 3  ;;  %v1235_v48 = vor.u32 %v1233_v13, %v1231_v29 }
 0x2b3   : > { %10362 = vmatprep.mubr.msk.bf16.mxu1 %vm1280_vm7, %v1232_v30  ;;  %v1779_v28 = vor.u32 %v1778_v38, %v1777_v24 }
 0x2b4   : > { %v12138_v31 = vpack.c.bf16 %v1169_v36, %v1166_v18  ;;  %v2213_v47 = vor.u32 %v2212_v45, %v2211_v32 }
 0x2b5   : > { %v12141_v50 = vsel %vm1773_vm8, %v1776_v56, %v1779_v28 }
 0x2b6   : > { %v1237_v8 = vshll.u32 %v12138_v31, 16  ;;  %v1241_v34 = vshrl.u32 %v12138_v31, 16  ;;  %v1498_v55 = vrot.slane %v12138_v31, 1  ;;  %v1637_v57 = vrot.slane %v12138_v31, 5 }
 0x2b7   : > { %v1173_v62 = vpop.f32.mrb[40].mxu1  ;;  %v1936_v60 = vrot.slane %v12138_v31, 6  ;;  %v2074_v54 = vrot.slane %v12138_v31, 2  ;;  %v2362_v61 = vrot.slane %v12138_v31, 3 }
 0x2b8   : > { %v1174_v0 = vadd.f32 %v12096_v33, %v1173_v62  ;;  %v10344_v58 = vpop.f32.mrb[41].mxu1  ;;  %v1239_v3 = vrot.slane %v1237_v8, 1  ;;  %v12154_v4 = vsel %vm531_vm1, %v1496_v20, %v1498_v55  ;;  %v12157_v5 = vsel %vm1633_vm4, %v1635_v21, %v1637_v57 }
 0x2b9   : > { %v1176_v6 = vpop.f32.mrb[42].mxu1  ;;  %v1781_v7 = vrot.slane %v1241_v34, 5  ;;  %v1782_v10 = vrot.slane %v1237_v8, 6  ;;  %v12163_v12 = vsel %vm1932_vm6, %v1934_v26, %v1936_v60  ;;  %v12166_v33 = vsel %vm716_vm2, %v2073_v40, %v2074_v54 }
 0x2ba   : > { %v1177_v63 = vadd.f32 %v12098_v42, %v1176_v6  ;;  %v10345_v56 = vpop.f32.mrb[43].mxu1  ;;  %v1240_v14 = vsel %vm1220_vm5, %v1235_v48, %v1239_v3  ;;  %v2214_v17 = vrot.slane %v1241_v34, 2  ;;  %v2215_v19 = vrot.slane %v1237_v8, 3  ;;  %v12180_v42 = vld [vmem:[%s14503_s3 + $0x20] sm:$0xff]  }
 0x2bb   : > { %10363 = vmatmul.mubr.msk.bf16.vlgmr.msra.gmra.mrb[56].mxu1 %vm1280_vm7, %v1240_v14  ;;  %v1783_v9 = vor.u32 %v1782_v10, %v1781_v7  ;;  %v12172_v13 = vsel %vm2360_vm9, %v2361_v51, %v2362_v61  ;;  %v1243_v21 = vor.u32 %v1241_v34, %v1239_v3 }
 0x2bc   : > { %v12174_v20 = vpack.c.bf16 %v1177_v63, %v1174_v0  ;;  %10375 = vmatpush3.bf16.msra.mxu1 %v12091_v16  ;;  %v2216_v23 = vor.u32 %v2215_v19, %v2214_v17 }
 0x2bd   : > { %10376 = vmatprep.subr.bf16.mxu1 %v10766_v52  ;;  %v12183_v22 = vsel %vm1773_vm8, %v1779_v28, %v1783_v9 }
 0x2be   : > { %v1245_v25 = vshll.u32 %v12174_v20, 16  ;;  %v1249_v26 = vshrl.u32 %v12174_v20, 16  ;;  %v1500_v18 = vrot.slane %v12174_v20, 1  ;;  %v1639_v16 = vrot.slane %v12174_v20, 5 }
 0x2bf   : > { %v1181_v27 = vpop.f32.mrb[44].mxu1  ;;  %v1938_v29 = vrot.slane %v12174_v20, 6  ;;  %v2076_v37 = vrot.slane %v12174_v20, 2  ;;  %v12192_v24 = vsel %vm2210_vm10, %v2213_v47, %v2216_v23  ;;  %v2364_v38 = vrot.slane %v12174_v20, 3 }
 0x2c0   : > { %v1182_v32 = vadd.f32 %v12100_v44, %v1181_v27  ;;  %v10348_v36 = vpop.f32.mrb[45].mxu1  ;;  %v1247_v43 = vrot.slane %v1245_v25, 1  ;;  %10377 = vmatpush3.bf16.msra.mxu1 %v10766_v52  ;;  %v12197_v30 = vsel %vm531_vm1, %v1498_v55, %v1500_v18  ;;  %v12200_v45 = vsel %vm1633_vm4, %v1637_v57, %v1639_v16 }
 0x2c1   : > { %v1184_v28 = vpop.f32.mrb[46].mxu1  ;;  %10390 = vmatprep.subr.bf16.mxu1 %v12180_v42  ;;  %v1785_v40 = vrot.slane %v1249_v26, 5  ;;  %v1786_v51 = vrot.slane %v1245_v25, 6  ;;  %v12204_v47 = vsel %vm1932_vm6, %v1936_v60, %v1938_v29  ;;  %v12207_v8 = vsel %vm716_vm2, %v2074_v54, %v2076_v37 }
 0x2c2   : > { %v1185_v44 = vadd.f32 %v12102_v46, %v1184_v28  ;;  %v10349_v34 = vpop.f32.mrb[47].mxu1  ;;  %v1248_v55 = vsel %vm1220_vm5, %v1243_v21, %v1247_v43  ;;  %v2218_v48 = vrot.slane %v1249_v26, 2  ;;  %v2219_v62 = vrot.slane %v1245_v25, 3 }
 0x2c3   : > { %10366 = vmatprep.mubr.msk.bf16.mxu1 %vm1280_vm7, %v1248_v55  ;;  %v1787_v57 = vor.u32 %v1786_v51, %v1785_v40  ;;  %v12213_v0 = vsel %vm2360_vm9, %v2362_v61, %v2364_v38  ;;  %v1251_v60 = vor.u32 %v1249_v26, %v1247_v43 }
 0x2c4   : > { %v12215_v58 = vpack.c.bf16 %v1185_v44, %v1182_v32  ;;  %v2220_v54 = vor.u32 %v2219_v62, %v2218_v48 }
 0x2c5   : > { %v12218_v3 = vsel %vm1773_vm8, %v1783_v9, %v1787_v57 }
 0x2c6   : > { %v1253_v46 = vshll.u32 %v12215_v58, 16  ;;  %v1257_v6 = vshrl.u32 %v12215_v58, 16  ;;  %v1502_v52 = vrot.slane %v12215_v58, 1  ;;  %v1641_v7 = vrot.slane %v12215_v58, 5 }
 0x2c7   : > { %v1189_v10 = vpop.f32.mrb[48].mxu1  ;;  %v1940_v63 = vrot.slane %v12215_v58, 6  ;;  %v2078_v61 = vrot.slane %v12215_v58, 2  ;;  %v12227_v56 = vsel %vm2210_vm10, %v2216_v23, %v2220_v54  ;;  %v2366_v14 = vrot.slane %v12215_v58, 3 }
 0x2c8   : > { %v1190_v17 = vadd.f32 %v12104_v49, %v1189_v10  ;;  %v10352_v9 = vpop.f32.mrb[49].mxu1  ;;  %v1255_v19 = vrot.slane %v1253_v46, 1  ;;  %v12232_v21 = vsel %vm531_vm1, %v1500_v18, %v1502_v52  ;;  %v12235_v25 = vsel %vm1633_vm4, %v1639_v16, %v1641_v7 }
 0x2c9   : > { %v1192_v26 = vpop.f32.mrb[50].mxu1  ;;  %v1789_v27 = vrot.slane %v1257_v6, 5  ;;  %v1790_v32 = vrot.slane %v1253_v46, 6  ;;  %v12238_v36 = vsel %vm1932_vm6, %v1938_v29, %v1940_v63  ;;  %v12241_v23 = vsel %vm716_vm2, %v2076_v37, %v2078_v61 }
 0x2ca   : > { %v1193_v43 = vadd.f32 %v12106_v39, %v1192_v26  ;;  %v10353_v49 = vpop.f32.mrb[51].mxu1  ;;  %v1256_v28 = vsel %vm1220_vm5, %v1251_v60, %v1255_v19  ;;  %v2222_v40 = vrot.slane %v1257_v6, 2  ;;  %v2223_v16 = vrot.slane %v1253_v46, 3 }
 0x2cb   : > { %10367 = vmatmul.mubr.msk.bf16.gmra.mrb[60].mxu1 %vm1280_vm7, %v1256_v28  ;;  %v1791_v18 = vor.u32 %v1790_v32, %v1789_v27  ;;  %v12247_v51 = vsel %vm2360_vm9, %v2364_v38, %v2366_v14  ;;  %v1259_v29 = vor.u32 %v1257_v6, %v1255_v19 }
 0x2cc   : > { %v12249_v44 = vpack.c.bf16 %v1193_v43, %v1190_v17  ;;  %v2224_v37 = vor.u32 %v2223_v16, %v2222_v40 }
 0x2cd   : > { %v12252_v34 = vsel %vm1773_vm8, %v1787_v57, %v1791_v18 }
 0x2ce   : > { %v1261_v39 = vshll.u32 %v12249_v44, 16  ;;  %v1265_v55 = vshrl.u32 %v12249_v44, 16  ;;  %v1504_v48 = vrot.slane %v12249_v44, 1  ;;  %v1643_v62 = vrot.slane %v12249_v44, 5 }
 0x2cf   : > { %v1197_v60 = vpop.f32.mrb[52].mxu1  ;;  %v1942_v46 = vrot.slane %v12249_v44, 6  ;;  %v2080_v38 = vrot.slane %v12249_v44, 2  ;;  %v12261_v10 = vsel %vm2210_vm10, %v2220_v54, %v2224_v37  ;;  %v2368_v57 = vrot.slane %v12249_v44, 3 }
 0x2d0   : > { %v1198_v6 = vadd.f32 %v12108_v53, %v1197_v60  ;;  %v10356_v17 = vpop.f32.mrb[53].mxu1  ;;  %v1263_v9 = vrot.slane %v1261_v39, 1  ;;  %v1505_v19 = vsel %vm531_vm1, %v1502_v52, %v1504_v48  ;;  %v12269_v26 = vsel %vm1633_vm4, %v1641_v7, %v1643_v62 }
 0x2d1   : > { %v1200_v27 = vpop.f32.mrb[54].mxu1  ;;  %v1793_v32 = vrot.slane %v1265_v55, 5  ;;  %v1794_v43 = vrot.slane %v1261_v39, 6  ;;  %v12272_v49 = vsel %vm1932_vm6, %v1940_v63, %v1942_v46  ;;  %v12275_v54 = vsel %vm716_vm2, %v2078_v61, %v2080_v38 }
 0x2d2   : > { %v1201_v53 = vadd.f32 %v12110_v59, %v1200_v27  ;;  %v1264_v28 = vsel %vm1220_vm5, %v1259_v29, %v1263_v9  ;;  %v1267_v40 = vor.u32 %v1265_v55, %v1263_v9  ;;  %v10357_v16 = vpop.f32.mrb[55].mxu1  ;;  %v2226_v60 = vrot.slane %v1265_v55, 2 }
 0x2d3   : > { %10370 = vmatprep.mubr.msk.bf16.mxu1 %vm1280_vm7, %v1264_v28  ;;  %v1795_v52 = vor.u32 %v1794_v43, %v1793_v32  ;;  %v2227_v7 = vrot.slane %v1261_v39, 3  ;;  %v12281_v17 = vsel %vm2360_vm9, %v2366_v14, %v2368_v57 }
 0x2d4   : > { %v12283_v1 = vpack.c.bf16 %v1201_v53, %v1198_v6  ;;  %10371 = vmatmul.mubr.msk.bf16.gmra.mrb[64].mxu1 %vm1280_vm7, %v1267_v40 }
 0x2d5   : > { %10378 = vmatprep.mubr.msk.bf16.mxu1 %vm1280_vm7, %v12112_v2  ;;  %v12289_v59 = vsel %vm1773_vm8, %v1791_v18, %v1795_v52  ;;  %v2228_v63 = vor.u32 %v2227_v7, %v2226_v60 }
 0x2d6   : > { %v1645_v61 = vrot.slane %v12283_v1, 5  ;;  %v1798_v29 = vshrl.u32 %v12283_v1, 16  ;;  %v1801_v39 = vshll.u32 %v12283_v1, 16  ;;  %v1944_v14 = vrot.slane %v12283_v1, 6 }
 0x2d7   : > { %v2082_v55 = vrot.slane %v12283_v1, 2  ;;  %v12297_v6 = vsel %vm2210_vm10, %v2224_v37, %v2228_v63  ;;  %v2370_v9 = vrot.slane %v12283_v1, 3 }
 0x2d8   : > { %v1646_v2 = vsel %vm1633_vm4, %v1643_v62, %v1645_v61  ;;  %v1800_v18 = vrot.slane %v1798_v29, 5  ;;  %v1803_v27 = vrot.slane %v1801_v39, 6  ;;  %v12302_v32 = vsel %vm1932_vm6, %v1942_v46, %v1944_v14  ;;  %v10768_v62 = vld [vmem:[%s14503_s3 + $0x28] sm:$0xff]  }
 0x2d9   : > { %v12307_v43 = vsel %vm716_vm2, %v2080_v38, %v2082_v55  ;;  %v2230_v53 = vrot.slane %v1798_v29, 2  ;;  %v2231_v28 = vrot.slane %v1801_v39, 3  ;;  %v12312_v37 = vsel %vm2360_vm9, %v2368_v57, %v2370_v9  ;;  %v10769_v57 = vld [vmem:[%s14503_s3 + $0x30] sm:$0xff]  }
 0x2da   : > { %v1804_v40 = vor.u32 %v1803_v27, %v1800_v18 }
 0x2db   : > { %v12317_v16 = vor.u32 %v2231_v28, %v2230_v53 }
 0x2dc   : > { %10379 = vmatmul.mubr.msk.bf16.vlgmr.msra.gmra.mrb[56].mxu1 %vm1280_vm7, %v12116_v15  ;;  %v1805_v46 = vsel %vm1773_vm8, %v1795_v52, %v1804_v40  ;;  %v10770_v15 = vld [vmem:[%s14503_s3 + $0x38] sm:$0xff]  }
 0x2dd   : > { %10382 = vmatprep.mubr.msk.bf16.mxu1 %vm1280_vm7, %v12138_v31  ;;  %10391 = vmatpush3.bf16.msra.mxu1 %v12180_v42  ;;  %v12327_v38 = vsel %vm2210_vm10, %v2228_v63, %v12317_v16  ;;  %v10771_v31 = vld [vmem:[%s14503_s3 + $0x40] sm:$0xff]  }
 0x2de   : > { %10392 = vmatprep.subr.bf16.mxu1 %v10768_v62 }
 0x2e1   : > { %10393 = vmatpush3.bf16.msra.mxu1 %v10768_v62 }
 0x2e2   : > { %10406 = vmatprep.subr.bf16.mxu1 %v10769_v57 }
 0x2e4   : > { %10383 = vmatmul.mubr.msk.bf16.gmra.mrb[60].mxu1 %vm1280_vm7, %v12174_v20  ;;  %v10777_v20 = vld [vmem:[%s14503_s3 + $0x70] sm:$0xff]  }
 0x2e5   : > { %10386 = vmatprep.mubr.msk.bf16.mxu1 %vm1280_vm7, %v12215_v58 }
 0x2ec   : > { %10387 = vmatmul.mubr.msk.bf16.gmra.mrb[68].mxu1 %vm1280_vm7, %v12249_v44 }
 0x2ed   : > { %10394 = vmatprep.mubr.msk.bf16.mxu1 %vm1280_vm7, %v12127_v11  ;;  %v10772_v11 = vld [vmem:[%s14503_s3 + $0x48] sm:$0xff]  }
 0x2f4   : > { %10395 = vmatmul.mubr.msk.bf16.vlgmr.msra.gmra.mrb[56].mxu1 %vm1280_vm7, %v12154_v4  ;;  %v10773_v4 = vld [vmem:[%s14503_s3 + $0x50] sm:$0xff]  }
 0x2f5   : > { %10398 = vmatprep.mubr.msk.bf16.mxu1 %vm1280_vm7, %v12197_v30  ;;  %10407 = vmatpush3.bf16.msra.mxu1 %v10769_v57 }
 0x2f6   : > { %10408 = vmatprep.subr.bf16.mxu1 %v10770_v15 }
 0x2f9   : > { %10409 = vmatpush3.bf16.msra.mxu1 %v10770_v15  ;;  %v12458_v15 = vld [vmem:[%s14504_s4] ss:$0 sm:$0xff] }
 0x2fa   : > { %10422 = vmatprep.subr.bf16.mxu1 %v10771_v31 }
 0x2fc   : > { %10399 = vmatmul.mubr.msk.bf16.gmra.mrb[60].mxu1 %vm1280_vm7, %v12232_v21 }
 0x2fd   : > { %10402 = vmatprep.mubr.msk.bf16.mxu1 %vm1280_vm7, %v1505_v19 }
 0x304   : > { %10403 = vmatmul.mubr.msk.bf16.gmra.mrb[72].mxu1 %vm1280_vm7, %v1504_v48 }
 0x305   : > { %10410 = vmatprep.mubr.msk.bf16.mxu1 %vm1280_vm7, %v12130_v35  ;;  %v10774_v35 = vld [vmem:[%s14503_s3 + $0x58] sm:$0xff]  }
 0x30c   : > { %10411 = vmatmul.mubr.msk.bf16.vlgmr.msra.gmra.mrb[56].mxu1 %vm1280_vm7, %v12157_v5  ;;  %v10775_v5 = vld [vmem:[%s14503_s3 + $0x60] sm:$0xff]  }
 0x30d   : > { %10414 = vmatprep.mubr.msk.bf16.mxu1 %vm1280_vm7, %v12200_v45  ;;  %10423 = vmatpush3.bf16.msra.mxu1 %v10771_v31 }
 0x30e   : > { %10424 = vmatprep.subr.bf16.mxu1 %v10772_v11 }
 0x311   : > { %10425 = vmatpush3.bf16.msra.mxu1 %v10772_v11 }
 0x312   : > { %10438 = vmatprep.subr.bf16.mxu1 %v10773_v4 }
 0x314   : > { %10415 = vmatmul.mubr.msk.bf16.gmra.mrb[60].mxu1 %vm1280_vm7, %v12235_v25 }
 0x315   : > { %10418 = vmatprep.mubr.msk.bf16.mxu1 %vm1280_vm7, %v12269_v26 }
 0x31c   : > { %10419 = vmatmul.mubr.msk.bf16.gmra.mrb[76].mxu1 %vm1280_vm7, %v1646_v2 }
 0x31d   : > { %10426 = vmatprep.mubr.msk.bf16.mxu1 %vm1280_vm7, %v12141_v50  ;;  %v10776_v50 = vld [vmem:[%s14503_s3 + $0x68] sm:$0xff]  }
 0x324   : > { %10427 = vmatmul.mubr.msk.bf16.vlgmr.msra.gmra.mrb[56].mxu1 %vm1280_vm7, %v12183_v22 }
 0x325   : > { %10430 = vmatprep.mubr.msk.bf16.mxu1 %vm1280_vm7, %v12218_v3  ;;  %10439 = vmatpush3.bf16.msra.mxu1 %v10773_v4 }
 0x326   : > { %10440 = vmatprep.subr.bf16.mxu1 %v10774_v35 }
 0x329   : > { %10441 = vmatpush3.bf16.msra.mxu1 %v10774_v35 }
 0x32a   : > { %10454 = vmatprep.subr.bf16.mxu1 %v10775_v5 }
 0x32c   : > { %10431 = vmatmul.mubr.msk.bf16.gmra.mrb[60].mxu1 %vm1280_vm7, %v12252_v34 }
 0x32d   : > { %10434 = vmatprep.mubr.msk.bf16.mxu1 %vm1280_vm7, %v12289_v59 }
 0x334   : > { %10435 = vmatmul.mubr.msk.bf16.gmra.mrb[80].mxu1 %vm1280_vm7, %v1805_v46 }
 0x335   : > { %10442 = vmatprep.mubr.msk.bf16.mxu1 %vm1280_vm7, %v12133_v41  ;;  %v10778_v41 = vld [vmem:[%s14503_s3 + $0x78] sm:$0xff]  }
 0x33c   : > { %10443 = vmatmul.mubr.msk.bf16.vlgmr.msra.gmra.mrb[56].mxu1 %vm1280_vm7, %v12163_v12  ;;  %v10779_v12 = vld [vmem:[%s14503_s3 + $0x80] sm:$0xff]  }
 0x33d   : > { %10446 = vmatprep.mubr.msk.bf16.mxu1 %vm1280_vm7, %v12204_v47  ;;  %10455 = vmatpush3.bf16.msra.mxu1 %v10775_v5 }
 0x33e   : > { %10456 = vmatprep.subr.bf16.mxu1 %v10776_v50 }
 0x341   : > { %10457 = vmatpush3.bf16.msra.mxu1 %v10776_v50 }
 0x342   : > { %10470 = vmatprep.subr.bf16.mxu1 %v10777_v20 }
 0x344   : > { %10447 = vmatmul.mubr.msk.bf16.gmra.mrb[60].mxu1 %vm1280_vm7, %v12238_v36 }
 0x345   : > { %10450 = vmatprep.mubr.msk.bf16.mxu1 %vm1280_vm7, %v12272_v49 }
 0x34c   : > { %10451 = vmatmul.mubr.msk.bf16.gmra.mrb[84].mxu1 %vm1280_vm7, %v12302_v32 }
 0x34d   : > { %10458 = vmatprep.mubr.msk.bf16.mxu1 %vm1280_vm7, %v12166_v33  ;;  %v10780_v33 = vld [vmem:[%s14503_s3 + $0x88] sm:$0xff]  }
 0x354   : > { %10459 = vmatmul.mubr.msk.bf16.vlgmr.msra.gmra.mrb[56].mxu1 %vm1280_vm7, %v12207_v8 }
 0x355   : > { %10462 = vmatprep.mubr.msk.bf16.mxu1 %vm1280_vm7, %v12241_v23  ;;  %10471 = vmatpush3.bf16.msra.mxu1 %v10777_v20 }
 0x356   : > { %10472 = vmatprep.subr.bf16.mxu1 %v10778_v41 }
 0x359   : > { %10473 = vmatpush3.bf16.msra.mxu1 %v10778_v41 }
 0x35a   : > { %10486 = vmatprep.subr.bf16.mxu1 %v10779_v12 }
 0x35c   : > { %10463 = vmatmul.mubr.msk.bf16.gmra.mrb[60].mxu1 %vm1280_vm7, %v12275_v54 }
 0x35d   : > { %10466 = vmatprep.mubr.msk.bf16.mxu1 %vm1280_vm7, %v12307_v43 }
 0x364   : > { %10467 = vmatmul.mubr.msk.bf16.gmra.mrb[88].mxu1 %vm1280_vm7, %v2082_v55 }
 0x365   : > { %10474 = vmatprep.mubr.msk.bf16.mxu1 %vm1280_vm7, %v12192_v24 }
 0x36c   : > { %10475 = vmatmul.mubr.msk.bf16.vlgmr.msra.gmra.mrb[56].mxu1 %vm1280_vm7, %v12227_v56 }
 0x36d   : > { %10478 = vmatprep.mubr.msk.bf16.mxu1 %vm1280_vm7, %v12261_v10  ;;  %10487 = vmatpush3.bf16.msra.mxu1 %v10779_v12 }
 0x36e   : > { %10488 = vmatprep.subr.bf16.mxu1 %v10780_v33 }
 0x371   : > { %10489 = vmatpush3.bf16.msra.mxu1 %v10780_v33 }
 0x374   : > { %10479 = vmatmul.mubr.msk.bf16.gmra.mrb[60].mxu1 %vm1280_vm7, %v12297_v6 }
 0x375   : > { %10482 = vmatprep.mubr.msk.bf16.mxu1 %vm1280_vm7, %v12327_v38 }
 0x37c   : > { %10483 = vmatmul.mubr.msk.bf16.gmra.mrb[92].mxu1 %vm1280_vm7, %v12317_v16 }
 0x37d   : > { %10490 = vmatprep.mubr.msk.bf16.mxu1 %vm1280_vm7, %v12172_v13 }
 0x384   : > { %10491 = vmatmul.mubr.msk.bf16.vlgmr.msra.gmra.mrb[56].mxu1 %vm1280_vm7, %v12213_v0 }
 0x385   : > { %10494 = vmatprep.mubr.msk.bf16.mxu1 %vm1280_vm7, %v12247_v51 }
 0x38c   : > { %10495 = vmatmul.mubr.msk.bf16.gmra.mrb[60].mxu1 %vm1280_vm7, %v12281_v17 }
 0x38d   : > { %10498 = vmatprep.mubr.msk.bf16.mxu1 %vm1280_vm7, %v12312_v37 }
 0x394   : > { %10499 = vmatmul.mubr.msk.bf16.gmra.mrb[96].mxu1 %vm1280_vm7, %v2370_v9 }
 0x3a7   : > { %v10372_v42 = vpop.f32.mrb[64].mxu1 }
 0x3a8   : > { %v1365_v22 = vpop.f32.mrb[65].mxu1 }
 0x3a9   : > { %v10373_v24 = vpop.f32.mrb[66].mxu1 }
 0x3aa   : > { %v1368_v13 = vpop.f32.mrb[67].mxu1 }
 0x3bf   : > { %v10388_v30 = vpop.f32.mrb[68].mxu1 }
 0x3c0   : > { %v1478_v45 = vadd.f32 %v10388_v30, %v10372_v42  ;;  %v1469_v47 = vpop.f32.mrb[69].mxu1 }
 0x3c1   : > { %v1470_v8 = vadd.f32 %v1469_v47, %v1365_v22  ;;  %v10389_v0 = vpop.f32.mrb[70].mxu1 }
 0x3c2   : > { %v1472_v58 = vpop.f32.mrb[71].mxu1 }
 0x3c3   : > { %v1473_v3 = vadd.f32 %v1472_v58, %v1368_v13 }
 0x3d7   : > { %v10404_v56 = vpop.f32.mrb[72].mxu1 }
 0x3d8   : > { %v1626_v21 = vadd.f32 %v10404_v56, %v1478_v45  ;;  %v1602_v25 = vpop.f32.mrb[73].mxu1 }
 0x3d9   : > { %v1624_v36 = vadd.f32 %v1602_v25, %v1470_v8  ;;  %v10405_v23 = vpop.f32.mrb[74].mxu1 }
 0x3da   : > { %v1605_v51 = vpop.f32.mrb[75].mxu1 }
 0x3db   : > { %v1625_v1 = vadd.f32 %v1605_v51, %v1473_v3 }
 0x3ef   : > { %v10420_v44 = vpop.f32.mrb[76].mxu1 }
 0x3f0   : > { %v1767_v34 = vadd.f32 %v10420_v44, %v1626_v21  ;;  %v1743_v48 = vpop.f32.mrb[77].mxu1 }
 0x3f1   : > { %v1765_v10 = vadd.f32 %v1743_v48, %v1624_v36  ;;  %v10421_v19 = vpop.f32.mrb[78].mxu1 }
 0x3f2   : > { %v1746_v26 = vpop.f32.mrb[79].mxu1 }
 0x3f3   : > { %v1766_v49 = vadd.f32 %v1746_v26, %v1625_v1 }
 0x407   : > { %v10436_v54 = vpop.f32.mrb[80].mxu1 }
 0x408   : > { %v1926_v60 = vadd.f32 %v10436_v54, %v1767_v34  ;;  %v1902_v52 = vpop.f32.mrb[81].mxu1 }
 0x409   : > { %v1924_v7 = vadd.f32 %v1902_v52, %v1765_v10  ;;  %v10437_v17 = vpop.f32.mrb[82].mxu1 }
 0x40a   : > { %v1905_v59 = vpop.f32.mrb[83].mxu1 }
 0x40b   : > { %v1925_v63 = vadd.f32 %v1905_v59, %v1766_v49 }
 0x41f   : > { %v10452_v61 = vpop.f32.mrb[84].mxu1 }
 0x420   : > { %v2066_v29 = vadd.f32 %v10452_v61, %v1926_v60  ;;  %v2042_v39 = vpop.f32.mrb[85].mxu1 }
 0x421   : > { %v2064_v14 = vadd.f32 %v2042_v39, %v1924_v7  ;;  %v10453_v55 = vpop.f32.mrb[86].mxu1 }
 0x422   : > { %v2045_v6 = vpop.f32.mrb[87].mxu1 }
 0x423   : > { %v2065_v9 = vadd.f32 %v2045_v6, %v1925_v63 }
 0x437   : > { %v10468_v2 = vpop.f32.mrb[88].mxu1 }
 0x438   : > { %v2204_v18 = vadd.f32 %v10468_v2, %v2066_v29  ;;  %v2180_v27 = vpop.f32.mrb[89].mxu1 }
 0x439   : > { %v2202_v32 = vadd.f32 %v2180_v27, %v2064_v14  ;;  %v10469_v43 = vpop.f32.mrb[90].mxu1 }
 0x43a   : > { %v2183_v53 = vpop.f32.mrb[91].mxu1 }
 0x43b   : > { %v2203_v28 = vadd.f32 %v2183_v53, %v2065_v9 }
 0x44f   : > { %v10484_v37 = vpop.f32.mrb[92].mxu1 }
 0x450   : > { %v2354_v62 = vadd.f32 %v10484_v37, %v2204_v18  ;;  %v2330_v40 = vpop.f32.mrb[93].mxu1 }
 0x451   : > { %v2352_v16 = vadd.f32 %v2330_v40, %v2202_v32  ;;  %v10485_v46 = vpop.f32.mrb[94].mxu1 }
 0x452   : > { %v2333_v38 = vpop.f32.mrb[95].mxu1 }
 0x453   : > { %v2353_v57 = vadd.f32 %v2333_v38, %v2203_v28 }
 0x457   : > { %v10492_v31 = vpop.f32.mrb[56].mxu1 }
 0x458   : > { %v2502_v11 = vadd.f32 %v10492_v31, %v12458_v15  ;;  %v2436_v4 = vpop.f32.mrb[57].mxu1 }
 0x459   : > { %v2500_v35 = vadd.f32 %v12458_v15, %v2436_v4  ;;  %v10493_v5 = vpop.f32.mrb[58].mxu1 }
 0x45a   : > { %v2513_v50 = vmax.f32 %v2502_v11, 0.0  ;;  %v2503_v20 = vadd.f32 %v10493_v5, %v12458_v15  ;;  %v2439_v41 = vpop.f32.mrb[59].mxu1 }
 0x45b   : > { %v2511_v12 = vmax.f32 %v2500_v35, 0.0  ;;  %v2501_v33 = vadd.f32 %v12458_v15, %v2439_v41 }
 0x45c   : > { %v2514_v42 = vmax.f32 %v2503_v20, 0.0  ;;  %v2535_v24 = vrot.slane %v2513_v50, 1 }
 0x45d   : > { %v2512_v22 = vmax.f32 %v2501_v33, 0.0  ;;  %v2532_v30 = vrot.slane %v2511_v12, 1 }
 0x45e   : > { %v2537_v13 = vrot.slane %v2514_v42, 1 }
 0x45f   : > { %v2533_v45 = vrot.slane %v2512_v22, 1  ;;  %v10496_v47 = vpop.f32.mrb[60].mxu1 }
 0x460   : > { %v2538_v8 = vsel %vm531_vm1, %v2535_v24, %v2537_v13  ;;  %v2506_v0 = vadd.f32 %v10496_v47, %v12458_v15  ;;  %v2452_v58 = vpop.f32.mrb[61].mxu1 }
 0x461   : > { %v12466_v3 = vmax.f32 %v2513_v50, %v2538_v8  ;;  %v2534_v56 = vsel %vm531_vm1, %v2532_v30, %v2533_v45  ;;  %v2536_v21 = vsel %vm531_vm1, %v2533_v45, %v2535_v24  ;;  %v2504_v25 = vadd.f32 %v12458_v15, %v2452_v58  ;;  %v10497_v36 = vpop.f32.mrb[62].mxu1 }
 0x462   : > { %v2560_v23 = vmax.f32 %v2511_v12, %v2534_v56  ;;  %v2561_v51 = vmax.f32 %v2512_v22, %v2536_v21  ;;  %v2517_v1 = vmax.f32 %v2506_v0, 0.0  ;;  %v2507_v44 = vadd.f32 %v10497_v36, %v12458_v15  ;;  %v2455_v34 = vpop.f32.mrb[63].mxu1 }
 0x463   : > { %v2587_v48 = vrot.slane %v12466_v3, 2  ;;  %v2515_v10 = vmax.f32 %v2504_v25, 0.0  ;;  %v2505_v19 = vadd.f32 %v12458_v15, %v2455_v34  ;;  %v14516_v0 = vmov 0.0  }
 0x464   : > { %v2586_v26 = vrot.slane %v2561_v51, 2  ;;  %v2518_v49 = vmax.f32 %v2507_v44, 0.0  ;;  %v2543_v7 = vrot.slane %v2517_v1, 1 }
 0x465   : > { %v2539_v54 = vrot.slane %v2515_v10, 1  ;;  %v2516_v60 = vmax.f32 %v2505_v19, 0.0 }
 0x466   : > { %v2588_v52 = vsel %vm716_vm2, %v2586_v26, %v2587_v48  ;;  %v2545_v17 = vrot.slane %v2518_v49, 1 }
 0x467   : > { %v2540_v59 = vsel %vm531_vm1, %v2537_v13, %v2539_v54  ;;  %v2541_v63 = vrot.slane %v2516_v60, 1  ;;  %v10500_v61 = vpop.f32.mrb[96].mxu1  ;;  %v2614_v29 = vmax.f32 %v2560_v23, %v2588_v52 }
 0x468   : > { %v2563_v39 = vmax.f32 %v2514_v42, %v2540_v59  ;;  %v2546_v14 = vsel %vm531_vm1, %v2543_v7, %v2545_v17  ;;  %v2492_v55 = vadd.f32 %v10500_v61, %v2354_v62  ;;  %v2468_v6 = vpop.f32.mrb[97].mxu1  ;;  %v10782_v61 = vld [vmem:[%s14508_s8 + $0x8] sm:$0xff]  }
 0x469   : > { %v2566_v9 = vmax.f32 %v2517_v1, %v2546_v14  ;;  %v2542_v2 = vsel %vm531_vm1, %v2539_v54, %v2541_v63  ;;  %v2544_v18 = vsel %vm531_vm1, %v2541_v63, %v2543_v7  ;;  %v2490_v27 = vadd.f32 %v2468_v6, %v2352_v16  ;;  %v10501_v32 = vpop.f32.mrb[98].mxu1  ;;  %v10781_v63 = vld [vmem:[%s14508_s8] sm:$0xff]   ;;  %v10786_v14 = vld [vmem:[%s14505_s5 + $0x30] sm:$0xff]  }
 0x46a   : > { %v2589_v43 = vrot.slane %v2563_v39, 2  ;;  %v2564_v53 = vmax.f32 %v2515_v10, %v2542_v2  ;;  %v2565_v28 = vmax.f32 %v2516_v60, %v2544_v18  ;;  %v2510_v37 = vadd.f32 %v12458_v15, %v2492_v55  ;;  %v2471_v40 = vpop.f32.mrb[99].mxu1  ;;  %v10787_v55 = vld [vmem:[%s14505_s5 + $0x38] sm:$0xff]   ;;  %v10788_v6 = vld [vmem:[%s14505_s5] sm:$0xff]  }
 0x46b   : > { %v2595_v46 = vrot.slane %v2566_v9, 2  ;;  %v2508_v38 = vadd.f32 %v12458_v15, %v2490_v27  ;;  %v2491_v31 = vadd.f32 %v2471_v40, %v2353_v57 }
 0x46c   : > { %v2591_v11 = vrot.slane %v2564_v53, 2  ;;  %v2593_v62 = vrot.slane %v2565_v28, 2  ;;  %v2521_v4 = vmax.f32 %v2510_v37, 0.0  ;;  %v2590_v35 = vsel %vm716_vm2, %v2587_v48, %v2589_v43 }
 0x46d   : > { %v2519_v5 = vmax.f32 %v2508_v38, 0.0  ;;  %v2509_v50 = vadd.f32 %v12458_v15, %v2491_v31  ;;  %v2615_v16 = vmax.f32 %v2561_v51, %v2590_v35 }
 0x46e   : > { %v2594_v20 = vsel %vm716_vm2, %v2591_v11, %v2593_v62  ;;  %v2596_v41 = vsel %vm716_vm2, %v2593_v62, %v2595_v46  ;;  %v2570_v12 = vrot.slane %v2521_v4, 1  ;;  %v2592_v33 = vsel %vm716_vm2, %v2589_v43, %v2591_v11 }
 0x46f   : > { %v2547_v42 = vrot.slane %v2519_v5, 1  ;;  %v2520_v22 = vmax.f32 %v2509_v50, 0.0  ;;  %v2628_v24 = vpack.c.bf16 %v2615_v16, %v2614_v29  ;;  %v2616_v57 = vmax.f32 %v12466_v3, %v2592_v33  ;;  %v10783_v29 = vld [vmem:[%s14508_s8 + $0x10] ss:$0 sps:$4 sm:$0xff]  }
 0x470   : > { %v2617_v13 = vmax.f32 %v2563_v39, %v2594_v20  ;;  %v2618_v30 = vmax.f32 %v2564_v53, %v2596_v41  ;;  %v2575_v15 = vmax.f32 %v2521_v4, %v2570_v12  ;;  %v10785_v39 = vld [vmem:[%s14505_s5 + $0x28] sm:$0xff]  }
 0x471   : > { %v2548_v45 = vsel %vm531_vm1, %v2545_v17, %v2547_v42  ;;  %v2549_v47 = vrot.slane %v2520_v22, 1  ;;  %10503 = vmatpush3.bf16.msra.mxu0 %v2628_v24  ;;  %v10784_v17 = vld [vmem:[%s14505_s5 + $0x20] sm:$0xff]  }
 0x472   : > { %v2567_v8 = vmax.f32 %v2518_v49, %v2548_v45  ;;  %10504 = vmatprep.subr.bf16.mxu0 %v14516_v0  ;;  %v2629_v58 = vpack.c.bf16 %v2617_v13, %v2616_v57  ;;  %v2603_v3 = vrot.slane %v2575_v15, 2 }
 0x473   : > { %v2550_v56 = vsel %vm531_vm1, %v2547_v42, %v2549_v47  ;;  %v2571_v21 = vsel %vm531_vm1, %v2549_v47, %v2570_v12 }
 0x474   : > { %v2597_v25 = vrot.slane %v2567_v8, 2  ;;  %v2568_v36 = vmax.f32 %v2519_v5, %v2550_v56  ;;  %v2574_v23 = vmax.f32 %v2520_v22, %v2571_v21 }
 0x475   : > { %10505 = vmatpush3.bf16.msra.mxu0 %v2629_v58 }
 0x476   : > { %v2599_v51 = vrot.slane %v2568_v36, 2  ;;  %v2601_v1 = vrot.slane %v2574_v23, 2  ;;  %10506 = vmatprep.subr.bf16.mxu0 %v14516_v0  ;;  %v2598_v44 = vsel %vm716_vm2, %v2595_v46, %v2597_v25 }
 0x477   : > { %v2619_v34 = vmax.f32 %v2565_v28, %v2598_v44 }
 0x478   : > { %v2602_v48 = vsel %vm716_vm2, %v2599_v51, %v2601_v1  ;;  %v2600_v10 = vsel %vm716_vm2, %v2597_v25, %v2599_v51  ;;  %v2604_v19 = vsel %vm716_vm2, %v2601_v1, %v2603_v3  ;;  %v10789_v51 = vld [vmem:[%s14505_s5 + $0x8] sm:$0xff]  }
 0x479   : > { %v2630_v26 = vpack.c.bf16 %v2619_v34, %v2618_v30  ;;  %v2620_v49 = vmax.f32 %v2566_v9, %v2600_v10  ;;  %v2621_v54 = vmax.f32 %v2567_v8, %v2602_v48  ;;  %v2622_v60 = vmax.f32 %v2568_v36, %v2604_v19 }
 0x47b   : > { %10507 = vmatpush3.bf16.msra.mxu0 %v2630_v26  ;;  %v2631_v52 = vpack.c.bf16 %v2621_v54, %v2620_v49  ;;  %v2632_v7 = vpack.c.bf16 %v2622_v60, %v2622_v60 }
 0x47c   : > { %10508 = vmatprep.subr.bf16.mxu0 %v14516_v0 }
 0x47d   : > { %v2658_v59 = vsel %vm2656_vm11, %v2632_v7, 0 }
 0x47f   : > { %10509 = vmatpush3.bf16.msra.mxu0 %v2631_v52 }
 0x480   : > { %10510 = vmatprep.subr.bf16.mxu0 %v14516_v0 }
 0x483   : > { %10511 = vmatpush3.bf16.msra.mxu0 %v2658_v59 }
 0x484   : > { %10524 = vmatprep.subr.bf16.mxu0 %v10784_v17 }
 0x486   : > { %10513 = vmatmul.mubr.msk.bf16.vlgmr.msra.gmra.mrb[76].mxu0 %vm2646_vm12, %v10781_v63  ;;  %v10790_v63 = vld [vmem:[%s14505_s5 + $0x10] sm:$0xff]  }
 0x487   : > { %10516 = vmatprep.mubr.msk.bf16.mxu0 %vm11653_vm0, %v14516_v0  ;;  %10525 = vmatpush3.bf16.msra.mxu0 %v10784_v17 }
 0x488   : > { %10526 = vmatprep.subr.bf16.mxu0 %v10785_v39 }
 0x48b   : > { %10527 = vmatpush3.bf16.msra.mxu0 %v10785_v39 }
 0x48c   : > { %10528 = vmatprep.subr.bf16.mxu0 %v10786_v14 }
 0x48e   : > { %10517 = vmatmul.mubr.msk.bf16.gmra.mrb[80].mxu0 %vm2646_vm12, %v10782_v61 }
 0x48f   : > { %10520 = vmatprep.mubr.msk.bf16.mxu0 %vm11653_vm0, %v14516_v0  ;;  %10529 = vmatpush3.bf16.msra.mxu0 %v10786_v14  ;;  %vm3391_vm0 = vsmask.f32 1280 }
 0x490   : > { %10530 = vmatprep.subr.bf16.mxu0 %v10787_v55 }
 0x493   : > { %10531 = vmatpush3.bf16.msra.mxu0 %v10787_v55 }
 0x494   : > { %10536 = vmatprep.subr.bf16.mxu0 %v10788_v6 }
 0x496   : > { %10521 = vmatmul.mubr.msk.bf16.gmra.mrb[84].mxu0 %vm2646_vm12, %v10783_v29 }
 0x559   : > { %v2694_v9 = vpop.f32.mrb[76].mxu0 }
 0x55a   : > { %v10514_v2 = vpop.f32.mrb[77].mxu0 }
 0x55b   : > { %v2697_v18 = vpop.f32.mrb[78].mxu0 }
 0x55c   : > { %v2716_v27 = vpack.c.bf16 %v2697_v18, %v2694_v9  ;;  %v10515_v32 = vpop.f32.mrb[79].mxu0  ;;  %v10791_v9 = vld [vmem:[%s14505_s5 + $0x18] sm:$0xff]   ;;  %v10792_v18 = vld [vmem:[%s14505_s5 + $0x40] sm:$0xff]  }
 0x55d   : > { %v10794_v32 = vld [vmem:[%s14505_s5 + $0x50] sm:$0xff]  }
 0x55e   : > { %v2737_v43 = vshrl.u32 %v2716_v27, 16  ;;  %v2739_v53 = vshll.u32 %v2716_v27, 16  ;;  %v2917_v4 = vrot.slane %v2716_v27, 1  ;;  %v3010_v35 = vrot.slane %v2716_v27, 3 }
 0x55f   : > { %v3202_v5 = vrot.slane %v2716_v27, 4  ;;  %v3296_v41 = vrot.slane %v2716_v27, 6  ;;  %v3499_v12 = vrot.slane %v2716_v27, 7 }
 0x560   : > { %v3392_v28 = vrot.slane %v2737_v43, 6  ;;  %v3393_v40 = vrot.slane %v2739_v53, 7  ;;  %v2741_v31 = vrot.slane %v2739_v53, 1  ;;  %v3104_v16 = vrot.slane %v2737_v43, 3 }
 0x561   : > { %v2702_v37 = vpop.f32.mrb[80].mxu0  ;;  %v3105_v20 = vrot.slane %v2739_v53, 4  ;;  %v10796_v53 = vld [vmem:[%s14505_s5 + $0x60] sm:$0xff]  }
 0x562   : > { %v10518_v46 = vpop.f32.mrb[81].mxu0  ;;  %v3394_v11 = vor.u32 %v3393_v40, %v3392_v28  ;;  %v2742_v57 = vor.u32 %v2741_v31, %v2737_v43  ;;  %v10795_v43 = vld [vmem:[%s14505_s5 + $0x58] sm:$0xff]   ;;  %v10797_v28 = vld [vmem:[%s14505_s5 + $0x68] sm:$0xff]   ;;  %v10802_v31 = vld [vmem:[%s14505_s5 + $0x90] sm:$0xff]  }
 0x563   : > { %v2705_v38 = vpop.f32.mrb[82].mxu0  ;;  %v3106_v48 = vor.u32 %v3105_v20, %v3104_v16  ;;  %v10799_v40 = vld [vmem:[%s14505_s5 + $0x78] sm:$0xff]   ;;  %v10800_v46 = vld [vmem:[%s14505_s5 + $0x80] sm:$0xff]   ;;  %v10809_v20 = vld [vmem:[%s14505_s5 + $0xc8] sm:$0xff]  }
 0x564   : > { %v12527_v62 = vpack.c.bf16 %v2705_v38, %v2702_v37  ;;  %v10519_v50 = vpop.f32.mrb[83].mxu0  ;;  %v10798_v37 = vld [vmem:[%s14505_s5 + $0x70] sm:$0xff]   ;;  %v10801_v38 = vld [vmem:[%s14505_s5 + $0x88] sm:$0xff]   ;;  %v10808_v16 = vld [vmem:[%s14505_s5 + $0xc0] sm:$0xff]  }
 0x565   : > { %v10807_v50 = vld [vmem:[%s14505_s5 + $0xb8] sm:$0xff]  }
 0x566   : > { %v2744_v33 = vshll.u32 %v12527_v62, 16  ;;  %v2748_v42 = vshrl.u32 %v12527_v62, 16  ;;  %v2918_v22 = vrot.slane %v12527_v62, 1  ;;  %v3011_v24 = vrot.slane %v12527_v62, 3 }
 0x567   : > { %v3203_v13 = vrot.slane %v12527_v62, 4  ;;  %v3297_v30 = vrot.slane %v12527_v62, 6  ;;  %v3500_v45 = vrot.slane %v12527_v62, 7 }
 0x568   : > { %v2746_v47 = vrot.slane %v2744_v33, 1  ;;  %v2919_v15 = vsel %vm531_vm1, %v2917_v4, %v2918_v22  ;;  %v12542_v8 = vsel %vm2360_vm9, %v3010_v35, %v3011_v24  ;;  %v3107_v0 = vrot.slane %v2748_v42, 3  ;;  %v10804_v4 = vld [vmem:[%s14505_s5 + $0xa0] sm:$0xff]   ;;  %v10805_v35 = vld [vmem:[%s14505_s5 + $0xa8] sm:$0xff]  }
 0x569   : > { %v3108_v58 = vrot.slane %v2744_v33, 4  ;;  %v12547_v56 = vsel %vm2656_vm11, %v3202_v5, %v3203_v13  ;;  %v2710_v21 = vpop.f32.mrb[84].mxu0  ;;  %v12550_v25 = vsel %vm1932_vm6, %v3296_v41, %v3297_v30  ;;  %v3395_v36 = vrot.slane %v2748_v42, 6  ;;  %v10806_v5 = vld [vmem:[%s14505_s5 + $0xb0] sm:$0xff]  }
 0x56a   : > { %v2747_v23 = vsel %vm1220_vm5, %v2742_v57, %v2746_v47  ;;  %v2750_v3 = vor.u32 %v2748_v42, %v2746_v47  ;;  %v2718_v1 = vpack.c.bf16 %v2710_v21, %v2710_v21  ;;  %v3396_v44 = vrot.slane %v2744_v33, 7  ;;  %v10522_v34 = vpop.f32.mrb[85].mxu0  ;;  %v10810_v41 = vld [vmem:[%s14505_s5 + $0xd0] sm:$0xff]   ;;  %v10813_v33 = vld [vmem:[%s14505_s5 + $0xe8] sm:$0xff]  }
 0x56b   : > { %10532 = vmatprep.mubr.msk.bf16.mxu0 %vm2775_vm13, %v2747_v23  ;;  %v12557_v10 = vor.u32 %v3108_v58, %v3107_v0  ;;  %v12560_v19 = vsel %vm3498_vm15, %v3499_v12, %v3500_v45  ;;  %v2713_v26 = vpop.f32.mrb[86].mxu0  ;;  %v10811_v12 = vld [vmem:[%s14505_s5 + $0xd8] sm:$0xff]   ;;  %v10814_v42 = vld [vmem:[%s14505_s5 + $0xf0] sm:$0xff]   ;;  %v10817_v57 = vld [vmem:[%s14505_s5 + $0x108] sm:$0xff]   ;;  %vm3681_vm1 = vcmask (%p48_p0), 1041409  }
 0x56c   : > { %10533 = vmatmul.mubr.msk.bf16.vlgmr.msra.gmra.mrb[88].mxu0 %vm2775_vm13, %v2750_v3  ;;  %v3299_v49 = vrot.slane %v2718_v1, 6  ;;  %v3400_v54 = vshrl.u32 %v2718_v1, 16  ;;  %v3403_v60 = vshll.u32 %v2718_v1, 16  ;;  %v3502_v52 = vrot.slane %v2718_v1, 7  ;;  %v10523_v7 = vpop.f32.mrb[87].mxu0 }
 0x56d   : > { %10537 = vmatpush3.bf16.msra.mxu0 %v10788_v6  ;;  %10544 = vmatprep.mubr.msk.bf16.mxu0 %vm2775_vm13, %v2716_v27  ;;  %v3110_v17 = vsel %vm3103_vm14, %v3106_v48, %v12557_v10  ;;  %v3397_v59 = vor.u32 %v3396_v44, %v3395_v36  ;;  %v10793_v27 = vld [vmem:[%s14505_s5 + $0x48] sm:$0xff]  }
 0x56e   : > { %10538 = vmatprep.subr.bf16.mxu0 %v10789_v51  ;;  %v3402_v61 = vrot.slane %v3400_v54, 6  ;;  %v3405_v29 = vrot.slane %v3403_v60, 7  ;;  %v12570_v39 = vsel %vm1932_vm6, %v3297_v30, %v3299_v49  ;;  %v12573_v14 = vsel %vm3498_vm15, %v3500_v45, %v3502_v52  ;;  %v10819_v30 = vld [vmem:[%s14505_s5 + $0x118] sm:$0xff]  }
 0x56f   : > { %v12576_v55 = vsel %vm3391_vm0, %v3394_v11, %v3397_v59  ;;  %v10803_v11 = vld [vmem:[%s14505_s5 + $0x98] sm:$0xff]  }
 0x570   : > { %v3406_v6 = vor.u32 %v3405_v29, %v3402_v61 }
 0x571   : > { %10539 = vmatpush3.bf16.msra.mxu0 %v10789_v51 }
 0x572   : > { %10540 = vmatprep.subr.bf16.mxu0 %v10790_v63  ;;  %v12582_v2 = vsel %vm3391_vm0, %v3397_v59, %v3406_v6 }
 0x575   : > { %10541 = vmatpush3.bf16.msra.mxu0 %v10790_v63 }
 0x576   : > { %10542 = vmatprep.subr.bf16.mxu0 %v10791_v9 }
 0x579   : > { %10543 = vmatpush3.bf16.msra.mxu0 %v10791_v9 }
 0x57a   : > { %10548 = vmatprep.subr.bf16.mxu0 %v10792_v18 }
 0x57c   : > { %10545 = vmatmul.mubr.msk.bf16.vlgmr.msra.gmra.mrb[92].mxu0 %vm2775_vm13, %v12527_v62  ;;  %v10812_v62 = vld [vmem:[%s14505_s5 + $0xe0] sm:$0xff]  }
 0x57d   : > { %10549 = vmatpush3.bf16.msra.mxu0 %v10792_v18  ;;  %10556 = vmatprep.mubr.msk.bf16.mxu0 %vm2775_vm13, %v2919_v15 }
 0x57e   : > { %10550 = vmatprep.subr.bf16.mxu0 %v10793_v27 }
 0x581   : > { %10551 = vmatpush3.bf16.msra.mxu0 %v10793_v27 }
 0x582   : > { %10552 = vmatprep.subr.bf16.mxu0 %v10794_v32 }
 0x585   : > { %10553 = vmatpush3.bf16.msra.mxu0 %v10794_v32 }
 0x586   : > { %10554 = vmatprep.subr.bf16.mxu0 %v10795_v43 }
 0x589   : > { %10555 = vmatpush3.bf16.msra.mxu0 %v10795_v43 }
 0x58a   : > { %10560 = vmatprep.subr.bf16.mxu0 %v10796_v53 }
 0x58c   : > { %10557 = vmatmul.mubr.msk.bf16.vlgmr.msra.gmra.mrb[96].mxu0 %vm2775_vm13, %v2918_v22  ;;  %v10815_v22 = vld [vmem:[%s14505_s5 + $0xf8] sm:$0xff]  }
 0x58d   : > { %10561 = vmatpush3.bf16.msra.mxu0 %v10796_v53  ;;  %10568 = vmatprep.mubr.msk.bf16.mxu0 %vm2775_vm13, %v12542_v8 }
 0x58e   : > { %10562 = vmatprep.subr.bf16.mxu0 %v10797_v28 }
 0x591   : > { %10563 = vmatpush3.bf16.msra.mxu0 %v10797_v28 }
 0x592   : > { %10564 = vmatprep.subr.bf16.mxu0 %v10798_v37 }
 0x595   : > { %10565 = vmatpush3.bf16.msra.mxu0 %v10798_v37 }
 0x596   : > { %10566 = vmatprep.subr.bf16.mxu0 %v10799_v40 }
 0x599   : > { %10567 = vmatpush3.bf16.msra.mxu0 %v10799_v40 }
 0x59a   : > { %10572 = vmatprep.subr.bf16.mxu0 %v10800_v46 }
 0x59c   : > { %10569 = vmatmul.mubr.msk.bf16.vlgmr.msra.gmra.mrb[100].mxu0 %vm2775_vm13, %v3011_v24  ;;  %v10816_v24 = vld [vmem:[%s14505_s5 + $0x100] sm:$0xff]  }
 0x59d   : > { %10573 = vmatpush3.bf16.msra.mxu0 %v10800_v46  ;;  %10580 = vmatprep.mubr.msk.bf16.mxu0 %vm2775_vm13, %v3110_v17 }
 0x59e   : > { %10574 = vmatprep.subr.bf16.mxu0 %v10801_v38 }
 0x5a1   : > { %10575 = vmatpush3.bf16.msra.mxu0 %v10801_v38 }
 0x5a2   : > { %10576 = vmatprep.subr.bf16.mxu0 %v10802_v31 }
 0x5a5   : > { %10577 = vmatpush3.bf16.msra.mxu0 %v10802_v31 }
 0x5a6   : > { %10578 = vmatprep.subr.bf16.mxu0 %v10803_v11 }
 0x5a9   : > { %10579 = vmatpush3.bf16.msra.mxu0 %v10803_v11 }
 0x5aa   : > { %10584 = vmatprep.subr.bf16.mxu0 %v10804_v4 }
 0x5ac   : > { %10581 = vmatmul.mubr.msk.bf16.vlgmr.msra.gmra.mrb[104].mxu0 %vm2775_vm13, %v12557_v10 }
 0x5ad   : > { %10585 = vmatpush3.bf16.msra.mxu0 %v10804_v4  ;;  %10592 = vmatprep.mubr.msk.bf16.mxu0 %vm2775_vm13, %v12547_v56 }
 0x5ae   : > { %10586 = vmatprep.subr.bf16.mxu0 %v10805_v35 }
 0x5b1   : > { %10587 = vmatpush3.bf16.msra.mxu0 %v10805_v35 }
 0x5b2   : > { %10588 = vmatprep.subr.bf16.mxu0 %v10806_v5 }
 0x5b5   : > { %10589 = vmatpush3.bf16.msra.mxu0 %v10806_v5 }
 0x5b6   : > { %10590 = vmatprep.subr.bf16.mxu0 %v10807_v50 }
 0x5b9   : > { %10591 = vmatpush3.bf16.msra.mxu0 %v10807_v50 }
 0x5ba   : > { %10596 = vmatprep.subr.bf16.mxu0 %v10808_v16 }
 0x5bc   : > { %10593 = vmatmul.mubr.msk.bf16.vlgmr.msra.gmra.mrb[108].mxu0 %vm2775_vm13, %v3203_v13  ;;  %v10818_v13 = vld [vmem:[%s14505_s5 + $0x110] sm:$0xff]  }
 0x5bd   : > { %10597 = vmatpush3.bf16.msra.mxu0 %v10808_v16  ;;  %10604 = vmatprep.mubr.msk.bf16.mxu0 %vm2775_vm13, %v12550_v25 }
 0x5be   : > { %10598 = vmatprep.subr.bf16.mxu0 %v10809_v20 }
 0x5c1   : > { %10599 = vmatpush3.bf16.msra.mxu0 %v10809_v20 }
 0x5c2   : > { %10600 = vmatprep.subr.bf16.mxu0 %v10810_v41 }
 0x5c5   : > { %10601 = vmatpush3.bf16.msra.mxu0 %v10810_v41  ;;  %v8938_v41 = vld [vmem:[%s14506_s6] ss:$0 sm:$0xff] }
 0x5c6   : > { %10602 = vmatprep.subr.bf16.mxu0 %v10811_v12 }
 0x5c9   : > { %10603 = vmatpush3.bf16.msra.mxu0 %v10811_v12 }
 0x5ca   : > { %10608 = vmatprep.subr.bf16.mxu0 %v10812_v62 }
 0x5cc   : > { %10605 = vmatmul.mubr.msk.bf16.vlgmr.msra.gmra.mrb[112].mxu0 %vm2775_vm13, %v12570_v39 }
 0x5cd   : > { %10609 = vmatpush3.bf16.msra.mxu0 %v10812_v62  ;;  %10616 = vmatprep.mubr.msk.bf16.mxu0 %vm2775_vm13, %v12576_v55 }
 0x5ce   : > { %10610 = vmatprep.subr.bf16.mxu0 %v10813_v33 }
 0x5d1   : > { %10611 = vmatpush3.bf16.msra.mxu0 %v10813_v33 }
 0x5d2   : > { %10612 = vmatprep.subr.bf16.mxu0 %v10814_v42 }
 0x5d5   : > { %10613 = vmatpush3.bf16.msra.mxu0 %v10814_v42 }
 0x5d6   : > { %10614 = vmatprep.subr.bf16.mxu0 %v10815_v22 }
 0x5d9   : > { %10615 = vmatpush3.bf16.msra.mxu0 %v10815_v22 }
 0x5da   : > { %10620 = vmatprep.subr.bf16.mxu0 %v10816_v24 }
 0x5dc   : > { %10617 = vmatmul.mubr.msk.bf16.vlgmr.msra.gmra.mrb[116].mxu0 %vm2775_vm13, %v12582_v2 }
 0x5dd   : > { %10621 = vmatpush3.bf16.msra.mxu0 %v10816_v24  ;;  %10628 = vmatprep.mubr.msk.bf16.mxu0 %vm2775_vm13, %v12560_v19 }
 0x5de   : > { %10622 = vmatprep.subr.bf16.mxu0 %v10817_v57 }
 0x5e1   : > { %10623 = vmatpush3.bf16.msra.mxu0 %v10817_v57 }
 0x5e2   : > { %10624 = vmatprep.subr.bf16.mxu0 %v10818_v13 }
 0x5e5   : > { %10625 = vmatpush3.bf16.msra.mxu0 %v10818_v13 }
 0x5e6   : > { %10626 = vmatprep.subr.bf16.mxu0 %v10819_v30 }
 0x5e9   : > { %10627 = vmatpush3.bf16.msra.mxu0 %v10819_v30 }
 0x5ec   : > { %10629 = vmatmul.mubr.msk.bf16.vlgmr.msra.gmra.mrb[120].mxu0 %vm2775_vm13, %v12573_v14 }
 0x63f   : > { %v10534_v45 = vpop.f32.mrb[88].mxu0 }
 0x640   : > { %v2816_v47 = vpop.f32.mrb[89].mxu0 }
 0x641   : > { %v10535_v15 = vpop.f32.mrb[90].mxu0 }
 0x642   : > { %v2819_v8 = vpop.f32.mrb[91].mxu0 }
 0x64f   : > { %v10546_v0 = vpop.f32.mrb[92].mxu0 }
 0x650   : > { %v2901_v58 = vadd.f32 %v10546_v0, %v10534_v45  ;;  %v2892_v56 = vpop.f32.mrb[93].mxu0  ;;  %v10822_v0 = vld [vmem:[%s14509_s9 + $0x10c] ss:$16 sps:$4 sm:$0xff] (%p48_p0)  }
 0x651   : > { %v2893_v21 = vadd.f32 %v2892_v56, %v2816_v47  ;;  %v10547_v25 = vpop.f32.mrb[94].mxu0  ;;  %v10824_v56 = vld [vmem:[%s14509_s9 + $0x100] ss:$16 sps:$4 sm:$0xff] (%p48_p0)   ;;  %3886 = vmatprep.subr.bf16.mxu1 (%p48_p0), %v10822_v0 }
 0x652   : > { %v2895_v36 = vpop.f32.mrb[95].mxu0  ;;  %v10826_v25 = vld [vmem:[%s14509_s9 + $0x124] ss:$16 sps:$4 sm:$0xff] (%p48_p0)  }
 0x653   : > { %v2896_v23 = vadd.f32 %v2895_v36, %v2819_v8  ;;  %v10820_v8 = vld [vmem:[%s14509_s9 + $0x104] ss:$16 sps:$4 sm:$0xff] (%p48_p0)   ;;  %v10828_v36 = vld [vmem:[%s14509_s9 + $0x12c] ss:$16 sps:$4 sm:$0xff] (%p48_p0)  }
 0x654   :  { %3845 = vmatprep.subr.bf16.mxu0 (%p48_p0), %v10820_v8  ;;  %v10903_v8 = vld [vmem:[%s14509_s9 + $0xac] ss:$16 sps:$4 sm:$0xff] (%p48_p0)  }
 0x655   :  { %3846 = vmatpush1.bf16.msra.mxu0 (%p48_p0), %v10824_v56 }
 0x656   :  { %3847 = vmatprep.subr.bf16.mxu0 (%p48_p0), %v10826_v25  ;;  %v10901_v25 = vld [vmem:[%s14509_s9 + $0xa8] ss:$16 sps:$4 sm:$0xff] (%p48_p0)  }
 0x65f   : > { %v10558_v3 = vpop.f32.mrb[96].mxu0 }
 0x660   : > { %v3000_v51 = vadd.f32 %v10558_v3, %v2901_v58  ;;  %v2984_v1 = vpop.f32.mrb[97].mxu0  ;;  %v11654_v58 = vmov (%p48_p0), 0   ;;  %v10831_v3 = vld [vmem:[%s14509_s9 + $0x128] ss:$16 sps:$4 sm:$0xff] (%p48_p0)  }
 0x661   : > { %v2998_v44 = vadd.f32 %v2984_v1, %v2893_v21  ;;  %v10559_v34 = vpop.f32.mrb[98].mxu0  ;;  %3877 = vmatprep.mubr.bf16.mxu0 (%p48_p0), %v11654_v58  ;;  %3918 = vmatprep.mubr.bf16.mxu1 (%p48_p0), %v11654_v58  ;;  %v10825_v21 = vld [vmem:[%s14509_s9 + $0x108] ss:$16 sps:$4 sm:$0xff] (%p48_p0)   ;;  %v10834_v1 = vld [vmem:[%s14509_s9 + $0x14c] ss:$16 sps:$4 sm:$0xff] (%p48_p0)  }
 0x662   : > { %v2987_v48 = vpop.f32.mrb[99].mxu0  ;;  %3887 = vmatpush1.bf16.msra.mxu1 (%p48_p0), %v10825_v21  ;;  %v10837_v34 = vld [vmem:[%s14509_s9 + $0x148] ss:$16 sps:$4 sm:$0xff] (%p48_p0)   ;;  %v10898_v21 = vld [vmem:[%s14509_s9 + $0xa0] ss:$16 sps:$4 sm:$0xff] (%p48_p0)  }
 0x663   : > { %v2999_v10 = vadd.f32 %v2987_v48, %v2896_v23  ;;  %v10830_v23 = vld [vmem:[%s14509_s9 + $0x120] ss:$16 sps:$4 sm:$0xff] (%p48_p0)   ;;  %3888 = vmatprep.subr.bf16.mxu1 (%p48_p0), %v10828_v36  ;;  %v10838_v48 = vld [vmem:[%s14509_s9 + $0x164] ss:$16 sps:$4 sm:$0xff] (%p48_p0)  }
 0x664   :  { %3848 = vmatpush1.bf16.msra.mxu0 (%p48_p0), %v10830_v23  ;;  %v10906_v36 = vld [vmem:[%s14509_s9 + $0xc4] ss:$16 sps:$4 sm:$0xff] (%p48_p0)  }
 0x666   :  { %3889 = vmatpush1.bf16.msra.mxu1 (%p48_p0), %v10831_v3 }
 0x667   :  { %3890 = vmatprep.subr.bf16.mxu1 (%p48_p0), %v10834_v1  ;;  %v10904_v1 = vld [vmem:[%s14509_s9 + $0xc0] ss:$16 sps:$4 sm:$0xff] (%p48_p0)  }
 0x66a   :  { %3891 = vmatpush1.bf16.msra.mxu1 (%p48_p0), %v10837_v34  ;;  %v10912_v34 = vld [vmem:[%s14509_s9 + $0xe4] ss:$16 sps:$4 sm:$0xff] (%p48_p0)  }
 0x66f   : > { %v10570_v19 = vpop.f32.mrb[100].mxu0 }
 0x670   : > { %v3093_v26 = vadd.f32 %v10570_v19, %v3000_v51  ;;  %v3077_v49 = vpop.f32.mrb[101].mxu0  ;;  %v10832_v51 = vld [vmem:[%s14509_s9 + $0x144] ss:$16 sps:$4 sm:$0xff] (%p48_p0)   ;;  %v10842_v19 = vld [vmem:[%s14509_s9 + $0x160] ss:$16 sps:$4 sm:$0xff] (%p48_p0)  }
 0x671   : > { %v3091_v54 = vadd.f32 %v3077_v49, %v2998_v44  ;;  %v10571_v60 = vpop.f32.mrb[102].mxu0  ;;  %v10836_v44 = vld [vmem:[%s14509_s9 + $0x140] ss:$16 sps:$4 sm:$0xff] (%p48_p0)   ;;  %3849 = vmatprep.subr.bf16.mxu0 (%p48_p0), %v10832_v51  ;;  %v10844_v49 = vld [vmem:[%s14509_s9 + $0x184] ss:$16 sps:$4 sm:$0xff] (%p48_p0)  }
 0x672   : > { %v3080_v52 = vpop.f32.mrb[103].mxu0  ;;  %3850 = vmatpush1.bf16.msra.mxu0 (%p48_p0), %v10836_v44  ;;  %v10848_v60 = vld [vmem:[%s14509_s9 + $0x180] ss:$16 sps:$4 sm:$0xff] (%p48_p0)   ;;  %v10909_v51 = vld [vmem:[%s14509_s9 + $0xcc] ss:$16 sps:$4 sm:$0xff] (%p48_p0)  }
 0x673   : > { %v3092_v7 = vadd.f32 %v3080_v52, %v2999_v10  ;;  %v10840_v10 = vld [vmem:[%s14509_s9 + $0x16c] ss:$16 sps:$4 sm:$0xff] (%p48_p0)   ;;  %3851 = vmatprep.subr.bf16.mxu0 (%p48_p0), %v10838_v48  ;;  %v10849_v52 = vld [vmem:[%s14509_s9 + $0x188] ss:$16 sps:$4 sm:$0xff] (%p48_p0)  }
 0x674   :  { %3892 = vmatprep.subr.bf16.mxu1 (%p48_p0), %v10840_v10  ;;  %v10907_v44 = vld [vmem:[%s14509_s9 + $0xc8] ss:$16 sps:$4 sm:$0xff] (%p48_p0)  }
 0x676   :  { %3852 = vmatpush1.bf16.msra.mxu0 (%p48_p0), %v10842_v19  ;;  %v10915_v19 = vld [vmem:[%s14509_s9 + $0xec] ss:$16 sps:$4 sm:$0xff] (%p48_p0)  }
 0x677   :  { %3853 = vmatprep.subr.bf16.mxu0 (%p48_p0), %v10844_v49  ;;  %v10913_v49 = vld [vmem:[%s14509_s9 + $0xe8] ss:$16 sps:$4 sm:$0xff] (%p48_p0)  }
 0x67a   :  { %3854 = vmatpush1.bf16.msra.mxu0 (%p48_p0), %v10848_v60  ;;  %v10918_v60 = vld [vmem:[%s14509_s9 + $0x204] ss:$16 sps:$4 sm:$0xff] (%p48_p0)  }
 0x67f   : > { %v10582_v17 = vpop.f32.mrb[104].mxu0 }
 0x680   : > { %v3191_v59 = vadd.f32 %v10582_v17, %v3093_v26  ;;  %v3175_v63 = vpop.f32.mrb[105].mxu0  ;;  %v10843_v26 = vld [vmem:[%s14509_s9 + $0x168] ss:$16 sps:$4 sm:$0xff] (%p48_p0)   ;;  %v10852_v17 = vld [vmem:[%s14509_s9 + $0x1ac] ss:$16 sps:$4 sm:$0xff] (%p48_p0)  }
 0x681   : > { %v3189_v61 = vadd.f32 %v3175_v63, %v3091_v54  ;;  %v10583_v29 = vpop.f32.mrb[106].mxu0  ;;  %v10846_v54 = vld [vmem:[%s14509_s9 + $0x18c] ss:$16 sps:$4 sm:$0xff] (%p48_p0)   ;;  %3893 = vmatpush1.bf16.msra.mxu1 (%p48_p0), %v10843_v26  ;;  %v10855_v63 = vld [vmem:[%s14509_s9 + $0x1a8] ss:$16 sps:$4 sm:$0xff] (%p48_p0)  }
 0x682   : > { %v3178_v39 = vpop.f32.mrb[107].mxu0  ;;  %3894 = vmatprep.subr.bf16.mxu1 (%p48_p0), %v10846_v54  ;;  %v10858_v29 = vld [vmem:[%s14509_s9 + $0x1cc] ss:$16 sps:$4 sm:$0xff] (%p48_p0)   ;;  %v10910_v26 = vld [vmem:[%s14509_s9 + $0xe0] ss:$16 sps:$4 sm:$0xff] (%p48_p0)  }
 0x683   : > { %v3190_v14 = vadd.f32 %v3178_v39, %v3092_v7  ;;  %v10850_v7 = vld [vmem:[%s14509_s9 + $0x1a4] ss:$16 sps:$4 sm:$0xff] (%p48_p0)  }
 0x684   :  { %3855 = vmatprep.subr.bf16.mxu0 (%p48_p0), %v10850_v7 }
 0x685   :  { %3895 = vmatpush1.bf16.msra.mxu1 (%p48_p0), %v10849_v52  ;;  %v10921_v52 = vld [vmem:[%s14509_s9 + $0x20c] ss:$16 sps:$4 sm:$0xff] (%p48_p0)  }
 0x686   :  { %3896 = vmatprep.subr.bf16.mxu1 (%p48_p0), %v10852_v17  ;;  %v10916_v17 = vld [vmem:[%s14509_s9 + $0x200] ss:$16 sps:$4 sm:$0xff] (%p48_p0)  }
 0x689   :  { %3897 = vmatpush1.bf16.msra.mxu1 (%p48_p0), %v10855_v63  ;;  %v10924_v63 = vld [vmem:[%s14509_s9 + $0x224] ss:$16 sps:$4 sm:$0xff] (%p48_p0)  }
 0x68a   :  { %3898 = vmatprep.subr.bf16.mxu1 (%p48_p0), %v10858_v29  ;;  %v10922_v29 = vld [vmem:[%s14509_s9 + $0x220] ss:$16 sps:$4 sm:$0xff] (%p48_p0)  }
 0x68f   : > { %v10594_v55 = vpop.f32.mrb[108].mxu0 }
 0x690   : > { %v3285_v6 = vadd.f32 %v10594_v55, %v3191_v59  ;;  %v3269_v9 = vpop.f32.mrb[109].mxu0  ;;  %v10854_v59 = vld [vmem:[%s14509_s9 + $0x1a0] ss:$16 sps:$4 sm:$0xff] (%p48_p0)  }
 0x691   : > { %v3283_v2 = vadd.f32 %v3269_v9, %v3189_v61  ;;  %v10595_v18 = vpop.f32.mrb[110].mxu0  ;;  %v10856_v61 = vld [vmem:[%s14509_s9 + $0x1c4] ss:$16 sps:$4 sm:$0xff] (%p48_p0)   ;;  %3856 = vmatpush1.bf16.msra.mxu0 (%p48_p0), %v10854_v59  ;;  %v10860_v9 = vld [vmem:[%s14509_s9 + $0x1c0] ss:$16 sps:$4 sm:$0xff] (%p48_p0)  }
 0x692   : > { %v3272_v27 = vpop.f32.mrb[111].mxu0  ;;  %3857 = vmatprep.subr.bf16.mxu0 (%p48_p0), %v10856_v61  ;;  %v10919_v59 = vld [vmem:[%s14509_s9 + $0x208] ss:$16 sps:$4 sm:$0xff] (%p48_p0)   ;;  %v10927_v61 = vld [vmem:[%s14509_s9 + $0x22c] ss:$16 sps:$4 sm:$0xff] (%p48_p0)  }
 0x693   : > { %v3284_v32 = vadd.f32 %v3272_v27, %v3190_v14 }
 0x695   :  { %3858 = vmatpush1.bf16.msra.mxu0 (%p48_p0), %v10860_v9  ;;  %v10931_v9 = vld [vmem:[%s14509_s9 + $0x248] ss:$16 sps:$4 sm:$0xff] (%p48_p0)  }
 0x69f   : > { %v10606_v43 = vpop.f32.mrb[112].mxu0 }
 0x6a0   : > { %v3381_v53 = vadd.f32 %v10606_v43, %v3285_v6  ;;  %v3365_v28 = vpop.f32.mrb[113].mxu0  ;;  %v10864_v43 = vld [vmem:[%s14509_s9 + $0x1ec] ss:$16 sps:$4 sm:$0xff] (%p48_p0)  }
 0x6a1   : > { %v3379_v37 = vadd.f32 %v3365_v28, %v3283_v2  ;;  %v10607_v40 = vpop.f32.mrb[114].mxu0  ;;  %v10861_v2 = vld [vmem:[%s14509_s9 + $0x1c8] ss:$16 sps:$4 sm:$0xff] (%p48_p0)   ;;  %v10866_v28 = vld [vmem:[%s14509_s9 + $0x1e0] ss:$16 sps:$4 sm:$0xff] (%p48_p0)  }
 0x6a2   : > { %v3368_v46 = vpop.f32.mrb[115].mxu0  ;;  %3899 = vmatpush1.bf16.msra.mxu1 (%p48_p0), %v10861_v2  ;;  %v10936_v2 = vld [vmem:[%s14509_s9 + $0x264] ss:$16 sps:$4 sm:$0xff] (%p48_p0)  }
 0x6a3   : > { %v3380_v38 = vadd.f32 %v3368_v46, %v3284_v32  ;;  %v10862_v32 = vld [vmem:[%s14509_s9 + $0x1e4] ss:$16 sps:$4 sm:$0xff] (%p48_p0)   ;;  %3900 = vmatprep.subr.bf16.mxu1 (%p48_p0), %v10864_v43 }
 0x6a4   :  { %3859 = vmatprep.subr.bf16.mxu0 (%p48_p0), %v10862_v32  ;;  %v10870_v46 = vld [vmem:[%s14509_s9 + $0x4] ss:$16 sps:$4 sm:$0xff] (%p48_p0)   ;;  %v10937_v32 = vld [vmem:[%s14509_s9 + $0x268] ss:$16 sps:$4 sm:$0xff] (%p48_p0)  }
 0x6a5   :  { %3860 = vmatpush1.bf16.msra.mxu0 (%p48_p0), %v10866_v28  ;;  %v10942_v43 = vld [vmem:[%s14509_s9 + $0x284] ss:$16 sps:$4 sm:$0xff] (%p48_p0)  }
 0x6a6   :  { %4095 = vmatprep.subr.bf16.mxu0 (%p48_p0), %v10870_v46  ;;  %v10948_v46 = vld [vmem:[%s14509_s9 + $0x2a4] ss:$16 sps:$4 sm:$0xff] (%p48_p0)  }
 0x6af   : > { %v10618_v31 = vpop.f32.mrb[116].mxu0 }
 0x6b0   : > { %v3488_v11 = vadd.f32 %v10618_v31, %v3381_v53  ;;  %v3472_v4 = vpop.f32.mrb[117].mxu0 }
 0x6b1   : > { %v3486_v35 = vadd.f32 %v3472_v4, %v3379_v37  ;;  %v10619_v5 = vpop.f32.mrb[118].mxu0  ;;  %v10867_v37 = vld [vmem:[%s14509_s9 + $0x1e8] ss:$16 sps:$4 sm:$0xff] (%p48_p0)  }
 0x6b2   : > { %v3475_v50 = vpop.f32.mrb[119].mxu0  ;;  %3901 = vmatpush1.bf16.msra.mxu1 (%p48_p0), %v10867_v37  ;;  %v10871_v4 = vld [vmem:[%s14509_s9 + $0x8] ss:$16 sps:$4 sm:$0xff] (%p48_p0)   ;;  %v10879_v5 = vld [vmem:[%s14509_s9 + $0x2c] ss:$16 sps:$4 sm:$0xff] (%p48_p0)  }
 0x6b3   : > { %v3487_v16 = vadd.f32 %v3475_v50, %v3380_v38  ;;  %v10873_v38 = vld [vmem:[%s14509_s9 + $0xc] ss:$16 sps:$4 sm:$0xff] (%p48_p0)   ;;  %v10874_v50 = vld [vmem:[%s14509_s9 + $0x20] ss:$16 sps:$4 sm:$0xff] (%p48_p0)  }
 0x6b4   :  { %4136 = vmatprep.subr.bf16.mxu1 (%p48_p0), %v10873_v38  ;;  %v10940_v37 = vld [vmem:[%s14509_s9 + $0x280] ss:$16 sps:$4 sm:$0xff] (%p48_p0)  }
 0x6bf   : > { %v10630_v20 = vpop.f32.mrb[120].mxu0 }
 0x6c0   : > { %v3584_v12 = vadd.f32 %v10630_v20, %v3488_v11  ;;  %v3568_v62 = vpop.f32.mrb[121].mxu0  ;;  %v10868_v11 = vld [vmem:[%s14509_s9] ss:$16 sps:$4 sm:$0xff] (%p48_p0)   ;;  %v10882_v20 = vld [vmem:[%s14509_s9 + $0x44] ss:$16 sps:$4 sm:$0xff] (%p48_p0)  }
 0x6c1   : > { %v3582_v33 = vadd.f32 %v3568_v62, %v3486_v35  ;;  %v10631_v42 = vpop.f32.mrb[122].mxu0  ;;  %v10876_v35 = vld [vmem:[%s14509_s9 + $0x24] ss:$16 sps:$4 sm:$0xff] (%p48_p0)   ;;  %v10883_v62 = vld [vmem:[%s14509_s9 + $0x48] ss:$16 sps:$4 sm:$0xff] (%p48_p0)  }
 0x6c2   : > { %v3594_v22 = vadd.f32 %v8938_v41, %v3584_v12  ;;  %v3571_v24 = vpop.f32.mrb[123].mxu0  ;;  %v10880_v12 = vld [vmem:[%s14509_s9 + $0x40] ss:$16 sps:$4 sm:$0xff] (%p48_p0)   ;;  %v10891_v42 = vld [vmem:[%s14509_s9 + $0x6c] ss:$16 sps:$4 sm:$0xff] (%p48_p0)  }
 0x6c3   : > { %v3592_v57 = vadd.f32 %v8938_v41, %v3582_v33  ;;  %v3583_v13 = vadd.f32 %v3571_v24, %v3487_v16  ;;  %50 = sbr.rel (!%p48_p0) target bundleno = 1 (0x1), region = 112  ;;  %v10877_v16 = vld [vmem:[%s14509_s9 + $0x28] ss:$16 sps:$4 sm:$0xff] (%p48_p0)   ;;  %v10888_v33 = vld [vmem:[%s14509_s9 + $0x64] ss:$16 sps:$4 sm:$0xff] (%p48_p0)  }
 0x6c4   : > { %v3597_v30 = vmax.f32 %v3594_v22, 0.0  ;;  %v10886_v22 = vld [vmem:[%s14509_s9 + $0x60] ss:$16 sps:$4 sm:$0xff] (%p48_p0)   ;;  %v10889_v24 = vld [vmem:[%s14509_s9 + $0x68] ss:$16 sps:$4 sm:$0xff] (%p48_p0)  }
 0x6c5   : > { %v3595_v45 = vmax.f32 %v3592_v57, 0.0  ;;  %v3593_v47 = vadd.f32 %v8938_v41, %v3583_v13  ;;  %v10885_v41 = vld [vmem:[%s14509_s9 + $0x4c] ss:$16 sps:$4 sm:$0xff] (%p48_p0)   ;;  %v10894_v57 = vld [vmem:[%s14509_s9 + $0x84] ss:$16 sps:$4 sm:$0xff] (%p48_p0)  }
 0x6c6   : > { %3602 = vst [vmem:[%s3599_s16 + $0x10] sm:$0xff] %v3597_v30  ;;  %v10897_v13 = vld [vmem:[%s14509_s9 + $0x8c] ss:$16 sps:$4 sm:$0xff] (%p48_p0)  }
 0x6c7   : > { %3600 = vst [vmem:[%s3599_s16] sm:$0xff] %v3595_v45  ;;  %v3596_v15 = vmax.f32 %v3593_v47, 0.0  ;;  %v10892_v45 = vld [vmem:[%s14509_s9 + $0x80] ss:$16 sps:$4 sm:$0xff] (%p48_p0)   ;;  %v10895_v47 = vld [vmem:[%s14509_s9 + $0x88] ss:$16 sps:$4 sm:$0xff] (%p48_p0)  }
 0x6c9   : > { %3601 = vst [vmem:[%s3599_s16 + $0x8] sm:$0xff] %v3596_v15  ;;  %v10900_v15 = vld [vmem:[%s14509_s9 + $0xa4] ss:$16 sps:$4 sm:$0xff] (%p48_p0)  }
 0x6d0   :  { %v3639_v39 = vld [vmem:[#allocation2 + $0x1] sm:$0x1]  ;;  %v3640_v14 = vld [vmem:[#allocation2 + $0x19] sm:$0x1]  ;;  %v3604_v30 = vld [vmem:[#allocation2 + $0x18] sm:$0x1] }
 0x6d1   :  { %v3641_v55 = vpack.c.bf16 %v3639_v39, %v3639_v39  ;;  %v3642_v6 = vpack.c.bf16 %v3640_v14, %v3640_v14  ;;  %v3606_v0 = vpack.c.bf16 %v3604_v30, %v3604_v30  ;;  %v3603_v56 = vld [vmem:[#allocation2] sm:$0x1]  ;;  %v10925_v39 = vld [vmem:[%s14509_s9 + $0x228] ss:$16 sps:$4 sm:$0xff]   ;;  %v10930_v14 = vld [vmem:[%s14509_s9 + $0x244] ss:$16 sps:$4 sm:$0xff]  }
 0x6d2   :  { %v3605_v23 = vpack.c.bf16 %v3603_v56, %v3603_v56  ;;  %v4178_v28 = vld [vmem:[#allocation2 + $0x1a] sm:$0x1]  ;;  %v10966_v30 = vld [vmem:[%s14509_s9 + $0x304] ss:$16 sps:$4 sm:$0xff]   ;;  %v10975_v56 = vld [vmem:[%s14509_s9 + $0x32c] ss:$16 sps:$4 sm:$0xff]  }
 0x6d3   :  { %v3678_v18 = vunpack.c.l.b16 %v3641_v55  ;;  %v3679_v27 = vunpack.c.l.b16 %v3642_v6  ;;  %v3930_v3 = vunpack.c.l.b16 %v3606_v0  ;;  %v10933_v55 = vld [vmem:[%s14509_s9 + $0x24c] ss:$16 sps:$4 sm:$0xff]   ;;  %v10928_v6 = vld [vmem:[%s14509_s9 + $0x240] ss:$16 sps:$4 sm:$0xff]   ;;  %v4180_v38 = vpack.c.bf16 %v4178_v28, %v4178_v28  ;;  %v10972_v0 = vld [vmem:[%s14509_s9 + $0x324] ss:$16 sps:$4 sm:$0xff]  }
 0x6d4   :  { %v3929_v48 = vunpack.c.l.b16 %v3605_v23  ;;  %v10981_v23 = vld [vmem:[%s14509_s9 + $0x34c] ss:$16 sps:$4 sm:$0xff]   ;;  %v11014_v28 = vld [vmem:[%s14509_s9 + $0x404] ss:$16 sps:$4 sm:$0xff]  }
 0x6d5   :  { %v3680_v53 = vrot.slane %v3679_v27, 7  ;;  %v3931_v10 = vrot.slane %v3930_v3, 7  ;;  %v10934_v27 = vld [vmem:[%s14509_s9 + $0x260] ss:$16 sps:$4 sm:$0xff]  }
 0x6d6   :  { %v10976_v3 = vld [vmem:[%s14509_s9 + $0x340] ss:$16 sps:$4 sm:$0xff]  }
 0x6d7   :  { %v3682_v40 = vsel %vm3681_vm1, %v3680_v53, %v3678_v18  ;;  %v3932_v54 = vsel %vm3681_vm1, %v3931_v10, %v3929_v48  ;;  %v10939_v18 = vld [vmem:[%s14509_s9 + $0x26c] ss:$16 sps:$4 sm:$0xff]   ;;  %v10985_v48 = vld [vmem:[%s14509_s9 + $0x368] ss:$16 sps:$4 sm:$0xff]   ;;  %v10990_v10 = vld [vmem:[%s14509_s9 + $0x384] ss:$16 sps:$4 sm:$0xff]  }
 0x6d8   :  { %v3683_v31 = vpack.c.b16 %v3682_v40, %v3682_v40  ;;  %v3933_v7 = vpack.c.b16 %v3932_v54, %v3932_v54  ;;  %v10945_v53 = vld [vmem:[%s14509_s9 + $0x28c] ss:$16 sps:$4 sm:$0xff]   ;;  %v10943_v40 = vld [vmem:[%s14509_s9 + $0x288] ss:$16 sps:$4 sm:$0xff]  }
 0x6d9   :  { %v10991_v54 = vld [vmem:[%s14509_s9 + $0x388] ss:$16 sps:$4 sm:$0xff]  }
 0x6da   :  { %3878 = vmatmul.mubr.bf16.vlgmr.msra.gmra.mrb[0].mxu0 %v3683_v31  ;;  %3919 = vmatmul.mubr.bf16.vlgmr.msra.gmra.mrb[0].mxu1 %v3683_v31  ;;  %v10951_v31 = vld [vmem:[%s14509_s9 + $0x2ac] ss:$16 sps:$4 sm:$0xff]  }
 0x6db   :  { %4096 = vmatpush1.bf16.msra.mxu0 %v10868_v11  ;;  %4137 = vmatpush1.bf16.msra.mxu1 %v10871_v4  ;;  %v4177_v11 = vld [vmem:[#allocation2 + $0x2] sm:$0x1] }
 0x6dc   :  { %4097 = vmatprep.subr.bf16.mxu0 %v10876_v35  ;;  %4138 = vmatprep.subr.bf16.mxu1 %v10879_v5  ;;  %v10946_v4 = vld [vmem:[%s14509_s9 + $0x2a0] ss:$16 sps:$4 sm:$0xff]   ;;  %v10949_v35 = vld [vmem:[%s14509_s9 + $0x2a8] ss:$16 sps:$4 sm:$0xff]   ;;  %v4179_v5 = vpack.c.bf16 %v4177_v11, %v4177_v11  ;;  %v11023_v11 = vld [vmem:[%s14509_s9 + $0x42c] ss:$16 sps:$4 sm:$0xff]  }
 0x6dd   :  { %4127 = vmatprep.mubr.bf16.mxu0 %v11654_v58  ;;  %4168 = vmatprep.mubr.bf16.mxu1 %v11654_v58 }
 0x6df   :  { %4098 = vmatpush1.bf16.msra.mxu0 %v10874_v50  ;;  %4139 = vmatpush1.bf16.msra.mxu1 %v10877_v16  ;;  %v4217_v50 = vunpack.c.l.b16 %v4180_v38  ;;  %v10954_v16 = vld [vmem:[%s14509_s9 + $0x2c4] ss:$16 sps:$4 sm:$0xff]   ;;  %v11015_v38 = vld [vmem:[%s14509_s9 + $0x408] ss:$16 sps:$4 sm:$0xff]  }
 0x6e0   :  { %4099 = vmatprep.subr.bf16.mxu0 %v10882_v20  ;;  %4140 = vmatprep.subr.bf16.mxu1 %v10885_v41  ;;  %v10957_v20 = vld [vmem:[%s14509_s9 + $0x2cc] ss:$16 sps:$4 sm:$0xff]   ;;  %v10952_v41 = vld [vmem:[%s14509_s9 + $0x2c0] ss:$16 sps:$4 sm:$0xff]  }
 0x6e3   :  { %4100 = vmatpush1.bf16.msra.mxu0 %v10880_v12  ;;  %4141 = vmatpush1.bf16.msra.mxu1 %v10883_v62  ;;  %v10955_v12 = vld [vmem:[%s14509_s9 + $0x2c8] ss:$16 sps:$4 sm:$0xff]   ;;  %v10960_v62 = vld [vmem:[%s14509_s9 + $0x2e4] ss:$16 sps:$4 sm:$0xff]  }
 0x6e4   :  { %4101 = vmatprep.subr.bf16.mxu0 %v10888_v33  ;;  %4142 = vmatprep.subr.bf16.mxu1 %v10891_v42  ;;  %v4216_v33 = vunpack.c.l.b16 %v4179_v5  ;;  %v4218_v42 = vrot.slane %v4217_v50, 7  ;;  %v11026_v5 = vld [vmem:[%s14509_s9 + $0x444] ss:$16 sps:$4 sm:$0xff]   ;;  %v11029_v50 = vld [vmem:[%s14509_s9 + $0x44c] ss:$16 sps:$4 sm:$0xff]  }
 0x6e7   :  { %4102 = vmatpush1.bf16.msra.mxu0 %v10886_v22  ;;  %4143 = vmatpush1.bf16.msra.mxu1 %v10889_v24  ;;  %v10963_v22 = vld [vmem:[%s14509_s9 + $0x2ec] ss:$16 sps:$4 sm:$0xff]   ;;  %v10958_v24 = vld [vmem:[%s14509_s9 + $0x2e0] ss:$16 sps:$4 sm:$0xff]  }
 0x6e8   :  { %4103 = vmatprep.subr.bf16.mxu0 %v10894_v57  ;;  %4144 = vmatprep.subr.bf16.mxu1 %v10897_v13  ;;  %v10961_v57 = vld [vmem:[%s14509_s9 + $0x2e8] ss:$16 sps:$4 sm:$0xff]   ;;  %v4219_v13 = vsel %vm3681_vm1, %v4218_v42, %v4216_v33  ;;  %v11038_v42 = vld [vmem:[%s14509_s9 + $0x484] ss:$16 sps:$4 sm:$0xff]  }
 0x6e9   :  { %v11033_v33 = vld [vmem:[%s14509_s9 + $0x468] ss:$16 sps:$4 sm:$0xff]  }
 0x6eb   :  { %4104 = vmatpush1.bf16.msra.mxu0 %v10892_v45  ;;  %4145 = vmatpush1.bf16.msra.mxu1 %v10895_v47  ;;  %v10969_v45 = vld [vmem:[%s14509_s9 + $0x30c] ss:$16 sps:$4 sm:$0xff]   ;;  %v4220_v47 = vpack.c.b16 %v4219_v13, %v4219_v13  ;;  %v11039_v13 = vld [vmem:[%s14509_s9 + $0x488] ss:$16 sps:$4 sm:$0xff]  }
 0x6ec   :  { %4105 = vmatprep.subr.bf16.mxu0 %v10900_v15  ;;  %4146 = vmatprep.subr.bf16.mxu1 %v10903_v8  ;;  %v10964_v15 = vld [vmem:[%s14509_s9 + $0x300] ss:$16 sps:$4 sm:$0xff]   ;;  %v10967_v8 = vld [vmem:[%s14509_s9 + $0x308] ss:$16 sps:$4 sm:$0xff]  }
 0x6ef   :  { %4106 = vmatpush1.bf16.msra.mxu0 %v10898_v21  ;;  %4147 = vmatpush1.bf16.msra.mxu1 %v10901_v25  ;;  %v10970_v21 = vld [vmem:[%s14509_s9 + $0x320] ss:$16 sps:$4 sm:$0xff]   ;;  %v10973_v25 = vld [vmem:[%s14509_s9 + $0x328] ss:$16 sps:$4 sm:$0xff]  }
 0x6f0   :  { %4107 = vmatprep.subr.bf16.mxu0 %v10906_v36  ;;  %4148 = vmatprep.subr.bf16.mxu1 %v10909_v51  ;;  %v10978_v36 = vld [vmem:[%s14509_s9 + $0x344] ss:$16 sps:$4 sm:$0xff]   ;;  %v10979_v51 = vld [vmem:[%s14509_s9 + $0x348] ss:$16 sps:$4 sm:$0xff]  }
 0x6f3   :  { %4108 = vmatpush1.bf16.msra.mxu0 %v10904_v1  ;;  %4149 = vmatpush1.bf16.msra.mxu1 %v10907_v44  ;;  %v10984_v1 = vld [vmem:[%s14509_s9 + $0x364] ss:$16 sps:$4 sm:$0xff]   ;;  %v10987_v44 = vld [vmem:[%s14509_s9 + $0x36c] ss:$16 sps:$4 sm:$0xff]  }
 0x6f4   :  { %4109 = vmatprep.subr.bf16.mxu0 %v10912_v34  ;;  %4150 = vmatprep.subr.bf16.mxu1 %v10915_v19  ;;  %v10982_v34 = vld [vmem:[%s14509_s9 + $0x360] ss:$16 sps:$4 sm:$0xff]   ;;  %v10993_v19 = vld [vmem:[%s14509_s9 + $0x38c] ss:$16 sps:$4 sm:$0xff]  }
 0x6f7   :  { %4110 = vmatpush1.bf16.msra.mxu0 %v10910_v26  ;;  %4151 = vmatpush1.bf16.msra.mxu1 %v10913_v49  ;;  %v4469_v26 = vld [vmem:[#allocation2 + $0x1b] sm:$0x1]  ;;  %v10988_v49 = vld [vmem:[%s14509_s9 + $0x380] ss:$16 sps:$4 sm:$0xff]  }
 0x6f8   :  { %4382 = vmatprep.subr.bf16.mxu0 %v10918_v60  ;;  %4423 = vmatprep.subr.bf16.mxu1 %v10921_v52  ;;  %v10996_v60 = vld [vmem:[%s14509_s9 + $0x3a4] ss:$16 sps:$4 sm:$0xff]   ;;  %v4471_v52 = vpack.c.bf16 %v4469_v26, %v4469_v26 }
 0x6f9   :  { %v11062_v26 = vld [vmem:[%s14509_s9 + $0x504] ss:$16 sps:$4 sm:$0xff]  }
 0x6fa   :  { %4128 = vmatmul.mubr.bf16.vlgmr.msra.gmra.mrb[4].mxu0 %v3933_v7  ;;  %4169 = vmatmul.mubr.bf16.vlgmr.msra.gmra.mrb[4].mxu1 %v3933_v7  ;;  %v10999_v7 = vld [vmem:[%s14509_s9 + $0x3ac] ss:$16 sps:$4 sm:$0xff]  }
 0x6fb   :  { %4383 = vmatpush1.bf16.msra.mxu0 %v10916_v17  ;;  %4424 = vmatpush1.bf16.msra.mxu1 %v10919_v59  ;;  %v4468_v17 = vld [vmem:[#allocation2 + $0x3] sm:$0x1] }
 0x6fc   :  { %4384 = vmatprep.subr.bf16.mxu0 %v10924_v63  ;;  %4425 = vmatprep.subr.bf16.mxu1 %v10927_v61  ;;  %v10994_v59 = vld [vmem:[%s14509_s9 + $0x3a0] ss:$16 sps:$4 sm:$0xff]   ;;  %v10997_v63 = vld [vmem:[%s14509_s9 + $0x3a8] ss:$16 sps:$4 sm:$0xff]   ;;  %v4470_v61 = vpack.c.bf16 %v4468_v17, %v4468_v17  ;;  %v11071_v17 = vld [vmem:[%s14509_s9 + $0x52c] ss:$16 sps:$4 sm:$0xff]  }
 0x6fd   :  { %4414 = vmatprep.mubr.bf16.mxu0 %v11654_v58  ;;  %4455 = vmatprep.mubr.bf16.mxu1 %v11654_v58 }
 0x6ff   :  { %4385 = vmatpush1.bf16.msra.mxu0 %v10922_v29  ;;  %4426 = vmatpush1.bf16.msra.mxu1 %v10925_v39  ;;  %v4508_v29 = vunpack.c.l.b16 %v4471_v52  ;;  %v11002_v39 = vld [vmem:[%s14509_s9 + $0x3c4] ss:$16 sps:$4 sm:$0xff]   ;;  %v11063_v52 = vld [vmem:[%s14509_s9 + $0x508] ss:$16 sps:$4 sm:$0xff]  }
 0x700   :  { %4386 = vmatprep.subr.bf16.mxu0 %v10930_v14  ;;  %4427 = vmatprep.subr.bf16.mxu1 %v10933_v55  ;;  %v11005_v14 = vld [vmem:[%s14509_s9 + $0x3cc] ss:$16 sps:$4 sm:$0xff]   ;;  %v11000_v55 = vld [vmem:[%s14509_s9 + $0x3c0] ss:$16 sps:$4 sm:$0xff]  }
 0x703   :  { %4387 = vmatpush1.bf16.msra.mxu0 %v10928_v6  ;;  %4428 = vmatpush1.bf16.msra.mxu1 %v10931_v9  ;;  %v11003_v6 = vld [vmem:[%s14509_s9 + $0x3c8] ss:$16 sps:$4 sm:$0xff]   ;;  %v4507_v9 = vunpack.c.l.b16 %v4470_v61  ;;  %v11074_v61 = vld [vmem:[%s14509_s9 + $0x544] ss:$16 sps:$4 sm:$0xff]  }
 0x704   :  { %4388 = vmatprep.subr.bf16.mxu0 %v10936_v2  ;;  %4429 = vmatprep.subr.bf16.mxu1 %v10939_v18  ;;  %v4509_v2 = vrot.slane %v4508_v29, 7  ;;  %v11008_v18 = vld [vmem:[%s14509_s9 + $0x3e4] ss:$16 sps:$4 sm:$0xff]   ;;  %v11077_v29 = vld [vmem:[%s14509_s9 + $0x54c] ss:$16 sps:$4 sm:$0xff]  }
 0x707   :  { %4389 = vmatpush1.bf16.msra.mxu0 %v10934_v27  ;;  %4430 = vmatpush1.bf16.msra.mxu1 %v10937_v32  ;;  %v11011_v27 = vld [vmem:[%s14509_s9 + $0x3ec] ss:$16 sps:$4 sm:$0xff]   ;;  %v11006_v32 = vld [vmem:[%s14509_s9 + $0x3e0] ss:$16 sps:$4 sm:$0xff]  }
 0x708   :  { %4390 = vmatprep.subr.bf16.mxu0 %v10942_v43  ;;  %4431 = vmatprep.subr.bf16.mxu1 %v10945_v53  ;;  %v11009_v43 = vld [vmem:[%s14509_s9 + $0x3e8] ss:$16 sps:$4 sm:$0xff]   ;;  %v4510_v53 = vsel %vm3681_vm1, %v4509_v2, %v4507_v9  ;;  %v11078_v9 = vld [vmem:[%s14509_s9 + $0x560] ss:$16 sps:$4 sm:$0xff]  }
 0x709   :  { %v11081_v2 = vld [vmem:[%s14509_s9 + $0x568] ss:$16 sps:$4 sm:$0xff]  }
 0x70b   :  { %4391 = vmatpush1.bf16.msra.mxu0 %v10940_v37  ;;  %4432 = vmatpush1.bf16.msra.mxu1 %v10943_v40  ;;  %v11017_v37 = vld [vmem:[%s14509_s9 + $0x40c] ss:$16 sps:$4 sm:$0xff]   ;;  %v4511_v40 = vpack.c.b16 %v4510_v53, %v4510_v53  ;;  %v11087_v53 = vld [vmem:[%s14509_s9 + $0x588] ss:$16 sps:$4 sm:$0xff]  }
 0x70c   :  { %4392 = vmatprep.subr.bf16.mxu0 %v10948_v46  ;;  %4433 = vmatprep.subr.bf16.mxu1 %v10951_v31  ;;  %v11012_v46 = vld [vmem:[%s14509_s9 + $0x400] ss:$16 sps:$4 sm:$0xff]   ;;  %v11020_v31 = vld [vmem:[%s14509_s9 + $0x424] ss:$16 sps:$4 sm:$0xff]  }
 0x70f   :  { %4393 = vmatpush1.bf16.msra.mxu0 %v10946_v4  ;;  %4434 = vmatpush1.bf16.msra.mxu1 %v10949_v35  ;;  %v11018_v4 = vld [vmem:[%s14509_s9 + $0x420] ss:$16 sps:$4 sm:$0xff]   ;;  %v11021_v35 = vld [vmem:[%s14509_s9 + $0x428] ss:$16 sps:$4 sm:$0xff]  }
 0x710   :  { %4394 = vmatprep.subr.bf16.mxu0 %v10954_v16  ;;  %4435 = vmatprep.subr.bf16.mxu1 %v10957_v20  ;;  %v11024_v16 = vld [vmem:[%s14509_s9 + $0x440] ss:$16 sps:$4 sm:$0xff]   ;;  %v11027_v20 = vld [vmem:[%s14509_s9 + $0x448] ss:$16 sps:$4 sm:$0xff]  }
 0x713   :  { %4395 = vmatpush1.bf16.msra.mxu0 %v10952_v41  ;;  %4436 = vmatpush1.bf16.msra.mxu1 %v10955_v12  ;;  %v11032_v41 = vld [vmem:[%s14509_s9 + $0x464] ss:$16 sps:$4 sm:$0xff]   ;;  %v11035_v12 = vld [vmem:[%s14509_s9 + $0x46c] ss:$16 sps:$4 sm:$0xff]  }
 0x714   :  { %4396 = vmatprep.subr.bf16.mxu0 %v10960_v62  ;;  %4437 = vmatprep.subr.bf16.mxu1 %v10963_v22  ;;  %v11030_v62 = vld [vmem:[%s14509_s9 + $0x460] ss:$16 sps:$4 sm:$0xff]   ;;  %v11041_v22 = vld [vmem:[%s14509_s9 + $0x48c] ss:$16 sps:$4 sm:$0xff]  }
 0x717   :  { %4397 = vmatpush1.bf16.msra.mxu0 %v10958_v24  ;;  %4438 = vmatpush1.bf16.msra.mxu1 %v10961_v57  ;;  %v4760_v24 = vld [vmem:[#allocation2 + $0x1e] sm:$0x1]  ;;  %v11036_v57 = vld [vmem:[%s14509_s9 + $0x480] ss:$16 sps:$4 sm:$0xff]  }
 0x718   :  { %4673 = vmatprep.subr.bf16.mxu0 %v10966_v30  ;;  %4714 = vmatprep.subr.bf16.mxu1 %v10969_v45  ;;  %v11044_v30 = vld [vmem:[%s14509_s9 + $0x4a4] ss:$16 sps:$4 sm:$0xff]   ;;  %v11047_v45 = vld [vmem:[%s14509_s9 + $0x4ac] ss:$16 sps:$4 sm:$0xff]  }
 0x71a   :  { %4415 = vmatmul.mubr.bf16.vlgmr.msra.gmra.mrb[8].mxu0 %v4220_v47  ;;  %4456 = vmatmul.mubr.bf16.vlgmr.msra.gmra.mrb[8].mxu1 %v4220_v47  ;;  %v4762_v47 = vpack.c.bf16 %v4760_v24, %v4760_v24  ;;  %v11110_v24 = vld [vmem:[%s14509_s9 + $0x604] ss:$16 sps:$4 sm:$0xff]  }
 0x71b   :  { %4674 = vmatpush1.bf16.msra.mxu0 %v10964_v15  ;;  %4715 = vmatpush1.bf16.msra.mxu1 %v10967_v8  ;;  %v4759_v15 = vld [vmem:[#allocation2 + $0x6] sm:$0x1]  ;;  %v11042_v8 = vld [vmem:[%s14509_s9 + $0x4a0] ss:$16 sps:$4 sm:$0xff]  }
 0x71c   :  { %4675 = vmatprep.subr.bf16.mxu0 %v10972_v0  ;;  %4716 = vmatprep.subr.bf16.mxu1 %v10975_v56  ;;  %v11045_v0 = vld [vmem:[%s14509_s9 + $0x4a8] ss:$16 sps:$4 sm:$0xff]   ;;  %v11050_v56 = vld [vmem:[%s14509_s9 + $0x4c4] ss:$16 sps:$4 sm:$0xff]  }
 0x71d   :  { %4705 = vmatprep.mubr.bf16.mxu0 %v11654_v58  ;;  %4746 = vmatprep.mubr.bf16.mxu1 %v11654_v58 }
 0x71f   :  { %4676 = vmatpush1.bf16.msra.mxu0 %v10970_v21  ;;  %4717 = vmatpush1.bf16.msra.mxu1 %v10973_v25  ;;  %v4761_v21 = vpack.c.bf16 %v4759_v15, %v4759_v15  ;;  %v4799_v25 = vunpack.c.l.b16 %v4762_v47  ;;  %v11116_v47 = vld [vmem:[%s14509_s9 + $0x624] ss:$16 sps:$4 sm:$0xff]   ;;  %v11119_v15 = vld [vmem:[%s14509_s9 + $0x62c] ss:$16 sps:$4 sm:$0xff]  }
 0x720   :  { %4677 = vmatprep.subr.bf16.mxu0 %v10978_v36  ;;  %4718 = vmatprep.subr.bf16.mxu1 %v10981_v23  ;;  %v11053_v36 = vld [vmem:[%s14509_s9 + $0x4cc] ss:$16 sps:$4 sm:$0xff]   ;;  %v11048_v23 = vld [vmem:[%s14509_s9 + $0x4c0] ss:$16 sps:$4 sm:$0xff]  }
 0x723   :  { %4678 = vmatpush1.bf16.msra.mxu0 %v10976_v3  ;;  %4719 = vmatpush1.bf16.msra.mxu1 %v10979_v51  ;;  %v11051_v3 = vld [vmem:[%s14509_s9 + $0x4c8] ss:$16 sps:$4 sm:$0xff]   ;;  %v4798_v51 = vunpack.c.l.b16 %v4761_v21  ;;  %v11125_v21 = vld [vmem:[%s14509_s9 + $0x64c] ss:$16 sps:$4 sm:$0xff]  }
 0x724   :  { %4679 = vmatprep.subr.bf16.mxu0 %v10984_v1  ;;  %4720 = vmatprep.subr.bf16.mxu1 %v10987_v44  ;;  %v4800_v1 = vrot.slane %v4799_v25, 7  ;;  %v11056_v44 = vld [vmem:[%s14509_s9 + $0x4e4] ss:$16 sps:$4 sm:$0xff]   ;;  %v11120_v25 = vld [vmem:[%s14509_s9 + $0x640] ss:$16 sps:$4 sm:$0xff]  }
 0x727   :  { %4680 = vmatpush1.bf16.msra.mxu0 %v10982_v34  ;;  %4721 = vmatpush1.bf16.msra.mxu1 %v10985_v48  ;;  %v11059_v34 = vld [vmem:[%s14509_s9 + $0x4ec] ss:$16 sps:$4 sm:$0xff]   ;;  %v11054_v48 = vld [vmem:[%s14509_s9 + $0x4e0] ss:$16 sps:$4 sm:$0xff]  }
 0x728   :  { %4681 = vmatprep.subr.bf16.mxu0 %v10990_v10  ;;  %4722 = vmatprep.subr.bf16.mxu1 %v10993_v19  ;;  %v11057_v10 = vld [vmem:[%s14509_s9 + $0x4e8] ss:$16 sps:$4 sm:$0xff]   ;;  %v4801_v19 = vsel %vm3681_vm1, %v4800_v1, %v4798_v51  ;;  %v11126_v51 = vld [vmem:[%s14509_s9 + $0x660] ss:$16 sps:$4 sm:$0xff]  }
 0x729   :  { %v11129_v1 = vld [vmem:[%s14509_s9 + $0x668] ss:$16 sps:$4 sm:$0xff]  }
 0x72b   :  { %4682 = vmatpush1.bf16.msra.mxu0 %v10988_v49  ;;  %4723 = vmatpush1.bf16.msra.mxu1 %v10991_v54  ;;  %v11065_v49 = vld [vmem:[%s14509_s9 + $0x50c] ss:$16 sps:$4 sm:$0xff]   ;;  %v4802_v54 = vpack.c.b16 %v4801_v19, %v4801_v19  ;;  %v11135_v19 = vld [vmem:[%s14509_s9 + $0x688] ss:$16 sps:$4 sm:$0xff]  }
 0x72c   :  { %4683 = vmatprep.subr.bf16.mxu0 %v10996_v60  ;;  %4724 = vmatprep.subr.bf16.mxu1 %v10999_v7  ;;  %v11060_v60 = vld [vmem:[%s14509_s9 + $0x500] ss:$16 sps:$4 sm:$0xff]   ;;  %v11068_v7 = vld [vmem:[%s14509_s9 + $0x524] ss:$16 sps:$4 sm:$0xff]  }
 0x72f   :  { %4684 = vmatpush1.bf16.msra.mxu0 %v10994_v59  ;;  %4725 = vmatpush1.bf16.msra.mxu1 %v10997_v63  ;;  %v11066_v59 = vld [vmem:[%s14509_s9 + $0x520] ss:$16 sps:$4 sm:$0xff]   ;;  %v11069_v63 = vld [vmem:[%s14509_s9 + $0x528] ss:$16 sps:$4 sm:$0xff]  }
 0x730   :  { %4685 = vmatprep.subr.bf16.mxu0 %v11002_v39  ;;  %4726 = vmatprep.subr.bf16.mxu1 %v11005_v14  ;;  %v11072_v39 = vld [vmem:[%s14509_s9 + $0x540] ss:$16 sps:$4 sm:$0xff]   ;;  %v11075_v14 = vld [vmem:[%s14509_s9 + $0x548] ss:$16 sps:$4 sm:$0xff]  }
 0x733   :  { %4686 = vmatpush1.bf16.msra.mxu0 %v11000_v55  ;;  %4727 = vmatpush1.bf16.msra.mxu1 %v11003_v6  ;;  %v11080_v55 = vld [vmem:[%s14509_s9 + $0x564] ss:$16 sps:$4 sm:$0xff]   ;;  %v11083_v6 = vld [vmem:[%s14509_s9 + $0x56c] ss:$16 sps:$4 sm:$0xff]  }
 0x734   :  { %4687 = vmatprep.subr.bf16.mxu0 %v11008_v18  ;;  %4728 = vmatprep.subr.bf16.mxu1 %v11011_v27  ;;  %v11086_v18 = vld [vmem:[%s14509_s9 + $0x584] ss:$16 sps:$4 sm:$0xff]   ;;  %v11089_v27 = vld [vmem:[%s14509_s9 + $0x58c] ss:$16 sps:$4 sm:$0xff]  }
 0x737   :  { %4688 = vmatpush1.bf16.msra.mxu0 %v11006_v32  ;;  %4729 = vmatpush1.bf16.msra.mxu1 %v11009_v43  ;;  %v5051_v32 = vld [vmem:[#allocation2 + $0x1f] sm:$0x1]  ;;  %v11084_v43 = vld [vmem:[%s14509_s9 + $0x580] ss:$16 sps:$4 sm:$0xff]  }
 0x738   :  { %4964 = vmatprep.subr.bf16.mxu0 %v11014_v28  ;;  %5005 = vmatprep.subr.bf16.mxu1 %v11017_v37  ;;  %v11092_v28 = vld [vmem:[%s14509_s9 + $0x5a4] ss:$16 sps:$4 sm:$0xff]   ;;  %v11095_v37 = vld [vmem:[%s14509_s9 + $0x5ac] ss:$16 sps:$4 sm:$0xff]  }
 0x73a   :  { %4706 = vmatmul.mubr.bf16.vlgmr.msra.gmra.mrb[12].mxu0 %v4511_v40  ;;  %4747 = vmatmul.mubr.bf16.vlgmr.msra.gmra.mrb[12].mxu1 %v4511_v40  ;;  %v5053_v40 = vpack.c.bf16 %v5051_v32, %v5051_v32  ;;  %v11158_v32 = vld [vmem:[%s14509_s9 + $0x704] ss:$16 sps:$4 sm:$0xff]  }
 0x73b   :  { %4965 = vmatpush1.bf16.msra.mxu0 %v11012_v46  ;;  %5006 = vmatpush1.bf16.msra.mxu1 %v11015_v38  ;;  %v5050_v46 = vld [vmem:[#allocation2 + $0x7] sm:$0x1]  ;;  %v11090_v38 = vld [vmem:[%s14509_s9 + $0x5a0] ss:$16 sps:$4 sm:$0xff]  }
 0x73c   :  { %4966 = vmatprep.subr.bf16.mxu0 %v11020_v31  ;;  %5007 = vmatprep.subr.bf16.mxu1 %v11023_v11  ;;  %v11093_v31 = vld [vmem:[%s14509_s9 + $0x5a8] ss:$16 sps:$4 sm:$0xff]   ;;  %v11098_v11 = vld [vmem:[%s14509_s9 + $0x5c4] ss:$16 sps:$4 sm:$0xff]  }
 0x73d   :  { %4996 = vmatprep.mubr.bf16.mxu0 %v11654_v58  ;;  %5037 = vmatprep.mubr.bf16.mxu1 %v11654_v58 }
 0x73f   :  { %4967 = vmatpush1.bf16.msra.mxu0 %v11018_v4  ;;  %5008 = vmatpush1.bf16.msra.mxu1 %v11021_v35  ;;  %v5052_v4 = vpack.c.bf16 %v5050_v46, %v5050_v46  ;;  %v5090_v35 = vunpack.c.l.b16 %v5053_v40  ;;  %v11164_v40 = vld [vmem:[%s14509_s9 + $0x724] ss:$16 sps:$4 sm:$0xff]   ;;  %v11167_v46 = vld [vmem:[%s14509_s9 + $0x72c] ss:$16 sps:$4 sm:$0xff]  }
 0x740   :  { %4968 = vmatprep.subr.bf16.mxu0 %v11026_v5  ;;  %5009 = vmatprep.subr.bf16.mxu1 %v11029_v50  ;;  %v11101_v5 = vld [vmem:[%s14509_s9 + $0x5cc] ss:$16 sps:$4 sm:$0xff]   ;;  %v11096_v50 = vld [vmem:[%s14509_s9 + $0x5c0] ss:$16 sps:$4 sm:$0xff]  }
 0x743   :  { %4969 = vmatpush1.bf16.msra.mxu0 %v11024_v16  ;;  %5010 = vmatpush1.bf16.msra.mxu1 %v11027_v20  ;;  %v11099_v16 = vld [vmem:[%s14509_s9 + $0x5c8] ss:$16 sps:$4 sm:$0xff]   ;;  %v11104_v20 = vld [vmem:[%s14509_s9 + $0x5e4] ss:$16 sps:$4 sm:$0xff]  }
 0x744   :  { %4970 = vmatprep.subr.bf16.mxu0 %v11032_v41  ;;  %5011 = vmatprep.subr.bf16.mxu1 %v11035_v12  ;;  %v5089_v41 = vunpack.c.l.b16 %v5052_v4  ;;  %v5091_v12 = vrot.slane %v5090_v35, 7  ;;  %v11173_v4 = vld [vmem:[%s14509_s9 + $0x74c] ss:$16 sps:$4 sm:$0xff]   ;;  %v11168_v35 = vld [vmem:[%s14509_s9 + $0x740] ss:$16 sps:$4 sm:$0xff]  }
 0x747   :  { %4971 = vmatpush1.bf16.msra.mxu0 %v11030_v62  ;;  %5012 = vmatpush1.bf16.msra.mxu1 %v11033_v33  ;;  %v11107_v62 = vld [vmem:[%s14509_s9 + $0x5ec] ss:$16 sps:$4 sm:$0xff]   ;;  %v11102_v33 = vld [vmem:[%s14509_s9 + $0x5e0] ss:$16 sps:$4 sm:$0xff]  }
 0x748   :  { %4972 = vmatprep.subr.bf16.mxu0 %v11038_v42  ;;  %5013 = vmatprep.subr.bf16.mxu1 %v11041_v22  ;;  %v11105_v42 = vld [vmem:[%s14509_s9 + $0x5e8] ss:$16 sps:$4 sm:$0xff]   ;;  %v5092_v22 = vsel %vm3681_vm1, %v5091_v12, %v5089_v41  ;;  %v11182_v12 = vld [vmem:[%s14509_s9 + $0x784] ss:$16 sps:$4 sm:$0xff]  }
 0x749   :  { %v11177_v41 = vld [vmem:[%s14509_s9 + $0x768] ss:$16 sps:$4 sm:$0xff]  }
 0x74b   :  { %4973 = vmatpush1.bf16.msra.mxu0 %v11036_v57  ;;  %5014 = vmatpush1.bf16.msra.mxu1 %v11039_v13  ;;  %v11113_v57 = vld [vmem:[%s14509_s9 + $0x60c] ss:$16 sps:$4 sm:$0xff]   ;;  %v5093_v13 = vpack.c.b16 %v5092_v22, %v5092_v22  ;;  %v11183_v22 = vld [vmem:[%s14509_s9 + $0x788] ss:$16 sps:$4 sm:$0xff]  }
 0x74c   :  { %4974 = vmatprep.subr.bf16.mxu0 %v11044_v30  ;;  %5015 = vmatprep.subr.bf16.mxu1 %v11047_v45  ;;  %v11108_v30 = vld [vmem:[%s14509_s9 + $0x600] ss:$16 sps:$4 sm:$0xff]   ;;  %v11111_v45 = vld [vmem:[%s14509_s9 + $0x608] ss:$16 sps:$4 sm:$0xff]  }
 0x74f   :  { %4975 = vmatpush1.bf16.msra.mxu0 %v11042_v8  ;;  %5016 = vmatpush1.bf16.msra.mxu1 %v11045_v0  ;;  %v11114_v8 = vld [vmem:[%s14509_s9 + $0x620] ss:$16 sps:$4 sm:$0xff]   ;;  %v11117_v0 = vld [vmem:[%s14509_s9 + $0x628] ss:$16 sps:$4 sm:$0xff]  }
 0x750   :  { %4976 = vmatprep.subr.bf16.mxu0 %v11050_v56  ;;  %5017 = vmatprep.subr.bf16.mxu1 %v11053_v36  ;;  %v11122_v56 = vld [vmem:[%s14509_s9 + $0x644] ss:$16 sps:$4 sm:$0xff]   ;;  %v11123_v36 = vld [vmem:[%s14509_s9 + $0x648] ss:$16 sps:$4 sm:$0xff]  }
 0x753   :  { %4977 = vmatpush1.bf16.msra.mxu0 %v11048_v23  ;;  %5018 = vmatpush1.bf16.msra.mxu1 %v11051_v3  ;;  %v11128_v23 = vld [vmem:[%s14509_s9 + $0x664] ss:$16 sps:$4 sm:$0xff]   ;;  %v11131_v3 = vld [vmem:[%s14509_s9 + $0x66c] ss:$16 sps:$4 sm:$0xff]  }
 0x754   :  { %4978 = vmatprep.subr.bf16.mxu0 %v11056_v44  ;;  %5019 = vmatprep.subr.bf16.mxu1 %v11059_v34  ;;  %v11134_v44 = vld [vmem:[%s14509_s9 + $0x684] ss:$16 sps:$4 sm:$0xff]   ;;  %v11137_v34 = vld [vmem:[%s14509_s9 + $0x68c] ss:$16 sps:$4 sm:$0xff]  }
 0x757   :  { %4979 = vmatpush1.bf16.msra.mxu0 %v11054_v48  ;;  %5020 = vmatpush1.bf16.msra.mxu1 %v11057_v10  ;;  %v5342_v48 = vld [vmem:[#allocation2 + $0x20] sm:$0x1] }
 0x758   :  { %5255 = vmatprep.subr.bf16.mxu0 %v11062_v26  ;;  %5296 = vmatprep.subr.bf16.mxu1 %v11065_v49  ;;  %v11132_v10 = vld [vmem:[%s14509_s9 + $0x680] ss:$16 sps:$4 sm:$0xff]   ;;  %v11140_v26 = vld [vmem:[%s14509_s9 + $0x6a4] ss:$16 sps:$4 sm:$0xff]   ;;  %v5344_v49 = vpack.c.bf16 %v5342_v48, %v5342_v48 }
 0x75a   :  { %4997 = vmatmul.mubr.bf16.vlgmr.msra.gmra.mrb[16].mxu0 %v4802_v54  ;;  %5038 = vmatmul.mubr.bf16.vlgmr.msra.gmra.mrb[16].mxu1 %v4802_v54  ;;  %v11143_v54 = vld [vmem:[%s14509_s9 + $0x6ac] ss:$16 sps:$4 sm:$0xff]  }
 0x75b   :  { %5256 = vmatpush1.bf16.msra.mxu0 %v11060_v60  ;;  %5297 = vmatpush1.bf16.msra.mxu1 %v11063_v52  ;;  %v5341_v60 = vld [vmem:[#allocation2 + $0x8] sm:$0x1]  ;;  %v11138_v52 = vld [vmem:[%s14509_s9 + $0x6a0] ss:$16 sps:$4 sm:$0xff]  }
 0x75c   :  { %5257 = vmatprep.subr.bf16.mxu0 %v11068_v7  ;;  %5298 = vmatprep.subr.bf16.mxu1 %v11071_v17  ;;  %v11141_v7 = vld [vmem:[%s14509_s9 + $0x6a8] ss:$16 sps:$4 sm:$0xff]   ;;  %v5343_v17 = vpack.c.bf16 %v5341_v60, %v5341_v60 }
 0x75d   :  { %5287 = vmatprep.mubr.bf16.mxu0 %v11654_v58  ;;  %5328 = vmatprep.mubr.bf16.mxu1 %v11654_v58  ;;  %v11201_v60 = vld [vmem:[%s14509_s9 + $0x7e8] ss:$16 sps:$4 sm:$0xff]  }
 0x75f   :  { %5258 = vmatpush1.bf16.msra.mxu0 %v11066_v59  ;;  %5299 = vmatpush1.bf16.msra.mxu1 %v11069_v63  ;;  %v5381_v59 = vunpack.c.l.b16 %v5344_v49  ;;  %v11146_v63 = vld [vmem:[%s14509_s9 + $0x6c4] ss:$16 sps:$4 sm:$0xff]   ;;  %v11203_v49 = vld [vmem:[%s14509_s9 + $0x7ec] ss:$16 sps:$4 sm:$0xff]  }
 0x760   :  { %5259 = vmatprep.subr.bf16.mxu0 %v11074_v61  ;;  %5300 = vmatprep.subr.bf16.mxu1 %v11077_v29  ;;  %v11149_v61 = vld [vmem:[%s14509_s9 + $0x6cc] ss:$16 sps:$4 sm:$0xff]   ;;  %v11144_v29 = vld [vmem:[%s14509_s9 + $0x6c0] ss:$16 sps:$4 sm:$0xff]  }
 0x763   :  { %5260 = vmatpush1.bf16.msra.mxu0 %v11072_v39  ;;  %5301 = vmatpush1.bf16.msra.mxu1 %v11075_v14  ;;  %v11147_v39 = vld [vmem:[%s14509_s9 + $0x6c8] ss:$16 sps:$4 sm:$0xff]   ;;  %v5380_v14 = vunpack.c.l.b16 %v5343_v17  ;;  %v11209_v17 = vld [vmem:[%s14509_s9 + $0x80c] ss:$16 sps:$4 sm:$0xff]  }
 0x764   :  { %5261 = vmatprep.subr.bf16.mxu0 %v11080_v55  ;;  %5302 = vmatprep.subr.bf16.mxu1 %v11083_v6  ;;  %v5382_v55 = vrot.slane %v5381_v59, 7  ;;  %v11152_v6 = vld [vmem:[%s14509_s9 + $0x6e4] ss:$16 sps:$4 sm:$0xff]  }
 0x767   :  { %5262 = vmatpush1.bf16.msra.mxu0 %v11078_v9  ;;  %5303 = vmatpush1.bf16.msra.mxu1 %v11081_v2  ;;  %v11155_v9 = vld [vmem:[%s14509_s9 + $0x6ec] ss:$16 sps:$4 sm:$0xff]   ;;  %v11150_v2 = vld [vmem:[%s14509_s9 + $0x6e0] ss:$16 sps:$4 sm:$0xff]  }
 0x768   :  { %5263 = vmatprep.subr.bf16.mxu0 %v11086_v18  ;;  %5304 = vmatprep.subr.bf16.mxu1 %v11089_v27  ;;  %v11153_v18 = vld [vmem:[%s14509_s9 + $0x6e8] ss:$16 sps:$4 sm:$0xff]   ;;  %v5383_v27 = vsel %vm3681_vm1, %v5382_v55, %v5380_v14  ;;  %v11210_v14 = vld [vmem:[%s14509_s9 + $0x820] ss:$16 sps:$4 sm:$0xff]  }
 0x769   :  { %v11213_v55 = vld [vmem:[%s14509_s9 + $0x828] ss:$16 sps:$4 sm:$0xff]  }
 0x76b   :  { %5264 = vmatpush1.bf16.msra.mxu0 %v11084_v43  ;;  %5305 = vmatpush1.bf16.msra.mxu1 %v11087_v53  ;;  %v11161_v43 = vld [vmem:[%s14509_s9 + $0x70c] ss:$16 sps:$4 sm:$0xff]   ;;  %v5384_v53 = vpack.c.b16 %v5383_v27, %v5383_v27  ;;  %v11224_v27 = vld [vmem:[%s14509_s9 + $0x864] ss:$16 sps:$4 sm:$0xff]  }
 0x76c   :  { %5265 = vmatprep.subr.bf16.mxu0 %v11092_v28  ;;  %5306 = vmatprep.subr.bf16.mxu1 %v11095_v37  ;;  %v11156_v28 = vld [vmem:[%s14509_s9 + $0x700] ss:$16 sps:$4 sm:$0xff]   ;;  %v11159_v37 = vld [vmem:[%s14509_s9 + $0x708] ss:$16 sps:$4 sm:$0xff]  }
 0x76f   :  { %5266 = vmatpush1.bf16.msra.mxu0 %v11090_v38  ;;  %5307 = vmatpush1.bf16.msra.mxu1 %v11093_v31  ;;  %v11162_v38 = vld [vmem:[%s14509_s9 + $0x720] ss:$16 sps:$4 sm:$0xff]   ;;  %v11165_v31 = vld [vmem:[%s14509_s9 + $0x728] ss:$16 sps:$4 sm:$0xff]  }
 0x770   :  { %5267 = vmatprep.subr.bf16.mxu0 %v11098_v11  ;;  %5308 = vmatprep.subr.bf16.mxu1 %v11101_v5  ;;  %v11170_v11 = vld [vmem:[%s14509_s9 + $0x744] ss:$16 sps:$4 sm:$0xff]   ;;  %v11171_v5 = vld [vmem:[%s14509_s9 + $0x748] ss:$16 sps:$4 sm:$0xff]  }
 0x773   :  { %5268 = vmatpush1.bf16.msra.mxu0 %v11096_v50  ;;  %5309 = vmatpush1.bf16.msra.mxu1 %v11099_v16  ;;  %v11176_v50 = vld [vmem:[%s14509_s9 + $0x764] ss:$16 sps:$4 sm:$0xff]   ;;  %v11179_v16 = vld [vmem:[%s14509_s9 + $0x76c] ss:$16 sps:$4 sm:$0xff]  }
 0x774   :  { %5269 = vmatprep.subr.bf16.mxu0 %v11104_v20  ;;  %5310 = vmatprep.subr.bf16.mxu1 %v11107_v62  ;;  %v11174_v20 = vld [vmem:[%s14509_s9 + $0x760] ss:$16 sps:$4 sm:$0xff]   ;;  %v11185_v62 = vld [vmem:[%s14509_s9 + $0x78c] ss:$16 sps:$4 sm:$0xff]  }
 0x777   :  { %5270 = vmatpush1.bf16.msra.mxu0 %v11102_v33  ;;  %5311 = vmatpush1.bf16.msra.mxu1 %v11105_v42  ;;  %v5633_v33 = vld [vmem:[#allocation2 + $0x21] sm:$0x1] }
 0x778   :  { %5546 = vmatprep.subr.bf16.mxu0 %v11110_v24  ;;  %5587 = vmatprep.subr.bf16.mxu1 %v11113_v57  ;;  %v11180_v42 = vld [vmem:[%s14509_s9 + $0x780] ss:$16 sps:$4 sm:$0xff]   ;;  %v5635_v24 = vpack.c.bf16 %v5633_v33, %v5633_v33  ;;  %v11188_v57 = vld [vmem:[%s14509_s9 + $0x7a4] ss:$16 sps:$4 sm:$0xff]  }
 0x77a   :  { %5288 = vmatmul.mubr.bf16.vlgmr.msra.gmra.mrb[20].mxu0 %v5093_v13  ;;  %5329 = vmatmul.mubr.bf16.vlgmr.msra.gmra.mrb[20].mxu1 %v5093_v13  ;;  %v11191_v13 = vld [vmem:[%s14509_s9 + $0x7ac] ss:$16 sps:$4 sm:$0xff]  }
 0x77b   :  { %5547 = vmatpush1.bf16.msra.mxu0 %v11108_v30  ;;  %5588 = vmatpush1.bf16.msra.mxu1 %v11111_v45  ;;  %v5632_v30 = vld [vmem:[#allocation2 + $0x9] sm:$0x1]  ;;  %v11186_v45 = vld [vmem:[%s14509_s9 + $0x7a0] ss:$16 sps:$4 sm:$0xff]  }
 0x77c   :  { %5548 = vmatprep.subr.bf16.mxu0 %v11116_v47  ;;  %5589 = vmatprep.subr.bf16.mxu1 %v11119_v15  ;;  %v11189_v47 = vld [vmem:[%s14509_s9 + $0x7a8] ss:$16 sps:$4 sm:$0xff]   ;;  %v5634_v15 = vpack.c.bf16 %v5632_v30, %v5632_v30 }
 0x77d   :  { %5578 = vmatprep.mubr.bf16.mxu0 %v11654_v58  ;;  %5619 = vmatprep.mubr.bf16.mxu1 %v11654_v58  ;;  %v11243_v30 = vld [vmem:[%s14509_s9 + $0x8c8] ss:$16 sps:$4 sm:$0xff]  }
 0x77e   :  { %v5671_v48 = vunpack.c.l.b16 %v5634_v15 }
 0x77f   :  { %5549 = vmatpush1.bf16.msra.mxu0 %v11114_v8  ;;  %5590 = vmatpush1.bf16.msra.mxu1 %v11117_v0  ;;  %v5672_v8 = vunpack.c.l.b16 %v5635_v24  ;;  %v11194_v0 = vld [vmem:[%s14509_s9 + $0x7c4] ss:$16 sps:$4 sm:$0xff]  }
 0x780   :  { %5550 = vmatprep.subr.bf16.mxu0 %v11122_v56  ;;  %5591 = vmatprep.subr.bf16.mxu1 %v11125_v21  ;;  %v11197_v56 = vld [vmem:[%s14509_s9 + $0x7cc] ss:$16 sps:$4 sm:$0xff]  }
 0x783   :  { %5551 = vmatpush1.bf16.msra.mxu0 %v11120_v25  ;;  %5592 = vmatpush1.bf16.msra.mxu1 %v11123_v36  ;;  %v11192_v36 = vld [vmem:[%s14509_s9 + $0x7c0] ss:$16 sps:$4 sm:$0xff]  }
 0x784   :  { %5552 = vmatprep.subr.bf16.mxu0 %v11128_v23  ;;  %5593 = vmatprep.subr.bf16.mxu1 %v11131_v3 }
 0x787   :  { %5553 = vmatpush1.bf16.msra.mxu0 %v11126_v51  ;;  %5594 = vmatpush1.bf16.msra.mxu1 %v11129_v1  ;;  %v11195_v51 = vld [vmem:[%s14509_s9 + $0x7c8] ss:$16 sps:$4 sm:$0xff]   ;;  %v11200_v1 = vld [vmem:[%s14509_s9 + $0x7e4] ss:$16 sps:$4 sm:$0xff]  }
 0x788   :  { %5554 = vmatprep.subr.bf16.mxu0 %v11134_v44  ;;  %5595 = vmatprep.subr.bf16.mxu1 %v11137_v34 }
 0x78b   :  { %5555 = vmatpush1.bf16.msra.mxu0 %v11132_v10  ;;  %5596 = vmatpush1.bf16.msra.mxu1 %v11135_v19  ;;  %v5673_v10 = vrot.slane %v5672_v8, 7 }
 0x78c   :  { %5556 = vmatprep.subr.bf16.mxu0 %v11140_v26  ;;  %5597 = vmatprep.subr.bf16.mxu1 %v11143_v54  ;;  %v11198_v54 = vld [vmem:[%s14509_s9 + $0x7e0] ss:$16 sps:$4 sm:$0xff]  }
 0x78f   :  { %5557 = vmatpush1.bf16.msra.mxu0 %v11138_v52  ;;  %5598 = vmatpush1.bf16.msra.mxu1 %v11141_v7  ;;  %v5674_v52 = vsel %vm3681_vm1, %v5673_v10, %v5671_v48  ;;  %v11206_v7 = vld [vmem:[%s14509_s9 + $0x804] ss:$16 sps:$4 sm:$0xff]   ;;  %v11252_v48 = vld [vmem:[%s14509_s9 + $0x900] ss:$16 sps:$4 sm:$0xff]   ;;  %v11255_v10 = vld [vmem:[%s14509_s9 + $0x908] ss:$16 sps:$4 sm:$0xff]  }
 0x790   :  { %5558 = vmatprep.subr.bf16.mxu0 %v11146_v63  ;;  %5599 = vmatprep.subr.bf16.mxu1 %v11149_v61  ;;  %v5675_v59 = vpack.c.b16 %v5674_v52, %v5674_v52  ;;  %v11204_v63 = vld [vmem:[%s14509_s9 + $0x800] ss:$16 sps:$4 sm:$0xff]   ;;  %v11207_v61 = vld [vmem:[%s14509_s9 + $0x808] ss:$16 sps:$4 sm:$0xff]   ;;  %v11266_v52 = vld [vmem:[%s14509_s9 + $0x944] ss:$16 sps:$4 sm:$0xff]  }
 0x793   :  { %5559 = vmatpush1.bf16.msra.mxu0 %v11144_v29  ;;  %5600 = vmatpush1.bf16.msra.mxu1 %v11147_v39  ;;  %v11212_v29 = vld [vmem:[%s14509_s9 + $0x824] ss:$16 sps:$4 sm:$0xff]   ;;  %v11215_v39 = vld [vmem:[%s14509_s9 + $0x82c] ss:$16 sps:$4 sm:$0xff]  }
 0x794   :  { %5560 = vmatprep.subr.bf16.mxu0 %v11152_v6  ;;  %5601 = vmatprep.subr.bf16.mxu1 %v11155_v9  ;;  %v11218_v6 = vld [vmem:[%s14509_s9 + $0x844] ss:$16 sps:$4 sm:$0xff]   ;;  %v11221_v9 = vld [vmem:[%s14509_s9 + $0x84c] ss:$16 sps:$4 sm:$0xff]  }
 0x797   :  { %5561 = vmatpush1.bf16.msra.mxu0 %v11150_v2  ;;  %5602 = vmatpush1.bf16.msra.mxu1 %v11153_v18  ;;  %v11216_v2 = vld [vmem:[%s14509_s9 + $0x840] ss:$16 sps:$4 sm:$0xff]   ;;  %v11219_v18 = vld [vmem:[%s14509_s9 + $0x848] ss:$16 sps:$4 sm:$0xff]  }
 0x798   :  { %5837 = vmatprep.subr.bf16.mxu0 %v11158_v32  ;;  %5878 = vmatprep.subr.bf16.mxu1 %v11161_v43  ;;  %v11227_v32 = vld [vmem:[%s14509_s9 + $0x86c] ss:$16 sps:$4 sm:$0xff]   ;;  %v11222_v43 = vld [vmem:[%s14509_s9 + $0x860] ss:$16 sps:$4 sm:$0xff]  }
 0x79a   :  { %5579 = vmatmul.mubr.bf16.vlgmr.msra.gmra.mrb[24].mxu0 %v5384_v53  ;;  %5620 = vmatmul.mubr.bf16.vlgmr.msra.gmra.mrb[24].mxu1 %v5384_v53  ;;  %v11225_v53 = vld [vmem:[%s14509_s9 + $0x868] ss:$16 sps:$4 sm:$0xff]  }
 0x79b   :  { %5838 = vmatpush1.bf16.msra.mxu0 %v11156_v28  ;;  %5879 = vmatpush1.bf16.msra.mxu1 %v11159_v37  ;;  %v11230_v28 = vld [vmem:[%s14509_s9 + $0x884] ss:$16 sps:$4 sm:$0xff]   ;;  %v11233_v37 = vld [vmem:[%s14509_s9 + $0x88c] ss:$16 sps:$4 sm:$0xff]  }
 0x79c   :  { %5839 = vmatprep.subr.bf16.mxu0 %v11164_v40  ;;  %5880 = vmatprep.subr.bf16.mxu1 %v11167_v46  ;;  %v5924_v40 = vld [vmem:[#allocation2 + $0x24] sm:$0x1]  ;;  %v11228_v46 = vld [vmem:[%s14509_s9 + $0x880] ss:$16 sps:$4 sm:$0xff]  }
 0x79d   :  { %5869 = vmatprep.mubr.bf16.mxu0 %v11654_v58  ;;  %5910 = vmatprep.mubr.bf16.mxu1 %v11654_v58 }
 0x79f   :  { %5840 = vmatpush1.bf16.msra.mxu0 %v11162_v38  ;;  %5881 = vmatpush1.bf16.msra.mxu1 %v11165_v31  ;;  %v11231_v38 = vld [vmem:[%s14509_s9 + $0x888] ss:$16 sps:$4 sm:$0xff]   ;;  %v11236_v31 = vld [vmem:[%s14509_s9 + $0x8a4] ss:$16 sps:$4 sm:$0xff]  }
 0x7a0   :  { %5841 = vmatprep.subr.bf16.mxu0 %v11170_v11  ;;  %5882 = vmatprep.subr.bf16.mxu1 %v11173_v4  ;;  %v5926_v11 = vpack.c.bf16 %v5924_v40, %v5924_v40  ;;  %v11239_v4 = vld [vmem:[%s14509_s9 + $0x8ac] ss:$16 sps:$4 sm:$0xff]  }
 0x7a3   :  { %5842 = vmatpush1.bf16.msra.mxu0 %v11168_v35  ;;  %5883 = vmatpush1.bf16.msra.mxu1 %v11171_v5  ;;  %v5923_v35 = vld [vmem:[#allocation2 + $0xc] sm:$0x1]  ;;  %v11234_v5 = vld [vmem:[%s14509_s9 + $0x8a0] ss:$16 sps:$4 sm:$0xff]  }
 0x7a4   :  { %5843 = vmatprep.subr.bf16.mxu0 %v11176_v50  ;;  %5884 = vmatprep.subr.bf16.mxu1 %v11179_v16  ;;  %v11237_v50 = vld [vmem:[%s14509_s9 + $0x8a8] ss:$16 sps:$4 sm:$0xff]   ;;  %v5925_v16 = vpack.c.bf16 %v5923_v35, %v5923_v35 }
 0x7a5   :  { %v11291_v35 = vld [vmem:[%s14509_s9 + $0x9c8] ss:$16 sps:$4 sm:$0xff]  }
 0x7a7   :  { %5844 = vmatpush1.bf16.msra.mxu0 %v11174_v20  ;;  %5885 = vmatpush1.bf16.msra.mxu1 %v11177_v41  ;;  %v5963_v20 = vunpack.c.l.b16 %v5926_v11  ;;  %v11242_v41 = vld [vmem:[%s14509_s9 + $0x8c4] ss:$16 sps:$4 sm:$0xff]  }
 0x7a8   :  { %5845 = vmatprep.subr.bf16.mxu0 %v11182_v12  ;;  %5886 = vmatprep.subr.bf16.mxu1 %v11185_v62  ;;  %v11245_v12 = vld [vmem:[%s14509_s9 + $0x8cc] ss:$16 sps:$4 sm:$0xff]  }
 0x7ab   :  { %5846 = vmatpush1.bf16.msra.mxu0 %v11180_v42  ;;  %5887 = vmatpush1.bf16.msra.mxu1 %v11183_v22  ;;  %v11240_v42 = vld [vmem:[%s14509_s9 + $0x8c0] ss:$16 sps:$4 sm:$0xff]  }
 0x7ac   :  { %5847 = vmatprep.subr.bf16.mxu0 %v11188_v57  ;;  %5888 = vmatprep.subr.bf16.mxu1 %v11191_v13 }
 0x7ad   :  { %v13479_v21 = vpop.f32.mrb[0].mxu0  ;;  %v13481_v25 = vpop.f32.mrb[0].mxu1 }
 0x7ae   :  { %v13486_v23 = vpop.f32.mrb[1].mxu0  ;;  %v13488_v3 = vpop.f32.mrb[1].mxu1 }
 0x7af   :  { %v3883_v44 = vpop.f32.mrb[2].mxu0  ;;  %v3924_v34 = vpop.f32.mrb[2].mxu1  ;;  %5848 = vmatpush1.bf16.msra.mxu0 %v11186_v45  ;;  %5889 = vmatpush1.bf16.msra.mxu1 %v11189_v47 }
 0x7b0   :  { %v3884_v19 = vpop.f32.mrb[3].mxu0  ;;  %v3925_v26 = vpop.f32.mrb[3].mxu1  ;;  %5849 = vmatprep.subr.bf16.mxu0 %v11194_v0  ;;  %5890 = vmatprep.subr.bf16.mxu1 %v11197_v56  ;;  %v11248_v0 = vld [vmem:[%s14509_s9 + $0x8e4] ss:$16 sps:$4 sm:$0xff]   ;;  %v5962_v56 = vunpack.c.l.b16 %v5925_v16  ;;  %v11257_v34 = vld [vmem:[%s14509_s9 + $0x90c] ss:$16 sps:$4 sm:$0xff]  }
 0x7b1   :  { %v11254_v44 = vld [vmem:[%s14509_s9 + $0x904] ss:$16 sps:$4 sm:$0xff]  }
 0x7b2   :  { %v11260_v26 = vld [vmem:[%s14509_s9 + $0x924] ss:$16 sps:$4 sm:$0xff]  }
 0x7b3   :  { %5850 = vmatpush1.bf16.msra.mxu0 %v11192_v36  ;;  %5891 = vmatpush1.bf16.msra.mxu1 %v11195_v51  ;;  %v11249_v51 = vld [vmem:[%s14509_s9 + $0x8e8] ss:$16 sps:$4 sm:$0xff]  }
 0x7b4   :  { %5851 = vmatprep.subr.bf16.mxu0 %v11200_v1  ;;  %5892 = vmatprep.subr.bf16.mxu1 %v11203_v49  ;;  %v11263_v49 = vld [vmem:[%s14509_s9 + $0x92c] ss:$16 sps:$4 sm:$0xff]  }
 0x7b7   :  { %5852 = vmatpush1.bf16.msra.mxu0 %v11198_v54  ;;  %5893 = vmatpush1.bf16.msra.mxu1 %v11201_v60  ;;  %v11258_v54 = vld [vmem:[%s14509_s9 + $0x920] ss:$16 sps:$4 sm:$0xff]   ;;  %v11261_v60 = vld [vmem:[%s14509_s9 + $0x928] ss:$16 sps:$4 sm:$0xff]  }
 0x7b8   :  { %6128 = vmatprep.subr.bf16.mxu0 %v11206_v7  ;;  %6169 = vmatprep.subr.bf16.mxu1 %v11209_v17  ;;  %v11269_v7 = vld [vmem:[%s14509_s9 + $0x94c] ss:$16 sps:$4 sm:$0xff]   ;;  %v11264_v17 = vld [vmem:[%s14509_s9 + $0x940] ss:$16 sps:$4 sm:$0xff]  }
 0x7ba   :  { %5870 = vmatmul.mubr.bf16.vlgmr.msra.gmra.mrb[28].mxu0 %v5675_v59  ;;  %5911 = vmatmul.mubr.bf16.vlgmr.msra.gmra.mrb[28].mxu1 %v5675_v59  ;;  %v11267_v59 = vld [vmem:[%s14509_s9 + $0x948] ss:$16 sps:$4 sm:$0xff]  }
 0x7bb   :  { %6129 = vmatpush1.bf16.msra.mxu0 %v11204_v63  ;;  %6170 = vmatpush1.bf16.msra.mxu1 %v11207_v61  ;;  %v11272_v63 = vld [vmem:[%s14509_s9 + $0x964] ss:$16 sps:$4 sm:$0xff]   ;;  %v11275_v61 = vld [vmem:[%s14509_s9 + $0x96c] ss:$16 sps:$4 sm:$0xff]  }
 0x7bc   :  { %6130 = vmatprep.subr.bf16.mxu0 %v11212_v29  ;;  %6171 = vmatprep.subr.bf16.mxu1 %v11215_v39  ;;  %v11270_v29 = vld [vmem:[%s14509_s9 + $0x960] ss:$16 sps:$4 sm:$0xff]   ;;  %v11273_v39 = vld [vmem:[%s14509_s9 + $0x968] ss:$16 sps:$4 sm:$0xff]  }
 0x7bd   :  { %6160 = vmatprep.mubr.bf16.mxu0 %v11654_v58  ;;  %6201 = vmatprep.mubr.bf16.mxu1 %v11654_v58 }
 0x7bf   :  { %6131 = vmatpush1.bf16.msra.mxu0 %v11210_v14  ;;  %6172 = vmatpush1.bf16.msra.mxu1 %v11213_v55  ;;  %v11278_v14 = vld [vmem:[%s14509_s9 + $0x984] ss:$16 sps:$4 sm:$0xff]   ;;  %v11281_v55 = vld [vmem:[%s14509_s9 + $0x98c] ss:$16 sps:$4 sm:$0xff]  }
 0x7c0   :  { %6132 = vmatprep.subr.bf16.mxu0 %v11218_v6  ;;  %6173 = vmatprep.subr.bf16.mxu1 %v11221_v9  ;;  %v6215_v6 = vld [vmem:[#allocation2 + $0x25] sm:$0x1]  ;;  %v11276_v9 = vld [vmem:[%s14509_s9 + $0x980] ss:$16 sps:$4 sm:$0xff]  }
 0x7c3   :  { %6133 = vmatpush1.bf16.msra.mxu0 %v11216_v2  ;;  %6174 = vmatpush1.bf16.msra.mxu1 %v11219_v18  ;;  %v11279_v2 = vld [vmem:[%s14509_s9 + $0x988] ss:$16 sps:$4 sm:$0xff]   ;;  %v11284_v18 = vld [vmem:[%s14509_s9 + $0x9a4] ss:$16 sps:$4 sm:$0xff]  }
 0x7c4   :  { %6134 = vmatprep.subr.bf16.mxu0 %v11224_v27  ;;  %6175 = vmatprep.subr.bf16.mxu1 %v11227_v32  ;;  %v6217_v27 = vpack.c.bf16 %v6215_v6, %v6215_v6  ;;  %v11287_v32 = vld [vmem:[%s14509_s9 + $0x9ac] ss:$16 sps:$4 sm:$0xff]  }
 0x7c6   :  { %v6254_v40 = vunpack.c.l.b16 %v6217_v27 }
 0x7c7   :  { %6135 = vmatpush1.bf16.msra.mxu0 %v11222_v43  ;;  %6176 = vmatpush1.bf16.msra.mxu1 %v11225_v53  ;;  %v6214_v43 = vld [vmem:[#allocation2 + $0xd] sm:$0x1]  ;;  %v11282_v53 = vld [vmem:[%s14509_s9 + $0x9a0] ss:$16 sps:$4 sm:$0xff]  }
 0x7c8   :  { %6136 = vmatprep.subr.bf16.mxu0 %v11230_v28  ;;  %6177 = vmatprep.subr.bf16.mxu1 %v11233_v37  ;;  %v11285_v28 = vld [vmem:[%s14509_s9 + $0x9a8] ss:$16 sps:$4 sm:$0xff]   ;;  %v6216_v37 = vpack.c.bf16 %v6214_v43, %v6214_v43 }
 0x7c9   :  { %v11339_v43 = vld [vmem:[%s14509_s9 + $0xac8] ss:$16 sps:$4 sm:$0xff]  }
 0x7cb   :  { %6137 = vmatpush1.bf16.msra.mxu0 %v11228_v46  ;;  %6178 = vmatpush1.bf16.msra.mxu1 %v11231_v38  ;;  %v11290_v46 = vld [vmem:[%s14509_s9 + $0x9c4] ss:$16 sps:$4 sm:$0xff]   ;;  %v11293_v38 = vld [vmem:[%s14509_s9 + $0x9cc] ss:$16 sps:$4 sm:$0xff]  }
 0x7cc   :  { %6138 = vmatprep.subr.bf16.mxu0 %v11236_v31  ;;  %6179 = vmatprep.subr.bf16.mxu1 %v11239_v4  ;;  %v11288_v4 = vld [vmem:[%s14509_s9 + $0x9c0] ss:$16 sps:$4 sm:$0xff]  }
 0x7cd   :  { %v4129_v62 = vpop.f32.mrb[4].mxu0  ;;  %v4170_v33 = vpop.f32.mrb[4].mxu1 }
 0x7ce   :  { %v13590_v22 = vadd.f32 %v4129_v62, %v13479_v21  ;;  %v13593_v24 = vadd.f32 %v4170_v33, %v13481_v25  ;;  %v4131_v57 = vpop.f32.mrb[5].mxu0  ;;  %v4172_v13 = vpop.f32.mrb[5].mxu1  ;;  %v5964_v21 = vrot.slane %v5963_v20, 7 }
 0x7cf   :  { %v13599_v45 = vadd.f32 %v4131_v57, %v13486_v23  ;;  %v13602_v47 = vadd.f32 %v4172_v13, %v13488_v3  ;;  %v4133_v15 = vpop.f32.mrb[6].mxu0  ;;  %v4174_v8 = vpop.f32.mrb[6].mxu1  ;;  %6139 = vmatpush1.bf16.msra.mxu0 %v11234_v5  ;;  %6180 = vmatpush1.bf16.msra.mxu1 %v11237_v50  ;;  %v11251_v23 = vld [vmem:[%s14509_s9 + $0x8ec] ss:$16 sps:$4 sm:$0xff]   ;;  %v11246_v3 = vld [vmem:[%s14509_s9 + $0x8e0] ss:$16 sps:$4 sm:$0xff]  }
 0x7d0   :  { %v4134_v25 = vpop.f32.mrb[7].mxu0  ;;  %v4175_v36 = vpop.f32.mrb[7].mxu1  ;;  %6140 = vmatprep.subr.bf16.mxu0 %v11242_v41  ;;  %6181 = vmatprep.subr.bf16.mxu1 %v11245_v12  ;;  %v5965_v1 = vsel %vm3681_vm1, %v5964_v21, %v5962_v56  ;;  %v6255_v57 = vrot.slane %v6254_v40, 7  ;;  %v11302_v8 = vld [vmem:[%s14509_s9 + $0xa04] ss:$16 sps:$4 sm:$0xff]  }
 0x7d1   :  { %v5966_v19 = vpack.c.b16 %v5965_v1, %v5965_v1  ;;  %v11300_v56 = vld [vmem:[%s14509_s9 + $0xa00] ss:$16 sps:$4 sm:$0xff]   ;;  %v11303_v21 = vld [vmem:[%s14509_s9 + $0xa08] ss:$16 sps:$4 sm:$0xff]   ;;  %v11308_v36 = vld [vmem:[%s14509_s9 + $0xa24] ss:$16 sps:$4 sm:$0xff]  }
 0x7d2   :  { %v11314_v1 = vld [vmem:[%s14509_s9 + $0xa44] ss:$16 sps:$4 sm:$0xff]  }
 0x7d3   :  { %6141 = vmatpush1.bf16.msra.mxu0 %v11240_v42  ;;  %6182 = vmatpush1.bf16.msra.mxu1 %v11243_v30  ;;  %v6253_v42 = vunpack.c.l.b16 %v6216_v37  ;;  %v11299_v30 = vld [vmem:[%s14509_s9 + $0x9ec] ss:$16 sps:$4 sm:$0xff]  }
 0x7d4   :  { %6142 = vmatprep.subr.bf16.mxu0 %v11248_v0  ;;  %6183 = vmatprep.subr.bf16.mxu1 %v11251_v23  ;;  %v11305_v0 = vld [vmem:[%s14509_s9 + $0xa0c] ss:$16 sps:$4 sm:$0xff]  }
 0x7d5   :  { %v6256_v15 = vsel %vm3681_vm1, %v6255_v57, %v6253_v42  ;;  %v11311_v23 = vld [vmem:[%s14509_s9 + $0xa2c] ss:$16 sps:$4 sm:$0xff]   ;;  %v11348_v57 = vld [vmem:[%s14509_s9 + $0xb00] ss:$16 sps:$4 sm:$0xff]  }
 0x7d6   :  { %v6257_v25 = vpack.c.b16 %v6256_v15, %v6256_v15  ;;  %v11353_v42 = vld [vmem:[%s14509_s9 + $0xb0c] ss:$16 sps:$4 sm:$0xff]   ;;  %v11362_v15 = vld [vmem:[%s14509_s9 + $0xb44] ss:$16 sps:$4 sm:$0xff]  }
 0x7d7   :  { %6143 = vmatpush1.bf16.msra.mxu0 %v11246_v3  ;;  %6184 = vmatpush1.bf16.msra.mxu1 %v11249_v51  ;;  %v11306_v3 = vld [vmem:[%s14509_s9 + $0xa20] ss:$16 sps:$4 sm:$0xff]   ;;  %v11309_v51 = vld [vmem:[%s14509_s9 + $0xa28] ss:$16 sps:$4 sm:$0xff]  }
 0x7d8   :  { %6419 = vmatprep.subr.bf16.mxu0 %v11254_v44  ;;  %6460 = vmatprep.subr.bf16.mxu1 %v11257_v34  ;;  %v11317_v44 = vld [vmem:[%s14509_s9 + $0xa4c] ss:$16 sps:$4 sm:$0xff]   ;;  %v11312_v34 = vld [vmem:[%s14509_s9 + $0xa40] ss:$16 sps:$4 sm:$0xff]  }
 0x7da   :  { %6161 = vmatmul.mubr.bf16.vlgmr.msra.gmra.mrb[32].mxu0 %v5966_v19  ;;  %6202 = vmatmul.mubr.bf16.vlgmr.msra.gmra.mrb[32].mxu1 %v5966_v19  ;;  %v11323_v19 = vld [vmem:[%s14509_s9 + $0xa6c] ss:$16 sps:$4 sm:$0xff]  }
 0x7db   :  { %6420 = vmatpush1.bf16.msra.mxu0 %v11252_v48  ;;  %6461 = vmatpush1.bf16.msra.mxu1 %v11255_v10  ;;  %v11315_v48 = vld [vmem:[%s14509_s9 + $0xa48] ss:$16 sps:$4 sm:$0xff]   ;;  %v11320_v10 = vld [vmem:[%s14509_s9 + $0xa64] ss:$16 sps:$4 sm:$0xff]  }
 0x7dc   :  { %6421 = vmatprep.subr.bf16.mxu0 %v11260_v26  ;;  %6462 = vmatprep.subr.bf16.mxu1 %v11263_v49  ;;  %v6506_v26 = vld [vmem:[#allocation2 + $0x26] sm:$0x1]  ;;  %v11318_v49 = vld [vmem:[%s14509_s9 + $0xa60] ss:$16 sps:$4 sm:$0xff]  }
 0x7dd   :  { %6451 = vmatprep.mubr.bf16.mxu0 %v11654_v58  ;;  %6492 = vmatprep.mubr.bf16.mxu1 %v11654_v58 }
 0x7df   :  { %6422 = vmatpush1.bf16.msra.mxu0 %v11258_v54  ;;  %6463 = vmatpush1.bf16.msra.mxu1 %v11261_v60  ;;  %v11321_v54 = vld [vmem:[%s14509_s9 + $0xa68] ss:$16 sps:$4 sm:$0xff]   ;;  %v11326_v60 = vld [vmem:[%s14509_s9 + $0xa84] ss:$16 sps:$4 sm:$0xff]  }
 0x7e0   :  { %6423 = vmatprep.subr.bf16.mxu0 %v11266_v52  ;;  %6464 = vmatprep.subr.bf16.mxu1 %v11269_v7  ;;  %v11329_v52 = vld [vmem:[%s14509_s9 + $0xa8c] ss:$16 sps:$4 sm:$0xff]   ;;  %v11324_v7 = vld [vmem:[%s14509_s9 + $0xa80] ss:$16 sps:$4 sm:$0xff]  }
 0x7e3   :  { %6424 = vmatpush1.bf16.msra.mxu0 %v11264_v17  ;;  %6465 = vmatpush1.bf16.msra.mxu1 %v11267_v59  ;;  %v6508_v17 = vpack.c.bf16 %v6506_v26, %v6506_v26  ;;  %v11327_v59 = vld [vmem:[%s14509_s9 + $0xa88] ss:$16 sps:$4 sm:$0xff]   ;;  %v6796_v26 = vld [vmem:[#allocation2 + $0xf] sm:$0x1] }
 0x7e4   :  { %6425 = vmatprep.subr.bf16.mxu0 %v11272_v63  ;;  %6466 = vmatprep.subr.bf16.mxu1 %v11275_v61  ;;  %v11332_v63 = vld [vmem:[%s14509_s9 + $0xaa4] ss:$16 sps:$4 sm:$0xff]   ;;  %v11335_v61 = vld [vmem:[%s14509_s9 + $0xaac] ss:$16 sps:$4 sm:$0xff]  }
 0x7e7   :  { %6426 = vmatpush1.bf16.msra.mxu0 %v11270_v29  ;;  %6467 = vmatpush1.bf16.msra.mxu1 %v11273_v39  ;;  %v6505_v29 = vld [vmem:[#allocation2 + $0xe] sm:$0x1]  ;;  %v11330_v39 = vld [vmem:[%s14509_s9 + $0xaa0] ss:$16 sps:$4 sm:$0xff]  }
 0x7e8   :  { %6427 = vmatprep.subr.bf16.mxu0 %v11278_v14  ;;  %6468 = vmatprep.subr.bf16.mxu1 %v11281_v55  ;;  %v11333_v14 = vld [vmem:[%s14509_s9 + $0xaa8] ss:$16 sps:$4 sm:$0xff]   ;;  %v6545_v55 = vunpack.c.l.b16 %v6508_v17  ;;  %v6507_v6 = vpack.c.bf16 %v6505_v29, %v6505_v29  ;;  %v11389_v17 = vld [vmem:[%s14509_s9 + $0xbcc] ss:$16 sps:$4 sm:$0xff]  }
 0x7eb   :  { %6428 = vmatpush1.bf16.msra.mxu0 %v11276_v9  ;;  %6469 = vmatpush1.bf16.msra.mxu1 %v11279_v2  ;;  %v11338_v9 = vld [vmem:[%s14509_s9 + $0xac4] ss:$16 sps:$4 sm:$0xff]   ;;  %v11341_v2 = vld [vmem:[%s14509_s9 + $0xacc] ss:$16 sps:$4 sm:$0xff]  }
 0x7ec   :  { %6429 = vmatprep.subr.bf16.mxu0 %v11284_v18  ;;  %6470 = vmatprep.subr.bf16.mxu1 %v11287_v32  ;;  %v11336_v32 = vld [vmem:[%s14509_s9 + $0xac0] ss:$16 sps:$4 sm:$0xff]  }
 0x7ed   :  { %v4416_v31 = vpop.f32.mrb[8].mxu0  ;;  %v4457_v11 = vpop.f32.mrb[8].mxu1 }
 0x7ee   :  { %v13704_v5 = vadd.f32 %v4416_v31, %v13590_v22  ;;  %v13707_v50 = vadd.f32 %v4457_v11, %v13593_v24  ;;  %v4418_v16 = vpop.f32.mrb[9].mxu0  ;;  %v4459_v20 = vpop.f32.mrb[9].mxu1  ;;  %v11296_v24 = vld [vmem:[%s14509_s9 + $0x9e4] ss:$16 sps:$4 sm:$0xff]  }
 0x7ef   :  { %v13710_v41 = vadd.f32 %v4418_v16, %v13599_v45  ;;  %v13713_v12 = vadd.f32 %v4459_v20, %v13602_v47  ;;  %v4420_v62 = vpop.f32.mrb[10].mxu0  ;;  %v4461_v33 = vpop.f32.mrb[10].mxu1  ;;  %6430 = vmatpush1.bf16.msra.mxu0 %v11282_v53  ;;  %6471 = vmatpush1.bf16.msra.mxu1 %v11285_v28  ;;  %v11294_v45 = vld [vmem:[%s14509_s9 + $0x9e0] ss:$16 sps:$4 sm:$0xff]   ;;  %v11297_v47 = vld [vmem:[%s14509_s9 + $0x9e8] ss:$16 sps:$4 sm:$0xff]  }
 0x7f0   :  { %v4421_v13 = vpop.f32.mrb[11].mxu0  ;;  %v4462_v22 = vpop.f32.mrb[11].mxu1  ;;  %6431 = vmatprep.subr.bf16.mxu0 %v11290_v46  ;;  %6472 = vmatprep.subr.bf16.mxu1 %v11293_v38  ;;  %v6546_v53 = vrot.slane %v6545_v55, 7  ;;  %v11350_v33 = vld [vmem:[%s14509_s9 + $0xb04] ss:$16 sps:$4 sm:$0xff]  }
 0x7f1   :  { %v11351_v22 = vld [vmem:[%s14509_s9 + $0xb08] ss:$16 sps:$4 sm:$0xff]   ;;  %v11384_v55 = vld [vmem:[%s14509_s9 + $0xbc0] ss:$16 sps:$4 sm:$0xff]  }
 0x7f3   :  { %6432 = vmatpush1.bf16.msra.mxu0 %v11288_v4  ;;  %6473 = vmatpush1.bf16.msra.mxu1 %v11291_v35  ;;  %v6544_v35 = vunpack.c.l.b16 %v6507_v6 }
 0x7f4   :  { %6433 = vmatprep.subr.bf16.mxu0 %v11296_v24  ;;  %6474 = vmatprep.subr.bf16.mxu1 %v11299_v30  ;;  %v11356_v24 = vld [vmem:[%s14509_s9 + $0xb24] ss:$16 sps:$4 sm:$0xff]   ;;  %v11359_v30 = vld [vmem:[%s14509_s9 + $0xb2c] ss:$16 sps:$4 sm:$0xff]  }
 0x7f5   :  { %v6547_v62 = vsel %vm3681_vm1, %v6546_v53, %v6544_v35 }
 0x7f6   :  { %v6548_v13 = vpack.c.b16 %v6547_v62, %v6547_v62  ;;  %v11410_v62 = vld [vmem:[%s14509_s9 + $0xc44] ss:$16 sps:$4 sm:$0xff]  }
 0x7f7   :  { %6434 = vmatpush1.bf16.msra.mxu0 %v11294_v45  ;;  %6475 = vmatpush1.bf16.msra.mxu1 %v11297_v47  ;;  %v11354_v45 = vld [vmem:[%s14509_s9 + $0xb20] ss:$16 sps:$4 sm:$0xff]   ;;  %v11357_v47 = vld [vmem:[%s14509_s9 + $0xb28] ss:$16 sps:$4 sm:$0xff]  }
 0x7f8   :  { %6710 = vmatprep.subr.bf16.mxu0 %v11302_v8  ;;  %6751 = vmatprep.subr.bf16.mxu1 %v11305_v0  ;;  %v11365_v8 = vld [vmem:[%s14509_s9 + $0xb4c] ss:$16 sps:$4 sm:$0xff]   ;;  %v11360_v0 = vld [vmem:[%s14509_s9 + $0xb40] ss:$16 sps:$4 sm:$0xff]  }
 0x7fa   :  { %6452 = vmatmul.mubr.bf16.vlgmr.msra.gmra.mrb[36].mxu0 %v6257_v25  ;;  %6493 = vmatmul.mubr.bf16.vlgmr.msra.gmra.mrb[36].mxu1 %v6257_v25  ;;  %v11371_v25 = vld [vmem:[%s14509_s9 + $0xb6c] ss:$16 sps:$4 sm:$0xff]  }
 0x7fb   :  { %6711 = vmatpush1.bf16.msra.mxu0 %v11300_v56  ;;  %6752 = vmatpush1.bf16.msra.mxu1 %v11303_v21  ;;  %v11363_v56 = vld [vmem:[%s14509_s9 + $0xb48] ss:$16 sps:$4 sm:$0xff]   ;;  %v11368_v21 = vld [vmem:[%s14509_s9 + $0xb64] ss:$16 sps:$4 sm:$0xff]  }
 0x7fc   :  { %6712 = vmatprep.subr.bf16.mxu0 %v11308_v36  ;;  %6753 = vmatprep.subr.bf16.mxu1 %v11311_v23  ;;  %v11366_v36 = vld [vmem:[%s14509_s9 + $0xb60] ss:$16 sps:$4 sm:$0xff]   ;;  %v11369_v23 = vld [vmem:[%s14509_s9 + $0xb68] ss:$16 sps:$4 sm:$0xff]  }
 0x7fd   :  { %6742 = vmatprep.mubr.bf16.mxu0 %v11654_v58  ;;  %6783 = vmatprep.mubr.bf16.mxu1 %v11654_v58 }
 0x7ff   :  { %6713 = vmatpush1.bf16.msra.mxu0 %v11306_v3  ;;  %6754 = vmatpush1.bf16.msra.mxu1 %v11309_v51  ;;  %v11374_v3 = vld [vmem:[%s14509_s9 + $0xb84] ss:$16 sps:$4 sm:$0xff]   ;;  %v11377_v51 = vld [vmem:[%s14509_s9 + $0xb8c] ss:$16 sps:$4 sm:$0xff]  }
 0x800   :  { %6714 = vmatprep.subr.bf16.mxu0 %v11314_v1  ;;  %6755 = vmatprep.subr.bf16.mxu1 %v11317_v44  ;;  %v6797_v1 = vld [vmem:[#allocation2 + $0x27] sm:$0x1]  ;;  %v11372_v44 = vld [vmem:[%s14509_s9 + $0xb80] ss:$16 sps:$4 sm:$0xff]  }
 0x803   :  { %6715 = vmatpush1.bf16.msra.mxu0 %v11312_v34  ;;  %6756 = vmatpush1.bf16.msra.mxu1 %v11315_v48  ;;  %v11375_v34 = vld [vmem:[%s14509_s9 + $0xb88] ss:$16 sps:$4 sm:$0xff]   ;;  %v11380_v48 = vld [vmem:[%s14509_s9 + $0xba4] ss:$16 sps:$4 sm:$0xff]  }
 0x804   :  { %6716 = vmatprep.subr.bf16.mxu0 %v11320_v10  ;;  %6757 = vmatprep.subr.bf16.mxu1 %v11323_v19  ;;  %v6799_v10 = vpack.c.bf16 %v6797_v1, %v6797_v1  ;;  %v11383_v19 = vld [vmem:[%s14509_s9 + $0xbac] ss:$16 sps:$4 sm:$0xff]  }
 0x807   :  { %6717 = vmatpush1.bf16.msra.mxu0 %v11318_v49  ;;  %6758 = vmatpush1.bf16.msra.mxu1 %v11321_v54  ;;  %v11378_v49 = vld [vmem:[%s14509_s9 + $0xba0] ss:$16 sps:$4 sm:$0xff]   ;;  %v11381_v54 = vld [vmem:[%s14509_s9 + $0xba8] ss:$16 sps:$4 sm:$0xff]  }
 0x808   :  { %6718 = vmatprep.subr.bf16.mxu0 %v11326_v60  ;;  %6759 = vmatprep.subr.bf16.mxu1 %v11329_v52  ;;  %v6798_v60 = vpack.c.bf16 %v6796_v26, %v6796_v26  ;;  %v6836_v52 = vunpack.c.l.b16 %v6799_v10 }
 0x80b   :  { %6719 = vmatpush1.bf16.msra.mxu0 %v11324_v7  ;;  %6760 = vmatpush1.bf16.msra.mxu1 %v11327_v59  ;;  %v11386_v7 = vld [vmem:[%s14509_s9 + $0xbc4] ss:$16 sps:$4 sm:$0xff]  }
 0x80c   :  { %6720 = vmatprep.subr.bf16.mxu0 %v11332_v63  ;;  %6761 = vmatprep.subr.bf16.mxu1 %v11335_v61 }
 0x80d   :  { %v4707_v18 = vpop.f32.mrb[12].mxu0  ;;  %v4748_v27 = vpop.f32.mrb[12].mxu1 }
 0x80e   :  { %v13815_v28 = vadd.f32 %v4707_v18, %v13704_v5  ;;  %v13818_v37 = vadd.f32 %v4748_v27, %v13707_v50  ;;  %v4709_v40 = vpop.f32.mrb[13].mxu0  ;;  %v4750_v46 = vpop.f32.mrb[13].mxu1  ;;  %v11344_v5 = vld [vmem:[%s14509_s9 + $0xae4] ss:$16 sps:$4 sm:$0xff]   ;;  %v11347_v50 = vld [vmem:[%s14509_s9 + $0xaec] ss:$16 sps:$4 sm:$0xff]  }
 0x80f   :  { %v13821_v38 = vadd.f32 %v4709_v40, %v13710_v41  ;;  %v13824_v31 = vadd.f32 %v4750_v46, %v13713_v12  ;;  %v4711_v11 = vpop.f32.mrb[14].mxu0  ;;  %v4752_v4 = vpop.f32.mrb[14].mxu1  ;;  %6721 = vmatpush1.bf16.msra.mxu0 %v11330_v39  ;;  %6762 = vmatpush1.bf16.msra.mxu1 %v11333_v14  ;;  %v11342_v41 = vld [vmem:[%s14509_s9 + $0xae0] ss:$16 sps:$4 sm:$0xff]   ;;  %v11345_v12 = vld [vmem:[%s14509_s9 + $0xae8] ss:$16 sps:$4 sm:$0xff]  }
 0x810   :  { %v4712_v16 = vpop.f32.mrb[15].mxu0  ;;  %v4753_v20 = vpop.f32.mrb[15].mxu1  ;;  %6722 = vmatprep.subr.bf16.mxu0 %v11338_v9  ;;  %6763 = vmatprep.subr.bf16.mxu1 %v11341_v2  ;;  %v11387_v27 = vld [vmem:[%s14509_s9 + $0xbc8] ss:$16 sps:$4 sm:$0xff]   ;;  %v11395_v40 = vld [vmem:[%s14509_s9 + $0xbec] ss:$16 sps:$4 sm:$0xff]  }
 0x811   :  { %v11390_v46 = vld [vmem:[%s14509_s9 + $0xbe0] ss:$16 sps:$4 sm:$0xff]   ;;  %v11398_v11 = vld [vmem:[%s14509_s9 + $0xc04] ss:$16 sps:$4 sm:$0xff]   ;;  %v11401_v4 = vld [vmem:[%s14509_s9 + $0xc0c] ss:$16 sps:$4 sm:$0xff]  }
 0x812   :  { %v11396_v16 = vld [vmem:[%s14509_s9 + $0xc00] ss:$16 sps:$4 sm:$0xff]   ;;  %v11399_v20 = vld [vmem:[%s14509_s9 + $0xc08] ss:$16 sps:$4 sm:$0xff]  }
 0x813   :  { %6723 = vmatpush1.bf16.msra.mxu0 %v11336_v32  ;;  %6764 = vmatpush1.bf16.msra.mxu1 %v11339_v43  ;;  %v6835_v32 = vunpack.c.l.b16 %v6798_v60  ;;  %v6837_v43 = vrot.slane %v6836_v52, 7  ;;  %v11432_v60 = vld [vmem:[%s14509_s9 + $0xcc0] ss:$16 sps:$4 sm:$0xff]  }
 0x814   :  { %6724 = vmatprep.subr.bf16.mxu0 %v11344_v5  ;;  %6765 = vmatprep.subr.bf16.mxu1 %v11347_v50  ;;  %v11404_v5 = vld [vmem:[%s14509_s9 + $0xc24] ss:$16 sps:$4 sm:$0xff]   ;;  %v11407_v50 = vld [vmem:[%s14509_s9 + $0xc2c] ss:$16 sps:$4 sm:$0xff]  }
 0x817   :  { %6725 = vmatpush1.bf16.msra.mxu0 %v11342_v41  ;;  %6766 = vmatpush1.bf16.msra.mxu1 %v11345_v12  ;;  %v11402_v41 = vld [vmem:[%s14509_s9 + $0xc20] ss:$16 sps:$4 sm:$0xff]   ;;  %v11405_v12 = vld [vmem:[%s14509_s9 + $0xc28] ss:$16 sps:$4 sm:$0xff]  }
 0x818   :  { %7001 = vmatprep.subr.bf16.mxu0 %v11350_v33  ;;  %7042 = vmatprep.subr.bf16.mxu1 %v11353_v42  ;;  %v11413_v33 = vld [vmem:[%s14509_s9 + $0xc4c] ss:$16 sps:$4 sm:$0xff]   ;;  %v11408_v42 = vld [vmem:[%s14509_s9 + $0xc40] ss:$16 sps:$4 sm:$0xff]  }
 0x81a   :  { %6743 = vmatmul.mubr.bf16.vlgmr.msra.gmra.mrb[40].mxu0 %v6548_v13  ;;  %6784 = vmatmul.mubr.bf16.vlgmr.msra.gmra.mrb[40].mxu1 %v6548_v13  ;;  %v11416_v13 = vld [vmem:[%s14509_s9 + $0xc64] ss:$16 sps:$4 sm:$0xff]  }
 0x81b   :  { %7002 = vmatpush1.bf16.msra.mxu0 %v11348_v57  ;;  %7043 = vmatpush1.bf16.msra.mxu1 %v11351_v22  ;;  %v11411_v57 = vld [vmem:[%s14509_s9 + $0xc48] ss:$16 sps:$4 sm:$0xff]   ;;  %v11419_v22 = vld [vmem:[%s14509_s9 + $0xc6c] ss:$16 sps:$4 sm:$0xff]  }
 0x81c   :  { %7003 = vmatprep.subr.bf16.mxu0 %v11356_v24  ;;  %7044 = vmatprep.subr.bf16.mxu1 %v11359_v30  ;;  %v11414_v24 = vld [vmem:[%s14509_s9 + $0xc60] ss:$16 sps:$4 sm:$0xff]   ;;  %v11417_v30 = vld [vmem:[%s14509_s9 + $0xc68] ss:$16 sps:$4 sm:$0xff]  }
 0x81d   :  { %7033 = vmatprep.mubr.bf16.mxu0 %v11654_v58  ;;  %7074 = vmatprep.mubr.bf16.mxu1 %v11654_v58 }
 0x81f   :  { %7004 = vmatpush1.bf16.msra.mxu0 %v11354_v45  ;;  %7045 = vmatpush1.bf16.msra.mxu1 %v11357_v47  ;;  %v11422_v45 = vld [vmem:[%s14509_s9 + $0xc84] ss:$16 sps:$4 sm:$0xff]   ;;  %v11425_v47 = vld [vmem:[%s14509_s9 + $0xc8c] ss:$16 sps:$4 sm:$0xff]  }
 0x820   :  { %7005 = vmatprep.subr.bf16.mxu0 %v11362_v15  ;;  %7046 = vmatprep.subr.bf16.mxu1 %v11365_v8  ;;  %v7088_v15 = vld [vmem:[#allocation2 + $0x2a] sm:$0x1]  ;;  %v11420_v8 = vld [vmem:[%s14509_s9 + $0xc80] ss:$16 sps:$4 sm:$0xff]  }
 0x823   :  { %7006 = vmatpush1.bf16.msra.mxu0 %v11360_v0  ;;  %7047 = vmatpush1.bf16.msra.mxu1 %v11363_v56  ;;  %v11423_v0 = vld [vmem:[%s14509_s9 + $0xc88] ss:$16 sps:$4 sm:$0xff]   ;;  %v7090_v56 = vpack.c.bf16 %v7088_v15, %v7088_v15 }
 0x824   :  { %7007 = vmatprep.subr.bf16.mxu0 %v11368_v21  ;;  %7048 = vmatprep.subr.bf16.mxu1 %v11371_v25  ;;  %v11428_v21 = vld [vmem:[%s14509_s9 + $0xca4] ss:$16 sps:$4 sm:$0xff]   ;;  %v11431_v25 = vld [vmem:[%s14509_s9 + $0xcac] ss:$16 sps:$4 sm:$0xff]  }
 0x825   :  { %v7127_v1 = vunpack.c.l.b16 %v7090_v56 }
 0x827   :  { %7008 = vmatpush1.bf16.msra.mxu0 %v11366_v36  ;;  %7049 = vmatpush1.bf16.msra.mxu1 %v11369_v23  ;;  %v7087_v36 = vld [vmem:[#allocation2 + $0x12] sm:$0x1] }
 0x828   :  { %7009 = vmatprep.subr.bf16.mxu0 %v11374_v3  ;;  %7050 = vmatprep.subr.bf16.mxu1 %v11377_v51  ;;  %v11426_v23 = vld [vmem:[%s14509_s9 + $0xca0] ss:$16 sps:$4 sm:$0xff]   ;;  %v11429_v3 = vld [vmem:[%s14509_s9 + $0xca8] ss:$16 sps:$4 sm:$0xff]   ;;  %v7089_v51 = vpack.c.bf16 %v7087_v36, %v7087_v36 }
 0x82b   :  { %7010 = vmatpush1.bf16.msra.mxu0 %v11372_v44  ;;  %7051 = vmatpush1.bf16.msra.mxu1 %v11375_v34  ;;  %v11434_v44 = vld [vmem:[%s14509_s9 + $0xcc4] ss:$16 sps:$4 sm:$0xff]   ;;  %v11437_v34 = vld [vmem:[%s14509_s9 + $0xccc] ss:$16 sps:$4 sm:$0xff]  }
 0x82c   :  { %7011 = vmatprep.subr.bf16.mxu0 %v11380_v48  ;;  %7052 = vmatprep.subr.bf16.mxu1 %v11383_v19 }
 0x82d   :  { %v4998_v59 = vpop.f32.mrb[16].mxu0  ;;  %v5039_v63 = vpop.f32.mrb[16].mxu1 }
 0x82e   :  { %v13920_v61 = vadd.f32 %v4998_v59, %v13815_v28  ;;  %v13923_v29 = vadd.f32 %v5039_v63, %v13818_v37  ;;  %v5000_v39 = vpop.f32.mrb[17].mxu0  ;;  %v5041_v14 = vpop.f32.mrb[17].mxu1  ;;  %v11392_v37 = vld [vmem:[%s14509_s9 + $0xbe4] ss:$16 sps:$4 sm:$0xff]   ;;  %v11435_v63 = vld [vmem:[%s14509_s9 + $0xcc8] ss:$16 sps:$4 sm:$0xff]  }
 0x82f   :  { %v13929_v6 = vadd.f32 %v5000_v39, %v13821_v38  ;;  %v13932_v9 = vadd.f32 %v5041_v14, %v13824_v31  ;;  %v5002_v2 = vpop.f32.mrb[18].mxu0  ;;  %v5043_v18 = vpop.f32.mrb[18].mxu1  ;;  %7012 = vmatpush1.bf16.msra.mxu0 %v11378_v49  ;;  %7053 = vmatpush1.bf16.msra.mxu1 %v11381_v54  ;;  %v11393_v38 = vld [vmem:[%s14509_s9 + $0xbe8] ss:$16 sps:$4 sm:$0xff]   ;;  %v6838_v31 = vsel %vm3681_vm1, %v6837_v43, %v6835_v32  ;;  %v11449_v32 = vld [vmem:[%s14509_s9 + $0xd0c] ss:$16 sps:$4 sm:$0xff]  }
 0x830   :  { %v5003_v53 = vpop.f32.mrb[19].mxu0  ;;  %v5044_v28 = vpop.f32.mrb[19].mxu1  ;;  %7013 = vmatprep.subr.bf16.mxu0 %v11386_v7  ;;  %7054 = vmatprep.subr.bf16.mxu1 %v11389_v17  ;;  %v6839_v35 = vpack.c.b16 %v6838_v31, %v6838_v31  ;;  %v11441_v2 = vld [vmem:[%s14509_s9 + $0xce8] ss:$16 sps:$4 sm:$0xff]   ;;  %v11458_v31 = vld [vmem:[%s14509_s9 + $0xd44] ss:$16 sps:$4 sm:$0xff]  }
 0x831   :  { %v11444_v53 = vld [vmem:[%s14509_s9 + $0xd00] ss:$16 sps:$4 sm:$0xff]   ;;  %v11447_v28 = vld [vmem:[%s14509_s9 + $0xd08] ss:$16 sps:$4 sm:$0xff]  }
 0x833   :  { %7014 = vmatpush1.bf16.msra.mxu0 %v11384_v55  ;;  %7055 = vmatpush1.bf16.msra.mxu1 %v11387_v27  ;;  %v11440_v55 = vld [vmem:[%s14509_s9 + $0xce4] ss:$16 sps:$4 sm:$0xff]  }
 0x834   :  { %7015 = vmatprep.subr.bf16.mxu0 %v11392_v37  ;;  %7056 = vmatprep.subr.bf16.mxu1 %v11395_v40  ;;  %v11446_v27 = vld [vmem:[%s14509_s9 + $0xd04] ss:$16 sps:$4 sm:$0xff]   ;;  %v11455_v40 = vld [vmem:[%s14509_s9 + $0xd2c] ss:$16 sps:$4 sm:$0xff]  }
 0x835   :  { %v11452_v37 = vld [vmem:[%s14509_s9 + $0xd24] ss:$16 sps:$4 sm:$0xff]  }
 0x837   :  { %7016 = vmatpush1.bf16.msra.mxu0 %v11390_v46  ;;  %7057 = vmatpush1.bf16.msra.mxu1 %v11393_v38  ;;  %v11450_v46 = vld [vmem:[%s14509_s9 + $0xd20] ss:$16 sps:$4 sm:$0xff]   ;;  %v11453_v38 = vld [vmem:[%s14509_s9 + $0xd28] ss:$16 sps:$4 sm:$0xff]  }
 0x838   :  { %7292 = vmatprep.subr.bf16.mxu0 %v11398_v11  ;;  %7333 = vmatprep.subr.bf16.mxu1 %v11401_v4  ;;  %v11461_v11 = vld [vmem:[%s14509_s9 + $0xd4c] ss:$16 sps:$4 sm:$0xff]   ;;  %v11456_v4 = vld [vmem:[%s14509_s9 + $0xd40] ss:$16 sps:$4 sm:$0xff]  }
 0x83a   :  { %7034 = vmatmul.mubr.bf16.vlgmr.msra.gmra.mrb[44].mxu0 %v6839_v35  ;;  %7075 = vmatmul.mubr.bf16.vlgmr.msra.gmra.mrb[44].mxu1 %v6839_v35  ;;  %v11459_v35 = vld [vmem:[%s14509_s9 + $0xd48] ss:$16 sps:$4 sm:$0xff]  }
 0x83b   :  { %7293 = vmatpush1.bf16.msra.mxu0 %v11396_v16  ;;  %7334 = vmatpush1.bf16.msra.mxu1 %v11399_v20  ;;  %v11464_v16 = vld [vmem:[%s14509_s9 + $0xd64] ss:$16 sps:$4 sm:$0xff]   ;;  %v11467_v20 = vld [vmem:[%s14509_s9 + $0xd6c] ss:$16 sps:$4 sm:$0xff]  }
 0x83c   :  { %7294 = vmatprep.subr.bf16.mxu0 %v11404_v5  ;;  %7335 = vmatprep.subr.bf16.mxu1 %v11407_v50  ;;  %v11462_v5 = vld [vmem:[%s14509_s9 + $0xd60] ss:$16 sps:$4 sm:$0xff]   ;;  %v11465_v50 = vld [vmem:[%s14509_s9 + $0xd68] ss:$16 sps:$4 sm:$0xff]  }
 0x83d   :  { %7324 = vmatprep.mubr.bf16.mxu0 %v11654_v58  ;;  %7365 = vmatprep.mubr.bf16.mxu1 %v11654_v58 }
 0x83f   :  { %7295 = vmatpush1.bf16.msra.mxu0 %v11402_v41  ;;  %7336 = vmatpush1.bf16.msra.mxu1 %v11405_v12  ;;  %v11470_v41 = vld [vmem:[%s14509_s9 + $0xd84] ss:$16 sps:$4 sm:$0xff]   ;;  %v11473_v12 = vld [vmem:[%s14509_s9 + $0xd8c] ss:$16 sps:$4 sm:$0xff]  }
 0x840   :  { %7296 = vmatprep.subr.bf16.mxu0 %v11410_v62  ;;  %7337 = vmatprep.subr.bf16.mxu1 %v11413_v33  ;;  %v7379_v62 = vld [vmem:[#allocation2 + $0x2b] sm:$0x1]  ;;  %v11468_v33 = vld [vmem:[%s14509_s9 + $0xd80] ss:$16 sps:$4 sm:$0xff]  }
 0x843   :  { %7297 = vmatpush1.bf16.msra.mxu0 %v11408_v42  ;;  %7338 = vmatpush1.bf16.msra.mxu1 %v11411_v57  ;;  %v11471_v42 = vld [vmem:[%s14509_s9 + $0xd88] ss:$16 sps:$4 sm:$0xff]   ;;  %v7381_v57 = vpack.c.bf16 %v7379_v62, %v7379_v62 }
 0x844   :  { %7298 = vmatprep.subr.bf16.mxu0 %v11416_v13  ;;  %7339 = vmatprep.subr.bf16.mxu1 %v11419_v22  ;;  %v11476_v13 = vld [vmem:[%s14509_s9 + $0xda4] ss:$16 sps:$4 sm:$0xff]   ;;  %v11479_v22 = vld [vmem:[%s14509_s9 + $0xdac] ss:$16 sps:$4 sm:$0xff]  }
 0x845   :  { %v7418_v15 = vunpack.c.l.b16 %v7381_v57 }
 0x847   :  { %7299 = vmatpush1.bf16.msra.mxu0 %v11414_v24  ;;  %7340 = vmatpush1.bf16.msra.mxu1 %v11417_v30  ;;  %v7378_v24 = vld [vmem:[#allocation2 + $0x13] sm:$0x1] }
 0x848   :  { %7300 = vmatprep.subr.bf16.mxu0 %v11422_v45  ;;  %7341 = vmatprep.subr.bf16.mxu1 %v11425_v47  ;;  %v11474_v30 = vld [vmem:[%s14509_s9 + $0xda0] ss:$16 sps:$4 sm:$0xff]   ;;  %v11477_v45 = vld [vmem:[%s14509_s9 + $0xda8] ss:$16 sps:$4 sm:$0xff]   ;;  %v7380_v47 = vpack.c.bf16 %v7378_v24, %v7378_v24 }
 0x84b   :  { %7301 = vmatpush1.bf16.msra.mxu0 %v11420_v8  ;;  %7342 = vmatpush1.bf16.msra.mxu1 %v11423_v0  ;;  %v11482_v8 = vld [vmem:[%s14509_s9 + $0xdc4] ss:$16 sps:$4 sm:$0xff]   ;;  %v11485_v0 = vld [vmem:[%s14509_s9 + $0xdcc] ss:$16 sps:$4 sm:$0xff]  }
 0x84c   :  { %7302 = vmatprep.subr.bf16.mxu0 %v11428_v21  ;;  %7343 = vmatprep.subr.bf16.mxu1 %v11431_v25 }
 0x84d   :  { %v5289_v48 = vpop.f32.mrb[20].mxu0  ;;  %v5330_v10 = vpop.f32.mrb[20].mxu1 }
 0x84e   :  { %v14031_v19 = vadd.f32 %v5289_v48, %v13920_v61  ;;  %v14034_v26 = vadd.f32 %v5330_v10, %v13923_v29  ;;  %v5291_v49 = vpop.f32.mrb[21].mxu0  ;;  %v5332_v54 = vpop.f32.mrb[21].mxu1  ;;  %v7126_v61 = vunpack.c.l.b16 %v7089_v51  ;;  %v7128_v29 = vrot.slane %v7127_v1, 7  ;;  %v11480_v51 = vld [vmem:[%s14509_s9 + $0xdc0] ss:$16 sps:$4 sm:$0xff]  }
 0x84f   :  { %v14040_v52 = vadd.f32 %v5291_v49, %v13929_v6  ;;  %v14043_v7 = vadd.f32 %v5332_v54, %v13932_v9  ;;  %v5293_v17 = vpop.f32.mrb[22].mxu0  ;;  %v5334_v59 = vpop.f32.mrb[22].mxu1  ;;  %7303 = vmatpush1.bf16.msra.mxu0 %v11426_v23  ;;  %7344 = vmatpush1.bf16.msra.mxu1 %v11429_v3  ;;  %v11443_v6 = vld [vmem:[%s14509_s9 + $0xcec] ss:$16 sps:$4 sm:$0xff]   ;;  %v11438_v9 = vld [vmem:[%s14509_s9 + $0xce0] ss:$16 sps:$4 sm:$0xff]  }
 0x850   :  { %v5294_v39 = vpop.f32.mrb[23].mxu0  ;;  %v5335_v14 = vpop.f32.mrb[23].mxu1  ;;  %7304 = vmatprep.subr.bf16.mxu0 %v11434_v44  ;;  %7345 = vmatprep.subr.bf16.mxu1 %v11437_v34  ;;  %v7129_v18 = vsel %vm3681_vm1, %v7128_v29, %v7126_v61  ;;  %v11483_v10 = vld [vmem:[%s14509_s9 + $0xdc8] ss:$16 sps:$4 sm:$0xff]   ;;  %v11497_v61 = vld [vmem:[%s14509_s9 + $0xe0c] ss:$16 sps:$4 sm:$0xff]  }
 0x851   :  { %v7130_v43 = vpack.c.b16 %v7129_v18, %v7129_v18  ;;  %v11489_v17 = vld [vmem:[%s14509_s9 + $0xde8] ss:$16 sps:$4 sm:$0xff]   ;;  %v11492_v39 = vld [vmem:[%s14509_s9 + $0xe00] ss:$16 sps:$4 sm:$0xff]   ;;  %v11506_v18 = vld [vmem:[%s14509_s9 + $0xe44] ss:$16 sps:$4 sm:$0xff]  }
 0x852   :  { %v11495_v14 = vld [vmem:[%s14509_s9 + $0xe08] ss:$16 sps:$4 sm:$0xff]  }
 0x853   :  { %7305 = vmatpush1.bf16.msra.mxu0 %v11432_v60  ;;  %7346 = vmatpush1.bf16.msra.mxu1 %v11435_v63  ;;  %v11488_v60 = vld [vmem:[%s14509_s9 + $0xde4] ss:$16 sps:$4 sm:$0xff]  }
 0x854   :  { %7306 = vmatprep.subr.bf16.mxu0 %v11440_v55  ;;  %7347 = vmatprep.subr.bf16.mxu1 %v11443_v6  ;;  %v11494_v63 = vld [vmem:[%s14509_s9 + $0xe04] ss:$16 sps:$4 sm:$0xff]   ;;  %v11503_v6 = vld [vmem:[%s14509_s9 + $0xe2c] ss:$16 sps:$4 sm:$0xff]  }
 0x855   :  { %v11500_v55 = vld [vmem:[%s14509_s9 + $0xe24] ss:$16 sps:$4 sm:$0xff]  }
 0x857   :  { %7307 = vmatpush1.bf16.msra.mxu0 %v11438_v9  ;;  %7348 = vmatpush1.bf16.msra.mxu1 %v11441_v2  ;;  %v11498_v9 = vld [vmem:[%s14509_s9 + $0xe20] ss:$16 sps:$4 sm:$0xff]   ;;  %v11501_v2 = vld [vmem:[%s14509_s9 + $0xe28] ss:$16 sps:$4 sm:$0xff]  }
 0x858   :  { %7583 = vmatprep.subr.bf16.mxu0 %v11446_v27  ;;  %7624 = vmatprep.subr.bf16.mxu1 %v11449_v32  ;;  %v11509_v27 = vld [vmem:[%s14509_s9 + $0xe4c] ss:$16 sps:$4 sm:$0xff]   ;;  %v11504_v32 = vld [vmem:[%s14509_s9 + $0xe40] ss:$16 sps:$4 sm:$0xff]  }
 0x85a   :  { %7325 = vmatmul.mubr.bf16.vlgmr.msra.gmra.mrb[48].mxu0 %v7130_v43  ;;  %7366 = vmatmul.mubr.bf16.vlgmr.msra.gmra.mrb[48].mxu1 %v7130_v43  ;;  %v11507_v43 = vld [vmem:[%s14509_s9 + $0xe48] ss:$16 sps:$4 sm:$0xff]  }
 0x85b   :  { %7584 = vmatpush1.bf16.msra.mxu0 %v11444_v53  ;;  %7625 = vmatpush1.bf16.msra.mxu1 %v11447_v28  ;;  %v11512_v53 = vld [vmem:[%s14509_s9 + $0xe64] ss:$16 sps:$4 sm:$0xff]   ;;  %v11515_v28 = vld [vmem:[%s14509_s9 + $0xe6c] ss:$16 sps:$4 sm:$0xff]  }
 0x85c   :  { %7585 = vmatprep.subr.bf16.mxu0 %v11452_v37  ;;  %7626 = vmatprep.subr.bf16.mxu1 %v11455_v40  ;;  %v11510_v37 = vld [vmem:[%s14509_s9 + $0xe60] ss:$16 sps:$4 sm:$0xff]   ;;  %v11513_v40 = vld [vmem:[%s14509_s9 + $0xe68] ss:$16 sps:$4 sm:$0xff]  }
 0x85d   :  { %7615 = vmatprep.mubr.bf16.mxu0 %v11654_v58  ;;  %7656 = vmatprep.mubr.bf16.mxu1 %v11654_v58 }
 0x85f   :  { %7586 = vmatpush1.bf16.msra.mxu0 %v11450_v46  ;;  %7627 = vmatpush1.bf16.msra.mxu1 %v11453_v38  ;;  %v11518_v46 = vld [vmem:[%s14509_s9 + $0xe84] ss:$16 sps:$4 sm:$0xff]   ;;  %v11521_v38 = vld [vmem:[%s14509_s9 + $0xe8c] ss:$16 sps:$4 sm:$0xff]  }
 0x860   :  { %7587 = vmatprep.subr.bf16.mxu0 %v11458_v31  ;;  %7628 = vmatprep.subr.bf16.mxu1 %v11461_v11  ;;  %v7670_v31 = vld [vmem:[#allocation2 + $0x2c] sm:$0x1]  ;;  %v11516_v11 = vld [vmem:[%s14509_s9 + $0xe80] ss:$16 sps:$4 sm:$0xff]  }
 0x863   :  { %7588 = vmatpush1.bf16.msra.mxu0 %v11456_v4  ;;  %7629 = vmatpush1.bf16.msra.mxu1 %v11459_v35  ;;  %v11519_v4 = vld [vmem:[%s14509_s9 + $0xe88] ss:$16 sps:$4 sm:$0xff]   ;;  %v7672_v35 = vpack.c.bf16 %v7670_v31, %v7670_v31  ;;  %v11578_v31 = vld [vmem:[%s14509_s9 + $0xfc4] ss:$16 sps:$4 sm:$0xff]  }
 0x864   :  { %7589 = vmatprep.subr.bf16.mxu0 %v11464_v16  ;;  %7630 = vmatprep.subr.bf16.mxu1 %v11467_v20  ;;  %v11524_v16 = vld [vmem:[%s14509_s9 + $0xea4] ss:$16 sps:$4 sm:$0xff]   ;;  %v11527_v20 = vld [vmem:[%s14509_s9 + $0xeac] ss:$16 sps:$4 sm:$0xff]  }
 0x865   :  { %v7709_v62 = vunpack.c.l.b16 %v7672_v35 }
 0x867   :  { %7590 = vmatpush1.bf16.msra.mxu0 %v11462_v5  ;;  %7631 = vmatpush1.bf16.msra.mxu1 %v11465_v50  ;;  %v7669_v5 = vld [vmem:[#allocation2 + $0x14] sm:$0x1]  ;;  %v11522_v50 = vld [vmem:[%s14509_s9 + $0xea0] ss:$16 sps:$4 sm:$0xff]  }
 0x868   :  { %7591 = vmatprep.subr.bf16.mxu0 %v11470_v41  ;;  %7632 = vmatprep.subr.bf16.mxu1 %v11473_v12  ;;  %v11525_v41 = vld [vmem:[%s14509_s9 + $0xea8] ss:$16 sps:$4 sm:$0xff]   ;;  %v7671_v12 = vpack.c.bf16 %v7669_v5, %v7669_v5 }
 0x86b   :  { %7592 = vmatpush1.bf16.msra.mxu0 %v11468_v33  ;;  %7633 = vmatpush1.bf16.msra.mxu1 %v11471_v42  ;;  %v11530_v33 = vld [vmem:[%s14509_s9 + $0xec4] ss:$16 sps:$4 sm:$0xff]   ;;  %v11533_v42 = vld [vmem:[%s14509_s9 + $0xecc] ss:$16 sps:$4 sm:$0xff]  }
 0x86c   :  { %7593 = vmatprep.subr.bf16.mxu0 %v11476_v13  ;;  %7634 = vmatprep.subr.bf16.mxu1 %v11479_v22 }
 0x86d   :  { %v5580_v56 = vpop.f32.mrb[24].mxu0  ;;  %v5621_v21 = vpop.f32.mrb[24].mxu1 }
 0x86e   :  { %v14142_v25 = vadd.f32 %v5580_v56, %v14031_v19  ;;  %v14145_v36 = vadd.f32 %v5621_v21, %v14034_v26  ;;  %v5582_v23 = vpop.f32.mrb[25].mxu0  ;;  %v5623_v3 = vpop.f32.mrb[25].mxu1  ;;  %v7417_v19 = vunpack.c.l.b16 %v7380_v47  ;;  %v7419_v26 = vrot.slane %v7418_v15, 7  ;;  %v11528_v47 = vld [vmem:[%s14509_s9 + $0xec0] ss:$16 sps:$4 sm:$0xff]  }
 0x86f   :  { %v14151_v1 = vadd.f32 %v5582_v23, %v14040_v52  ;;  %v14154_v44 = vadd.f32 %v5623_v3, %v14043_v7  ;;  %v5584_v34 = vpop.f32.mrb[26].mxu0  ;;  %v5625_v48 = vpop.f32.mrb[26].mxu1  ;;  %7594 = vmatpush1.bf16.msra.mxu0 %v11474_v30  ;;  %7635 = vmatpush1.bf16.msra.mxu1 %v11477_v45  ;;  %v11491_v52 = vld [vmem:[%s14509_s9 + $0xdec] ss:$16 sps:$4 sm:$0xff]   ;;  %v11486_v7 = vld [vmem:[%s14509_s9 + $0xde0] ss:$16 sps:$4 sm:$0xff]  }
 0x870   :  { %v5585_v49 = vpop.f32.mrb[27].mxu0  ;;  %v5626_v54 = vpop.f32.mrb[27].mxu1  ;;  %7595 = vmatprep.subr.bf16.mxu0 %v11482_v8  ;;  %7636 = vmatprep.subr.bf16.mxu1 %v11485_v0  ;;  %v7420_v59 = vsel %vm3681_vm1, %v7419_v26, %v7417_v19  ;;  %v11531_v21 = vld [vmem:[%s14509_s9 + $0xec8] ss:$16 sps:$4 sm:$0xff]   ;;  %v11545_v19 = vld [vmem:[%s14509_s9 + $0xf0c] ss:$16 sps:$4 sm:$0xff]  }
 0x871   :  { %v7421_v29 = vpack.c.b16 %v7420_v59, %v7420_v59  ;;  %v11537_v34 = vld [vmem:[%s14509_s9 + $0xee8] ss:$16 sps:$4 sm:$0xff]   ;;  %v11540_v49 = vld [vmem:[%s14509_s9 + $0xf00] ss:$16 sps:$4 sm:$0xff]   ;;  %v11554_v59 = vld [vmem:[%s14509_s9 + $0xf44] ss:$16 sps:$4 sm:$0xff]  }
 0x872   :  { %v11543_v54 = vld [vmem:[%s14509_s9 + $0xf08] ss:$16 sps:$4 sm:$0xff]  }
 0x873   :  { %7596 = vmatpush1.bf16.msra.mxu0 %v11480_v51  ;;  %7637 = vmatpush1.bf16.msra.mxu1 %v11483_v10  ;;  %v11536_v51 = vld [vmem:[%s14509_s9 + $0xee4] ss:$16 sps:$4 sm:$0xff]  }
 0x874   :  { %7597 = vmatprep.subr.bf16.mxu0 %v11488_v60  ;;  %7638 = vmatprep.subr.bf16.mxu1 %v11491_v52  ;;  %v11542_v10 = vld [vmem:[%s14509_s9 + $0xf04] ss:$16 sps:$4 sm:$0xff]   ;;  %v11551_v52 = vld [vmem:[%s14509_s9 + $0xf2c] ss:$16 sps:$4 sm:$0xff]  }
 0x875   :  { %v11548_v60 = vld [vmem:[%s14509_s9 + $0xf24] ss:$16 sps:$4 sm:$0xff]  }
 0x877   :  { %7598 = vmatpush1.bf16.msra.mxu0 %v11486_v7  ;;  %7639 = vmatpush1.bf16.msra.mxu1 %v11489_v17  ;;  %v11546_v7 = vld [vmem:[%s14509_s9 + $0xf20] ss:$16 sps:$4 sm:$0xff]   ;;  %v11549_v17 = vld [vmem:[%s14509_s9 + $0xf28] ss:$16 sps:$4 sm:$0xff]  }
 0x878   :  { %7874 = vmatprep.subr.bf16.mxu0 %v11494_v63  ;;  %7915 = vmatprep.subr.bf16.mxu1 %v11497_v61  ;;  %v11557_v63 = vld [vmem:[%s14509_s9 + $0xf4c] ss:$16 sps:$4 sm:$0xff]   ;;  %v11552_v61 = vld [vmem:[%s14509_s9 + $0xf40] ss:$16 sps:$4 sm:$0xff]  }
 0x87a   :  { %7616 = vmatmul.mubr.bf16.vlgmr.msra.gmra.mrb[52].mxu0 %v7421_v29  ;;  %7657 = vmatmul.mubr.bf16.vlgmr.msra.gmra.mrb[52].mxu1 %v7421_v29  ;;  %v11555_v29 = vld [vmem:[%s14509_s9 + $0xf48] ss:$16 sps:$4 sm:$0xff]  }
 0x87b   :  { %7875 = vmatpush1.bf16.msra.mxu0 %v11492_v39  ;;  %7916 = vmatpush1.bf16.msra.mxu1 %v11495_v14  ;;  %v11560_v39 = vld [vmem:[%s14509_s9 + $0xf64] ss:$16 sps:$4 sm:$0xff]   ;;  %v11558_v14 = vld [vmem:[%s14509_s9 + $0xf60] ss:$16 sps:$4 sm:$0xff]  }
 0x87c   :  { %7876 = vmatprep.subr.bf16.mxu0 %v11500_v55  ;;  %7917 = vmatprep.subr.bf16.mxu1 %v11503_v6  ;;  %v11561_v55 = vld [vmem:[%s14509_s9 + $0xf68] ss:$16 sps:$4 sm:$0xff]   ;;  %v11566_v6 = vld [vmem:[%s14509_s9 + $0xf84] ss:$16 sps:$4 sm:$0xff]  }
 0x87d   :  { %7906 = vmatprep.mubr.bf16.mxu0 %v11654_v58  ;;  %7947 = vmatprep.mubr.bf16.mxu1 %v11654_v58 }
 0x87f   :  { %7877 = vmatpush1.bf16.msra.mxu0 %v11498_v9  ;;  %7918 = vmatpush1.bf16.msra.mxu1 %v11501_v2  ;;  %v11569_v9 = vld [vmem:[%s14509_s9 + $0xf8c] ss:$16 sps:$4 sm:$0xff]  }
 0x880   :  { %7878 = vmatprep.subr.bf16.mxu0 %v11506_v18  ;;  %7919 = vmatprep.subr.bf16.mxu1 %v11509_v27  ;;  %v7961_v2 = vld [vmem:[#allocation2 + $0x2d] sm:$0x1]  ;;  %v11564_v18 = vld [vmem:[%s14509_s9 + $0xf80] ss:$16 sps:$4 sm:$0xff]   ;;  %v11567_v27 = vld [vmem:[%s14509_s9 + $0xf88] ss:$16 sps:$4 sm:$0xff]  }
 0x883   :  { %7879 = vmatpush1.bf16.msra.mxu0 %v11504_v32  ;;  %7920 = vmatpush1.bf16.msra.mxu1 %v11507_v43  ;;  %v7963_v32 = vpack.c.bf16 %v7961_v2, %v7961_v2  ;;  %v11572_v43 = vld [vmem:[%s14509_s9 + $0xfa4] ss:$16 sps:$4 sm:$0xff]   ;;  %v11593_v2 = vld [vmem:[%s14511_s11 + $0xc8] sm:$0xff]  }
 0x884   :  { %7880 = vmatprep.subr.bf16.mxu0 %v11512_v53  ;;  %7921 = vmatprep.subr.bf16.mxu1 %v11515_v28  ;;  %v11575_v53 = vld [vmem:[%s14509_s9 + $0xfac] ss:$16 sps:$4 sm:$0xff]   ;;  %v7960_v28 = vld [vmem:[#allocation2 + $0x15] sm:$0x1] }
 0x887   :  { %7881 = vmatpush1.bf16.msra.mxu0 %v11510_v37  ;;  %7922 = vmatpush1.bf16.msra.mxu1 %v11513_v40  ;;  %v11570_v37 = vld [vmem:[%s14509_s9 + $0xfa0] ss:$16 sps:$4 sm:$0xff]   ;;  %v11573_v40 = vld [vmem:[%s14509_s9 + $0xfa8] ss:$16 sps:$4 sm:$0xff]  }
 0x888   :  { %7882 = vmatprep.subr.bf16.mxu0 %v11518_v46  ;;  %7923 = vmatprep.subr.bf16.mxu1 %v11521_v38  ;;  %v7962_v46 = vpack.c.bf16 %v7960_v28, %v7960_v28  ;;  %v8000_v38 = vunpack.c.l.b16 %v7963_v32  ;;  %v11596_v32 = vld [vmem:[%s14511_s11 + $0x50] sm:$0xff]  }
 0x889   :  { %v11599_v28 = vld [vmem:[%s14511_s11 + $0x90] sm:$0xff]  }
 0x88b   :  { %7883 = vmatpush1.bf16.msra.mxu0 %v11516_v11  ;;  %7924 = vmatpush1.bf16.msra.mxu1 %v11519_v4  ;;  %v11581_v11 = vld [vmem:[%s14509_s9 + $0xfcc] ss:$16 sps:$4 sm:$0xff]  }
 0x88c   :  { %7884 = vmatprep.subr.bf16.mxu0 %v11524_v16  ;;  %7925 = vmatprep.subr.bf16.mxu1 %v11527_v20 }
 0x88d   :  { %v5871_v57 = vpop.f32.mrb[28].mxu0  ;;  %v5912_v13 = vpop.f32.mrb[28].mxu1 }
 0x88e   :  { %v14253_v22 = vadd.f32 %v5871_v57, %v14142_v25  ;;  %v14256_v24 = vadd.f32 %v5912_v13, %v14145_v36  ;;  %v5873_v30 = vpop.f32.mrb[29].mxu0  ;;  %v5914_v45 = vpop.f32.mrb[29].mxu1  ;;  %v7708_v25 = vunpack.c.l.b16 %v7671_v12  ;;  %v7710_v36 = vrot.slane %v7709_v62, 7  ;;  %v11579_v57 = vld [vmem:[%s14509_s9 + $0xfc8] ss:$16 sps:$4 sm:$0xff]  }
 0x88f   :  { %v14262_v15 = vadd.f32 %v5873_v30, %v14151_v1  ;;  %v14265_v8 = vadd.f32 %v5914_v45, %v14154_v44  ;;  %v5875_v0 = vpop.f32.mrb[30].mxu0  ;;  %v5916_v56 = vpop.f32.mrb[30].mxu1  ;;  %7885 = vmatpush1.bf16.msra.mxu0 %v11522_v50  ;;  %7926 = vmatpush1.bf16.msra.mxu1 %v11525_v41  ;;  %v11539_v1 = vld [vmem:[%s14509_s9 + $0xeec] ss:$16 sps:$4 sm:$0xff]   ;;  %v11534_v44 = vld [vmem:[%s14509_s9 + $0xee0] ss:$16 sps:$4 sm:$0xff]   ;;  %v7999_v13 = vunpack.c.l.b16 %v7962_v46 }
 0x890   :  { %v5876_v23 = vpop.f32.mrb[31].mxu0  ;;  %v5917_v3 = vpop.f32.mrb[31].mxu1  ;;  %7886 = vmatprep.subr.bf16.mxu0 %v11530_v33  ;;  %7927 = vmatprep.subr.bf16.mxu1 %v11533_v42  ;;  %v7711_v48 = vsel %vm3681_vm1, %v7710_v36, %v7708_v25  ;;  %v11576_v41 = vld [vmem:[%s14509_s9 + $0xfc0] ss:$16 sps:$4 sm:$0xff]   ;;  %v11584_v45 = vld [vmem:[%s14509_s9 + $0xfe4] ss:$16 sps:$4 sm:$0xff]  }
 0x891   :  { %v7712_v26 = vpack.c.b16 %v7711_v48, %v7711_v48  ;;  %v11602_v46 = vld [vmem:[%s14511_s11 + $0x18] sm:$0xff]  }
 0x893   :  { %7887 = vmatpush1.bf16.msra.mxu0 %v11528_v47  ;;  %7928 = vmatpush1.bf16.msra.mxu1 %v11531_v21  ;;  %v11587_v47 = vld [vmem:[%s14509_s9 + $0xfec] ss:$16 sps:$4 sm:$0xff]  }
 0x894   :  { %7888 = vmatprep.subr.bf16.mxu0 %v11536_v51  ;;  %7929 = vmatprep.subr.bf16.mxu1 %v11539_v1 }
 0x897   :  { %7889 = vmatpush1.bf16.msra.mxu0 %v11534_v44  ;;  %7930 = vmatpush1.bf16.msra.mxu1 %v11537_v34 }
 0x898   :  { %8165 = vmatprep.subr.bf16.mxu0 %v11542_v10  ;;  %8206 = vmatprep.subr.bf16.mxu1 %v11545_v19 }
 0x89a   :  { %7907 = vmatmul.mubr.bf16.vlgmr.msra.gmra.mrb[56].mxu0 %v7712_v26  ;;  %7948 = vmatmul.mubr.bf16.vlgmr.msra.gmra.mrb[56].mxu1 %v7712_v26 }
 0x89b   :  { %8166 = vmatpush1.bf16.msra.mxu0 %v11540_v49  ;;  %8207 = vmatpush1.bf16.msra.mxu1 %v11543_v54 }
 0x89c   :  { %8167 = vmatprep.subr.bf16.mxu0 %v11548_v60  ;;  %8208 = vmatprep.subr.bf16.mxu1 %v11551_v52 }
 0x89d   :  { %8197 = vmatprep.mubr.bf16.mxu0 %v11654_v58  ;;  %8238 = vmatprep.mubr.bf16.mxu1 %v11654_v58  ;;  %v11563_v58 = vld [vmem:[%s14509_s9 + $0xf6c] ss:$16 sps:$4 sm:$0xff]  }
 0x89f   :  { %8168 = vmatpush1.bf16.msra.mxu0 %v11546_v7  ;;  %8209 = vmatpush1.bf16.msra.mxu1 %v11549_v17 }
 0x8a0   :  { %8169 = vmatprep.subr.bf16.mxu0 %v11554_v59  ;;  %8210 = vmatprep.subr.bf16.mxu1 %v11557_v63 }
 0x8a3   :  { %8170 = vmatpush1.bf16.msra.mxu0 %v11552_v61  ;;  %8211 = vmatpush1.bf16.msra.mxu1 %v11555_v29 }
 0x8a4   :  { %8171 = vmatprep.subr.bf16.mxu0 %v11560_v39  ;;  %8212 = vmatprep.subr.bf16.mxu1 %v11563_v58  ;;  %v11588_v58 = vld [vmem:[%s14511_s11 + $0x40] sm:$0xff]  }
 0x8a7   :  { %8172 = vmatpush1.bf16.msra.mxu0 %v11558_v14  ;;  %8213 = vmatpush1.bf16.msra.mxu1 %v11561_v55  ;;  %v11589_v14 = vld [vmem:[%s14511_s11 + $0xc0] sm:$0xff]  }
 0x8a8   :  { %8173 = vmatprep.subr.bf16.mxu0 %v11566_v6  ;;  %8214 = vmatprep.subr.bf16.mxu1 %v11569_v9  ;;  %v11590_v55 = vld [vmem:[%s14511_s11] sm:$0xff]   ;;  %v11592_v9 = vld [vmem:[%s14511_s11 + $0x48] sm:$0xff]  }
 0x8a9   :  { %v11591_v6 = vld [vmem:[%s14511_s11 + $0x80] sm:$0xff]  }
 0x8ab   :  { %8174 = vmatpush1.bf16.msra.mxu0 %v11564_v18  ;;  %8215 = vmatpush1.bf16.msra.mxu1 %v11567_v27  ;;  %v11594_v18 = vld [vmem:[%s14511_s11 + $0x8] sm:$0xff]  }
 0x8ac   :  { %8175 = vmatprep.subr.bf16.mxu0 %v11572_v43  ;;  %8216 = vmatprep.subr.bf16.mxu1 %v11575_v53  ;;  %v11595_v27 = vld [vmem:[%s14511_s11 + $0x88] sm:$0xff]   ;;  %v11597_v43 = vld [vmem:[%s14511_s11 + $0xd0] sm:$0xff]  }
 0x8ad   :  { %v6162_v4 = vpop.f32.mrb[32].mxu0  ;;  %v6203_v35 = vpop.f32.mrb[32].mxu1  ;;  %v11598_v53 = vld [vmem:[%s14511_s11 + $0x10] sm:$0xff]  }
 0x8ae   :  { %v6210_v16 = vadd.f32 %v6162_v4, %v14253_v22  ;;  %v6212_v20 = vadd.f32 %v6203_v35, %v14256_v24  ;;  %v6164_v5 = vpop.f32.mrb[33].mxu0  ;;  %v6205_v50 = vpop.f32.mrb[33].mxu1  ;;  %v8001_v22 = vrot.slane %v8000_v38, 7  ;;  %v11603_v38 = vld [vmem:[%s14511_s11 + $0x98] sm:$0xff]   ;;  %v11606_v4 = vld [vmem:[%s14511_s11 + $0x20] sm:$0xff]  }
 0x8af   :  { %v6211_v12 = vadd.f32 %v6164_v5, %v14262_v15  ;;  %v6213_v62 = vadd.f32 %v6205_v50, %v14265_v8  ;;  %v6166_v33 = vpop.f32.mrb[34].mxu0  ;;  %v6207_v42 = vpop.f32.mrb[34].mxu1  ;;  %8176 = vmatpush1.bf16.msra.mxu0 %v11570_v37  ;;  %8217 = vmatpush1.bf16.msra.mxu1 %v11573_v40  ;;  %v11582_v15 = vld [vmem:[%s14509_s9 + $0xfe0] ss:$16 sps:$4 sm:$0xff]   ;;  %v11585_v8 = vld [vmem:[%s14509_s9 + $0xfe8] ss:$16 sps:$4 sm:$0xff]  }
 0x8b0   :  { %v6167_v24 = vpop.f32.mrb[35].mxu0  ;;  %v6208_v30 = vpop.f32.mrb[35].mxu1  ;;  %8177 = vmatprep.subr.bf16.mxu0 %v11578_v31  ;;  %8218 = vmatprep.subr.bf16.mxu1 %v11581_v11  ;;  %v8002_v0 = vsel %vm3681_vm1, %v8001_v22, %v7999_v13  ;;  %v11600_v37 = vld [vmem:[%s14511_s11 + $0x58] sm:$0xff]   ;;  %v11604_v31 = vld [vmem:[%s14511_s11 + $0x60] sm:$0xff]   ;;  %v11610_v5 = vld [vmem:[%s14511_s11 + $0x28] sm:$0xff]  }
 0x8b1   :  { %v8003_v56 = vpack.c.b16 %v8002_v0, %v8002_v0  ;;  %v11601_v40 = vld [vmem:[%s14511_s11 + $0xd8] sm:$0xff]   ;;  %v11605_v11 = vld [vmem:[%s14511_s11 + $0xe0] sm:$0xff]   ;;  %v11611_v50 = vld [vmem:[%s14511_s11 + $0xa8] sm:$0xff]  }
 0x8b2   :  { %v11607_v35 = vld [vmem:[%s14511_s11 + $0xa0] sm:$0xff]   ;;  %v11612_v13 = vld [vmem:[%s14511_s11 + $0x70] sm:$0xff]  }
 0x8b3   :  { %8178 = vmatpush1.bf16.msra.mxu0 %v11576_v41  ;;  %8219 = vmatpush1.bf16.msra.mxu1 %v11579_v57  ;;  %v11613_v22 = vld [vmem:[%s14511_s11 + $0xf0] sm:$0xff]  }
 0x8b4   :  { %8179 = vmatprep.subr.bf16.mxu0 %v11584_v45  ;;  %8220 = vmatprep.subr.bf16.mxu1 %v11587_v47 }
 0x8b7   :  { %8180 = vmatpush1.bf16.msra.mxu0 %v11582_v15  ;;  %8221 = vmatpush1.bf16.msra.mxu1 %v11585_v8  ;;  %v11614_v15 = vld [vmem:[%s14511_s11 + $0x30] sm:$0xff]  }
 0x8b8   :  { %10192 = vmatprep.subr.bf16.mxu0 %v11588_v58  ;;  %10214 = vmatprep.subr.bf16.mxu1 %v11589_v14  ;;  %v11615_v8 = vld [vmem:[%s14511_s11 + $0xb0] sm:$0xff]  }
 0x8ba   :  { %8198 = vmatmul.mubr.bf16.vlgmr.msra.gmra.mrb[60].mxu0 %v8003_v56  ;;  %8239 = vmatmul.mubr.bf16.vlgmr.msra.gmra.mrb[60].mxu1 %v8003_v56 }
 0x8bb   :  { %10193 = vmatpush3.bf16.msra.mxu0 %v11590_v55  ;;  %10215 = vmatpush3.bf16.msra.mxu1 %v11591_v6 }
 0x8bc   :  { %10194 = vmatprep.subr.bf16.mxu0 %v11592_v9  ;;  %10216 = vmatprep.subr.bf16.mxu1 %v11593_v2 }
 0x8bf   :  { %10195 = vmatpush3.bf16.msra.mxu0 %v11594_v18  ;;  %10217 = vmatpush3.bf16.msra.mxu1 %v11595_v27 }
 0x8c0   :  { %10196 = vmatprep.subr.bf16.mxu0 %v11596_v32  ;;  %10218 = vmatprep.subr.bf16.mxu1 %v11597_v43 }
 0x8c3   :  { %10197 = vmatpush3.bf16.msra.mxu0 %v11598_v53  ;;  %10219 = vmatpush3.bf16.msra.mxu1 %v11599_v28 }
 0x8c4   :  { %10198 = vmatprep.subr.bf16.mxu0 %v11600_v37  ;;  %10220 = vmatprep.subr.bf16.mxu1 %v11601_v40 }
 0x8c7   :  { %10199 = vmatpush3.bf16.msra.mxu0 %v11602_v46  ;;  %10221 = vmatpush3.bf16.msra.mxu1 %v11603_v38 }
 0x8c8   :  { %10200 = vmatprep.subr.bf16.mxu0 %v11604_v31  ;;  %10222 = vmatprep.subr.bf16.mxu1 %v11605_v11  ;;  %v8253_v31 = vlaneseq }
 0x8ca   :  { %v8254_v11 = vshrl.u32 %v8253_v31, 7 }
 0x8cb   :  { %10201 = vmatpush3.bf16.msra.mxu0 %v11606_v4  ;;  %10223 = vmatpush3.bf16.msra.mxu1 %v11607_v35 }
 0x8cc   :  { %v8255_v4 = vsub.s32 0, %v8254_v11  ;;  %v8263_v35 = vsub.s32 2, %v8254_v11 }
 0x8cd   :  { %v6453_v21 = vpop.f32.mrb[36].mxu0  ;;  %v6494_v25 = vpop.f32.mrb[36].mxu1 }
 0x8ce   :  { %v6501_v36 = vadd.f32 %v6453_v21, %v6210_v16  ;;  %v6503_v23 = vadd.f32 %v6494_v25, %v6212_v20  ;;  %v6455_v3 = vpop.f32.mrb[37].mxu0  ;;  %v6496_v51 = vpop.f32.mrb[37].mxu1  ;;  %v11608_v16 = vld [vmem:[%s14511_s11 + $0x68] sm:$0xff]   ;;  %v11616_v21 = vld [vmem:[%s14511_s11 + $0x78] sm:$0xff]  }
 0x8cf   :  { %v6502_v1 = vadd.f32 %v6455_v3, %v6211_v12  ;;  %v6504_v44 = vadd.f32 %v6496_v51, %v6213_v62  ;;  %v6457_v34 = vpop.f32.mrb[38].mxu0  ;;  %v6498_v48 = vpop.f32.mrb[38].mxu1  ;;  %v11609_v20 = vld [vmem:[%s14511_s11 + $0xe8] sm:$0xff]   ;;  %10202 = vmatprep.subr.bf16.mxu0 %v11608_v16  ;;  %v11617_v25 = vld [vmem:[%s14511_s11 + $0xf8] sm:$0xff]   ;;  %v8251_v16 = vld [vmem:[%s14510_s10] sm:$0xf] }
 0x8d0   :  { %v6458_v10 = vpop.f32.mrb[39].mxu0  ;;  %v6499_v19 = vpop.f32.mrb[39].mxu1  ;;  %10224 = vmatprep.subr.bf16.mxu1 %v11609_v20  ;;  %10203 = vmatpush3.bf16.msra.mxu0 %v11610_v5  ;;  %v8259_v20 = vsub.s32 1, %v8254_v11  ;;  %v8267_v5 = vsub.s32 3, %v8254_v11 }
 0x8d1   :  { %10225 = vmatpush3.bf16.msra.mxu1 %v11611_v50  ;;  %10204 = vmatprep.subr.bf16.mxu0 %v11612_v13  ;;  %v8256_v50 = vrot.slane %v8251_v16, %v8255_v4 }
 0x8d2   :  { %10226 = vmatprep.subr.bf16.mxu1 %v11613_v22 }
 0x8d4   :  { %10205 = vmatpush3.bf16.msra.mxu0 %v11614_v15 }
 0x8d5   :  { %10227 = vmatpush3.bf16.msra.mxu1 %v11615_v8  ;;  %10206 = vmatprep.subr.bf16.mxu0 %v11616_v21 }
 0x8d6   :  { %10228 = vmatprep.subr.bf16.mxu1 %v11617_v25 }
 0x8ed   :  { %v6744_v26 = vpop.f32.mrb[40].mxu0  ;;  %v6785_v49 = vpop.f32.mrb[40].mxu1 }
 0x8ee   :  { %v6792_v54 = vadd.f32 %v6744_v26, %v6501_v36  ;;  %v6794_v60 = vadd.f32 %v6785_v49, %v6503_v23  ;;  %v6746_v52 = vpop.f32.mrb[41].mxu0  ;;  %v6787_v7 = vpop.f32.mrb[41].mxu1  ;;  %v11618_v36 = vld [vmem:[%s14511_s11 + $0x38] sm:$0xff]  }
 0x8ef   :  { %v6793_v17 = vadd.f32 %v6746_v52, %v6502_v1  ;;  %v6795_v59 = vadd.f32 %v6787_v7, %v6504_v44  ;;  %v6748_v63 = vpop.f32.mrb[42].mxu0  ;;  %v6789_v61 = vpop.f32.mrb[42].mxu1  ;;  %v11619_v23 = vld [vmem:[%s14511_s11 + $0xb8] sm:$0xff]   ;;  %10207 = vmatpush3.bf16.msra.mxu0 %v11618_v36 }
 0x8f0   :  { %v6749_v29 = vpop.f32.mrb[43].mxu0  ;;  %v6790_v39 = vpop.f32.mrb[43].mxu1  ;;  %10229 = vmatpush3.bf16.msra.mxu1 %v11619_v23 }
 0x90d   :  { %v7035_v41 = vpop.f32.mrb[44].mxu0  ;;  %v7076_v12 = vpop.f32.mrb[44].mxu1 }
 0x90e   :  { %v7083_v62 = vadd.f32 %v7035_v41, %v6792_v54  ;;  %v7085_v33 = vadd.f32 %v7076_v12, %v6794_v60  ;;  %v7037_v42 = vpop.f32.mrb[45].mxu0  ;;  %v7078_v57 = vpop.f32.mrb[45].mxu1  ;;  %v8264_v41 = vrot.slane %v8251_v16, %v8263_v35 }
 0x90f   :  { %v7084_v24 = vadd.f32 %v7037_v42, %v6793_v17  ;;  %v7086_v30 = vadd.f32 %v7078_v57, %v6795_v59  ;;  %v7039_v45 = vpop.f32.mrb[46].mxu0  ;;  %v7080_v47 = vpop.f32.mrb[46].mxu1  ;;  %v8268_v42 = vrot.slane %v8251_v16, %v8267_v5 }
 0x910   :  { %v7040_v0 = vpop.f32.mrb[47].mxu0  ;;  %v7081_v56 = vpop.f32.mrb[47].mxu1 }
 0x92d   :  { %v7326_v3 = vpop.f32.mrb[48].mxu0  ;;  %v7367_v51 = vpop.f32.mrb[48].mxu1 }
 0x92e   :  { %v7374_v1 = vadd.f32 %v7326_v3, %v7083_v62  ;;  %v7376_v44 = vadd.f32 %v7367_v51, %v7085_v33  ;;  %v7328_v34 = vpop.f32.mrb[49].mxu0  ;;  %v7369_v48 = vpop.f32.mrb[49].mxu1  ;;  %v8260_v33 = vrot.slane %v8251_v16, %v8259_v20 }
 0x92f   :  { %v7375_v10 = vadd.f32 %v7328_v34, %v7084_v24  ;;  %v7377_v19 = vadd.f32 %v7369_v48, %v7086_v30  ;;  %v7330_v26 = vpop.f32.mrb[50].mxu0  ;;  %v7371_v49 = vpop.f32.mrb[50].mxu1 }
 0x930   :  { %v7331_v54 = vpop.f32.mrb[51].mxu0  ;;  %v7372_v60 = vpop.f32.mrb[51].mxu1  ;;  %v9931_v49 = vld [vmem:[%s14512_s12] ss:$0 sm:$0xff] }
 0x94d   :  { %v7617_v52 = vpop.f32.mrb[52].mxu0  ;;  %v7658_v7 = vpop.f32.mrb[52].mxu1 }
 0x94e   :  { %v7665_v17 = vadd.f32 %v7617_v52, %v7374_v1  ;;  %v7667_v59 = vadd.f32 %v7658_v7, %v7376_v44  ;;  %v7619_v63 = vpop.f32.mrb[53].mxu0  ;;  %v7660_v61 = vpop.f32.mrb[53].mxu1 }
 0x94f   :  { %v7666_v29 = vadd.f32 %v7619_v63, %v7375_v10  ;;  %v7668_v39 = vadd.f32 %v7660_v61, %v7377_v19  ;;  %v7621_v58 = vpop.f32.mrb[54].mxu0  ;;  %v7662_v14 = vpop.f32.mrb[54].mxu1 }
 0x950   :  { %v7622_v55 = vpop.f32.mrb[55].mxu0  ;;  %v7663_v6 = vpop.f32.mrb[55].mxu1 }
 0x96d   :  { %v7908_v9 = vpop.f32.mrb[56].mxu0  ;;  %v7949_v2 = vpop.f32.mrb[56].mxu1 }
 0x96e   :  { %v7956_v18 = vadd.f32 %v7908_v9, %v7665_v17  ;;  %v7958_v27 = vadd.f32 %v7949_v2, %v7667_v59  ;;  %v7910_v32 = vpop.f32.mrb[57].mxu0  ;;  %v7951_v43 = vpop.f32.mrb[57].mxu1 }
 0x96f   :  { %v7957_v53 = vadd.f32 %v7910_v32, %v7666_v29  ;;  %v7959_v28 = vadd.f32 %v7951_v43, %v7668_v39  ;;  %v7912_v37 = vpop.f32.mrb[58].mxu0  ;;  %v7953_v40 = vpop.f32.mrb[58].mxu1 }
 0x970   :  { %v7913_v46 = vpop.f32.mrb[59].mxu0  ;;  %v7954_v38 = vpop.f32.mrb[59].mxu1 }
 0x98d   :  { %v8199_v12 = vpop.f32.mrb[60].mxu0  ;;  %v8240_v62 = vpop.f32.mrb[60].mxu1 }
 0x98e   :  { %v8247_v57 = vadd.f32 %v8199_v12, %v7956_v18  ;;  %v8249_v13 = vadd.f32 %v8240_v62, %v7958_v27  ;;  %v8201_v22 = vpop.f32.mrb[61].mxu0  ;;  %v8242_v24 = vpop.f32.mrb[61].mxu1 }
 0x98f   :  { %v8248_v30 = vadd.f32 %v8201_v22, %v7957_v53  ;;  %v8250_v45 = vadd.f32 %v8242_v24, %v7959_v28  ;;  %v8203_v47 = vpop.f32.mrb[62].mxu0  ;;  %v8244_v15 = vpop.f32.mrb[62].mxu1 }
 0x990   :  { %v8273_v8 = vadd.f32 %v8256_v50, %v8247_v57  ;;  %v8275_v0 = vadd.f32 %v8264_v41, %v8249_v13  ;;  %v8204_v56 = vpop.f32.mrb[63].mxu0  ;;  %v8245_v21 = vpop.f32.mrb[63].mxu1 }
 0x991   :  { %v8274_v25 = vadd.f32 %v8260_v33, %v8248_v30  ;;  %v8276_v36 = vadd.f32 %v8268_v42, %v8250_v45 }
 0x992   :  { %v8277_v23 = vmax.f32 %v8273_v8, 0.0  ;;  %v8279_v3 = vmax.f32 %v8275_v0, 0.0 }
 0x993   :  { %v8278_v51 = vmax.f32 %v8274_v25, 0.0  ;;  %v8280_v1 = vmax.f32 %v8276_v36, 0.0 }
 0x994   :  { %v8281_v48 = vpack.c.bf16 %v8277_v23, %v8277_v23  ;;  %v8283_v10 = vpack.c.bf16 %v8279_v3, %v8279_v3 }
 0x995   :  { %v8282_v44 = vpack.c.bf16 %v8278_v51, %v8278_v51  ;;  %v8284_v34 = vpack.c.bf16 %v8280_v1, %v8280_v1 }
 0x997   :  { %8580 = vmatprep.mubr.bf16.mxu0 %v8282_v44  ;;  %8620 = vmatprep.mubr.bf16.mxu1 %v8284_v34 }
 0x998   :  { %8581 = vmatmul.mubr.bf16.vlgmr.msra.gmra.mrb[64].mxu0 %v8281_v48  ;;  %8621 = vmatmul.mubr.bf16.vlgmr.msra.gmra.mrb[64].mxu1 %v8283_v10 }
 0xa6b   :  { %v10208_v19 = vpop.f32.mrb[64].mxu0  ;;  %v10230_v26 = vpop.f32.mrb[64].mxu1 }
 0xa6c   :  { %v10209_v54 = vpop.f32.mrb[65].mxu0  ;;  %v10231_v60 = vpop.f32.mrb[65].mxu1 }
 0xa6d   :  { %v10210_v52 = vadd.f32 %v10209_v54, %v10208_v19  ;;  %v10232_v7 = vadd.f32 %v10231_v60, %v10230_v26  ;;  %v10211_v17 = vpop.f32.mrb[66].mxu0  ;;  %v10233_v59 = vpop.f32.mrb[66].mxu1 }
 0xa6e   :  { %v10212_v63 = vpop.f32.mrb[67].mxu0  ;;  %v10234_v61 = vpop.f32.mrb[67].mxu1 }
 0xa6f   :  { %v8583_v29 = vadd.f32 %v10210_v52, %v9931_v49 }
 0xa71   :  { %v8623_v39 = vadd.f32 %v10232_v7, %v8583_v29 }
 0xa73   :  { %8628 = vst [vmem:[#allocation3] sm:$0x3] %v8623_v39 }
 0xa74   :  { %11631 = shalt.err (!%p11628_p5)
}
 0xa75   :  { %s11632_s16 = scalar_lea.hbm %s14513_s13, 32 }
 0xa76   :  { %p11633_p6 = scmp.ne.s32.totalorder %s14513_s13, %s11632_s16  ;;  %p11636_p7 = scmp.lt.u32.totalorder %s11632_s16, %s14513_s13 }
 0xa78   :  { %p11638_p8 = pnand %p11636_p7, %p11633_p6 }
 0xa7a   :  { %11641 = shalt.err (!%p11638_p8)
}
 0xa7b   :  { %8638 = dma.vmem_to_hbm [thread:$0]  %s8636_s30, 32, %s14513_s13, [#allocation4]  }
 0xa7c   :  { %11646 = dma.done.wait [#allocation4], 32  }
 0xa7d   :  { %11647 = vsyncadd [#allocation4], 4294967264 }
 0xa7e   :  { %8642 = vsyncpa [#allocation4], 1 }

</bundles_post_ra>
